<compile_context>
chip_gen: v7x
topology: tpu7x:2x2x1
jax: 0.10.0
libtpu: 0.0.40
codegen_flags: <defaults>
</compile_context>

<pallas_src>
import functools
import math

import numpy as np
import jax
import jax.numpy as jnp
from jax.experimental import pallas as pl
from jax.experimental.pallas import tpu as pltpu


# ----------------------------------------------------------------------------
# Kernel 1: fused QKV projection (one matmul), optional fused pre-LayerNorm,
#           q gets the 1/sqrt(d_k) scale, k/v stored as bf16.
# ----------------------------------------------------------------------------
def _qkv_kernel(x_ref, w_ref, g_ref, b_ref, q_ref, k_ref, v_ref,
                *, scale, eps, pre_norm, hd):
    x = x_ref[...]
    w = w_ref[...]
    if pre_norm:
        mu = jnp.mean(x, axis=-1, keepdims=True)
        d = x - mu
        var = jnp.mean(d * d, axis=-1, keepdims=True)
        xn = d * jax.lax.rsqrt(var + eps) * g_ref[...] + b_ref[...]
        q = jnp.dot(xn, w[:, :hd], preferred_element_type=jnp.float32)
        kv = jnp.dot(x, w[:, hd:], preferred_element_type=jnp.float32)
        k = kv[:, :hd]
        v = kv[:, hd:]
    else:
        y = jnp.dot(x, w, preferred_element_type=jnp.float32)
        q = y[:, :hd]
        k = y[:, hd:2 * hd]
        v = y[:, 2 * hd:]
    q_ref[...] = q * scale
    k_ref[...] = k.astype(k_ref.dtype)
    v_ref[...] = v.astype(v_ref.dtype)


def _qkv_pallas(x, w_qkv_t, ln_g, ln_b, scale, eps, pre_norm, block_rows=1024):
    N, D = x.shape
    HD3 = w_qkv_t.shape[1]
    HD = HD3 // 3
    bn = min(block_rows, N)
    kern = functools.partial(_qkv_kernel, scale=scale, eps=eps,
                             pre_norm=pre_norm, hd=HD)
    return pl.pallas_call(
        kern,
        out_shape=(jax.ShapeDtypeStruct((N, HD), jnp.float32),
                   jax.ShapeDtypeStruct((N, HD), jnp.bfloat16),
                   jax.ShapeDtypeStruct((N, HD), jnp.bfloat16)),
        grid_spec=pltpu.PrefetchScalarGridSpec(
            num_scalar_prefetch=0,
            grid=(pl.cdiv(N, bn),),
            in_specs=[pl.BlockSpec((bn, D), lambda i: (i, 0)),
                      pl.BlockSpec((D, HD3), lambda i: (0, 0)),
                      pl.BlockSpec((1, D), lambda i: (0, 0)),
                      pl.BlockSpec((1, D), lambda i: (0, 0))],
            out_specs=(pl.BlockSpec((bn, HD), lambda i: (i, 0)),
                       pl.BlockSpec((bn, HD), lambda i: (i, 0)),
                       pl.BlockSpec((bn, HD), lambda i: (i, 0))),
        ),
        compiler_params=pltpu.CompilerParams(dimension_semantics=("parallel",)),
    )(x, w_qkv_t, ln_g, ln_b)


# ----------------------------------------------------------------------------
# Kernel 2: prob-sparse measure M, L_K-tiled with running max / weighted-sum
#           accumulators.  Heads handled as static column slices (no transpose).
#           Output is lane-dense (B, H, L_Q).
# ----------------------------------------------------------------------------
def _m_kernel(q_ref, k_ref, cnt_ref, m_ref, mmax_sc, wsum_sc,
              *, n_head, d_k, inv_lk):
    kidx = pl.program_id(1)

    @pl.when(kidx == 0)
    def _():
        mmax_sc[...] = jnp.full_like(mmax_sc, -1e30)
        wsum_sc[...] = jnp.zeros_like(wsum_sc)

    q = q_ref[0]                                   # (L_Q, H*E) f32
    k = k_ref[0]                                   # (tk,  H*E) bf16
    cnt = cnt_ref[...].astype(jnp.float32)         # (tk, L_Q)  key-multiplicity
    valid = cnt > 0.0
    neg = jnp.float32(-1e30)

    for h in range(n_head):
        q_h = q[:, h * d_k:(h + 1) * d_k].astype(jnp.bfloat16)   # (L_Q, E)
        k_h = k[:, h * d_k:(h + 1) * d_k]                        # (tk,  E)
        s = jax.lax.dot_general(k_h, q_h, (((1,), (1,)), ((), ())),
                                preferred_element_type=jnp.float32)  # (tk, L_Q)
        tmax = jnp.max(jnp.where(valid, s, neg), axis=0, keepdims=True)
        tsum = jnp.sum(s * cnt, axis=0, keepdims=True)
        mmax_sc[pl.ds(h, 1), :] = jnp.maximum(mmax_sc[pl.ds(h, 1), :], tmax)
        wsum_sc[pl.ds(h, 1), :] = wsum_sc[pl.ds(h, 1), :] + tsum

    @pl.when(kidx == pl.num_programs(1) - 1)
    def _():
        m_ref[0] = mmax_sc[...] - wsum_sc[...] * inv_lk


def _m_scores_pallas(q3, k3, cnt_t, *, n_head, d_k, block_k=512):
    B, LQ, HD = q3.shape
    LK = k3.shape[1]
    # TODO(synk): if L_K is not a multiple of block_k, fall back to one tile
    # (padding the ragged tail of cnt would otherwise leak garbage into the max).
    tk = block_k if (LK > block_k and LK % block_k == 0) else LK
    kern = functools.partial(_m_kernel, n_head=n_head, d_k=d_k, inv_lk=1.0 / LK)
    return pl.pallas_call(
        kern,
        out_shape=jax.ShapeDtypeStruct((B, n_head, LQ), jnp.float32),
        grid_spec=pltpu.PrefetchScalarGridSpec(
            num_scalar_prefetch=0,
            grid=(B, pl.cdiv(LK, tk)),
            in_specs=[pl.BlockSpec((1, LQ, HD), lambda b, kk: (b, 0, 0)),
                      pl.BlockSpec((1, tk, HD), lambda b, kk: (b, kk, 0)),
                      pl.BlockSpec((tk, LQ), lambda b, kk: (kk, 0))],
            out_specs=pl.BlockSpec((1, n_head, LQ), lambda b, kk: (b, 0, 0)),
            scratch_shapes=[pltpu.VMEM((n_head, LQ), jnp.float32),
                            pltpu.VMEM((n_head, LQ), jnp.float32)],
        ),
        compiler_params=pltpu.CompilerParams(
            dimension_semantics=("parallel", "arbitrary"),
            vmem_limit_bytes=32 * 1024 * 1024,
        ),
    )(q3, k3, cnt_t)


# ----------------------------------------------------------------------------
# Kernel 3: softmax attention for the selected (top-u) queries + V mean.
#           Heads via static column slices; lane-dense (u, H*E) output.
# ----------------------------------------------------------------------------
def _attn_kernel(qr_ref, k_ref, v_ref, o_ref, vm_ref, *, n_head, d_k):
    qr = qr_ref[0]                                 # (u, H*E) f32
    k = k_ref[0]                                   # (L, H*E) bf16
    v = v_ref[0]                                   # (L, H*E) bf16
    outs = []
    for h in range(n_head):
        q_h = qr[:, h * d_k:(h + 1) * d_k].astype(jnp.bfloat16)
        k_h = k[:, h * d_k:(h + 1) * d_k]
        v_h = v[:, h * d_k:(h + 1) * d_k]
        s = jax.lax.dot_general(q_h, k_h, (((1,), (1,)), ((), ())),
                                preferred_element_type=jnp.float32)   # (u, L)
        smax = jnp.max(s, axis=-1, keepdims=True)
        p = jnp.exp(s - smax)
        denom = jnp.sum(p, axis=-1, keepdims=True)
        attn = p * pl.reciprocal(denom, approx=True)
        outs.append(jnp.dot(attn.astype(jnp.bfloat16), v_h,
                            preferred_element_type=jnp.float32))      # (u, E)
    o_ref[0] = jnp.concatenate(outs, axis=-1)                         # (u, H*E)
    vm_ref[0] = jnp.mean(v.astype(jnp.float32), axis=0, keepdims=True)


def _sparse_attn_pallas(q_red, k3, v3, *, n_head, d_k):
    B, U, HD = q_red.shape
    L = k3.shape[1]
    kern = functools.partial(_attn_kernel, n_head=n_head, d_k=d_k)
    return pl.pallas_call(
        kern,
        out_shape=(jax.ShapeDtypeStruct((B, U, HD), jnp.float32),
                   jax.ShapeDtypeStruct((B, 1, HD), jnp.float32)),
        grid_spec=pltpu.PrefetchScalarGridSpec(
            num_scalar_prefetch=0,
            grid=(B,),
            in_specs=[pl.BlockSpec((1, U, HD), lambda b: (b, 0, 0)),
                      pl.BlockSpec((1, L, HD), lambda b: (b, 0, 0)),
                      pl.BlockSpec((1, L, HD), lambda b: (b, 0, 0))],
            out_specs=(pl.BlockSpec((1, U, HD), lambda b: (b, 0, 0)),
                       pl.BlockSpec((1, 1, HD), lambda b: (b, 0, 0))),
        ),
        compiler_params=pltpu.CompilerParams(dimension_semantics=("parallel",)),
    )(q_red, k3, v3)


# ----------------------------------------------------------------------------
# Kernel 4: fc + bias + residual (+ LayerNorm when post-norm)
# ----------------------------------------------------------------------------
def _out_kernel(ctx_ref, w_ref, b_ref, res_ref, g_ref, beta_ref, o_ref,
                *, eps, apply_ln):
    y = jnp.dot(ctx_ref[...], w_ref[...], preferred_element_type=jnp.float32)
    y = y + b_ref[...] + res_ref[...]
    if apply_ln:
        mu = jnp.mean(y, axis=-1, keepdims=True)
        d = y - mu
        var = jnp.mean(d * d, axis=-1, keepdims=True)
        y = d * jax.lax.rsqrt(var + eps) * g_ref[...] + beta_ref[...]
    o_ref[...] = y


def _out_pallas(ctx, wfc_t, bfc, residual, gamma, beta, eps, apply_ln,
                block_rows=1024):
    N, HD = ctx.shape
    D = wfc_t.shape[1]
    bn = min(block_rows, N)
    kern = functools.partial(_out_kernel, eps=eps, apply_ln=apply_ln)
    return pl.pallas_call(
        kern,
        out_shape=jax.ShapeDtypeStruct((N, D), jnp.float32),
        grid_spec=pltpu.PrefetchScalarGridSpec(
            num_scalar_prefetch=0,
            grid=(pl.cdiv(N, bn),),
            in_specs=[pl.BlockSpec((bn, HD), lambda i: (i, 0)),
                      pl.BlockSpec((HD, D), lambda i: (0, 0)),
                      pl.BlockSpec((1, D), lambda i: (0, 0)),
                      pl.BlockSpec((bn, D), lambda i: (i, 0)),
                      pl.BlockSpec((1, D), lambda i: (0, 0)),
                      pl.BlockSpec((1, D), lambda i: (0, 0))],
            out_specs=pl.BlockSpec((bn, D), lambda i: (i, 0)),
        ),
        compiler_params=pltpu.CompilerParams(dimension_semantics=("parallel",)),
    )(ctx, wfc_t, bfc, residual, gamma, beta)


# ----------------------------------------------------------------------------
# Full forward pass (jit-compatible, everything stays on device)
# ----------------------------------------------------------------------------
def prob_sparse_attention(hidden, params, index_sample, *, n_head, d_k, factor,
                          normalize_before=False, eps=1e-6, return_aux=False):
    B, S, d_model = hidden.shape
    H, E = n_head, d_k
    HD = H * E
    u = min(int(factor * math.ceil(math.log(S))), S)   # n_top == sample_k here
    assert index_sample.shape == (S, u)

    x2d = hidden.reshape(B * S, d_model).astype(jnp.float32)
    scale = 1.0 / math.sqrt(d_k)
    w_qkv = jnp.concatenate([params["wq_t"], params["wk_t"], params["wv_t"]], axis=1)

    q2d, k2d, v2d = _qkv_pallas(x2d, w_qkv, params["ln_g"], params["ln_b"],
                                scale, eps, normalize_before)

    # cnt_t[j, i] = multiplicity of key j among query i's sampled keys
    # (scatter-add; shared by every batch / head, stored bf16 — counts <= u are exact)
    cnt_t = jnp.zeros((S, S), jnp.float32)
    cnt_t = cnt_t.at[index_sample, jnp.arange(S)[:, None]].add(1.0)
    cnt_t = cnt_t.astype(jnp.bfloat16)

    q3 = q2d.reshape(B, S, HD)
    k3 = k2d.reshape(B, S, HD)
    v3 = v2d.reshape(B, S, HD)

    M = _m_scores_pallas(q3, k3, cnt_t, n_head=H, d_k=E)          # (B, H, S)

    # TODO(synk): data-dependent top-k / row gather / scatter have no static-shape
    # Pallas equivalent; done on device with lax.top_k + jnp indexing (jit-friendly).
    top = jax.lax.top_k(M.reshape(B * H, S), u)[1]                # (B*H, u)
    top_bhu = top.reshape(B, H, u)
    top_t = jnp.transpose(top_bhu, (0, 2, 1))                     # (B, u, H)

    q4 = q2d.reshape(B, S, H, E)
    q_red = jnp.take_along_axis(q4, top_t[..., None], axis=1)     # (B, u, H, E)
    q_red = q_red.reshape(B, u, HD)

    upd, v_mean = _sparse_attn_pallas(q_red, k3, v3, n_head=H, d_k=E)

    context = jnp.broadcast_to(v_mean, (B, S, HD)).reshape(B, S, H, E)
    b_idx = jnp.arange(B)[:, None, None]
    h_idx = jnp.arange(H)[None, None, :]
    context = context.at[b_idx, top_t, h_idx].set(upd.reshape(B, u, H, E))
    ctx2d = context.reshape(B * S, HD)                            # already (B,S,H*E)

    # TODO(synk): dropout_fc is eval-mode identity in this forward translation.
    out2d = _out_pallas(ctx2d, params["wfc_t"], params["bfc"], x2d,
                        params["ln_g"], params["ln_b"], eps,
                        apply_ln=not normalize_before)
    out = out2d.reshape(B, S, d_model)
    if return_aux:
        return out, M.reshape(B * H, S), top
    return out


# ----------------------------------------------------------------------------
# Pure-JAX f32 reference (mirrors the PyTorch module; takes the top indices so
# the comparison is not sensitive to float ties in top-k)
# ----------------------------------------------------------------------------
def _reference(hidden, params, index_sample, top_index, *, n_head, d_k,
               normalize_before=False, eps=1e-6):
    B, S, d_model = hidden.shape
    H, E = n_head, d_k
    x = hidden.astype(jnp.float32)

    def ln(t):
        mu = t.mean(-1, keepdims=True)
        var = ((t - mu) ** 2).mean(-1, keepdims=True)
        return (t - mu) * jax.lax.rsqrt(var + eps) * params["ln_g"].reshape(-1) \
               + params["ln_b"].reshape(-1)

    q_in = ln(x) if normalize_before else x
    q = (q_in @ params["wq_t"]) / math.sqrt(d_k)
    k = x @ params["wk_t"]
    v = x @ params["wv_t"]

    def heads(t):
        return t.reshape(B, S, H, E).transpose(0, 2, 1, 3)

    q, k, v = heads(q), heads(k), heads(v)                         # (B,H,S,E)

    k_sample = k[:, :, index_sample, :]                            # (B,H,S,samp,E)
    qk_sample = jnp.einsum("bhie,bhije->bhij", q, k_sample)
    M = qk_sample.max(-1) - qk_sample.sum(-1) / S                  # (B,H,S)

    top = top_index.reshape(B, H, -1)
    q_red = jnp.take_along_axis(q, top[..., None], axis=2)         # (B,H,u,E)
    scores = jnp.einsum("bhue,bhke->bhuk", q_red, k)
    attn = jax.nn.softmax(scores, axis=-1)
    upd = jnp.einsum("bhuk,bhkd->bhud", attn, v)

    ctx = jnp.broadcast_to(v.mean(axis=2, keepdims=True), (B, H, S, E))
    b_idx = jnp.arange(B)[:, None, None]
    h_idx = jnp.arange(H)[None, :, None]
    ctx = ctx.at[b_idx, h_idx, top].set(upd)
    ctx = ctx.transpose(0, 2, 1, 3).reshape(B, S, H * E)

    out = ctx @ params["wfc_t"] + params["bfc"].reshape(-1)
    out = out + x
    if not normalize_before:
        out = ln(out)
    return out, M.reshape(B * H, S)


if __name__ == "__main__":
    B, S, d_model = 2, 64, 64
    n_head, d_k = 4, 16
    factor = 2
    normalize_before = False
    eps = 1e-6

    key = jax.random.PRNGKey(0)
    ks = jax.random.split(key, 8)
    hidden = jax.random.normal(ks[0], (B, S, d_model), dtype=jnp.float32)

    def xavier(k, shape):
        lim = math.sqrt(6.0 / (shape[0] + shape[1]))
        return jax.random.uniform(k, shape, jnp.float32, -lim, lim)

    params = {
        "wq_t": xavier(ks[1], (d_model, n_head * d_k)),
        "wk_t": xavier(ks[2], (d_model, n_head * d_k)),
        "wv_t": xavier(ks[3], (d_model, n_head * d_k)),
        "wfc_t": xavier(ks[4], (n_head * d_k, d_model)),
        "bfc": jax.random.uniform(ks[5], (1, d_model), jnp.float32, -0.1, 0.1),
        "ln_g": jnp.ones((1, d_model), jnp.float32),
        "ln_b": jnp.zeros((1, d_model), jnp.float32),
    }

    u = min(int(factor * math.ceil(math.log(S))), S)
    # TODO(synk): torch.randint's RNG stream cannot be reproduced bit-for-bit; the
    # sampling distribution (uniform ints in [0, L_K)) is matched with jax.random.
    index_sample = jax.random.randint(ks[6], (S, u), 0, S)

    fwd = jax.jit(functools.partial(
        prob_sparse_attention, n_head=n_head, d_k=d_k, factor=factor,
        normalize_before=normalize_before, eps=eps, return_aux=True))

    out, M, top = fwd(hidden, params, index_sample)
    jax.block_until_ready(out)

    ref_out, ref_M = _reference(hidden, params, index_sample, top,
                                n_head=n_head, d_k=d_k,
                                normalize_before=normalize_before, eps=eps)
    # Tolerances cover bf16 MXU operands / bf16-stored K,V vs the f32 reference.
    np.testing.assert_allclose(np.asarray(M), np.asarray(ref_M), rtol=5e-2, atol=5e-2)
    np.testing.assert_allclose(np.asarray(out), np.asarray(ref_out), rtol=5e-2, atol=5e-2)

    print("KERNEL_OK")
</pallas_src>

<mosaic_0001>
module attributes {stable_mosaic.version = 11 : i64} {
  func.func private @main(%arg0: i32) attributes {dimension_semantics = [#tpu.dimension_semantics<core_parallel>], iteration_bounds = array<i64: 2>, tpu.core_type = #tpu.core_type<sc_scalar_subcore>, window_params = []} {
    return
  }
}

module attributes {stable_mosaic.version = 11 : i64} {
  func.func private @main(%arg0: i32) attributes {dimension_semantics = [#tpu.dimension_semantics<core_parallel>], iteration_bounds = array<i64: 2>, tpu.core_type = #tpu.core_type<sc_scalar_subcore>, window_params = []} {
    return
  }
}

module attributes {stable_mosaic.version = 11 : i64} {
  func.func @_qkv_kernel(%arg0: i32, %arg1: memref<128x64xf32, #tpu.memory_space<vmem>>, %arg2: memref<64x192xf32, #tpu.memory_space<vmem>>, %arg3: memref<1x64xf32, #tpu.memory_space<vmem>>, %arg4: memref<1x64xf32, #tpu.memory_space<vmem>>, %arg5: memref<128x64xf32, #tpu.memory_space<vmem>>, %arg6: memref<128x64xbf16, #tpu.memory_space<vmem>>, %arg7: memref<128x64xbf16, #tpu.memory_space<vmem>>) attributes {dimension_semantics = [#tpu.dimension_semantics<parallel>], iteration_bounds = array<i64: 1>, scalar_prefetch = 0 : i64, scratch_operands = 0 : i64, tpu.core_type = #tpu.core_type<tc>, window_params = [{transform_indices = @transform_0, window_bounds = array<i64: 128, 64>}, {pipeline_mode = #tpu.pipeline_mode<synchronous>, transform_indices = @transform_1, window_bounds = array<i64: 64, 192>}, {pipeline_mode = #tpu.pipeline_mode<synchronous>, transform_indices = @transform_2, window_bounds = array<i64: 1, 64>}, {pipeline_mode = #tpu.pipeline_mode<synchronous>, transform_indices = @transform_3, window_bounds = array<i64: 1, 64>}, {transform_indices = @transform_4, window_bounds = array<i64: 128, 64>}, {transform_indices = @transform_5, window_bounds = array<i64: 128, 64>}, {transform_indices = @transform_6, window_bounds = array<i64: 128, 64>}]} {
    %c0 = arith.constant 0 : index
    %c0_0 = arith.constant 0 : index
    %0 = vector.load %arg1[%c0, %c0_0] : memref<128x64xf32, #tpu.memory_space<vmem>>, vector<128x64xf32>
    %c0_1 = arith.constant 0 : index
    %c0_2 = arith.constant 0 : index
    %1 = vector.load %arg2[%c0_1, %c0_2] : memref<64x192xf32, #tpu.memory_space<vmem>>, vector<64x192xf32>
    %cst = arith.constant dense<0.000000e+00> : vector<128x192xf32>
    %2 = tpu.matmul %0, %1, %cst {dimension_numbers = #tpu.dot_dimension_numbers<[1], [0], [0], [1], [0, 0, 1, 1], [], []>} : vector<128x64xf32>, vector<64x192xf32>, vector<128x192xf32> -> vector<128x192xf32>
    %3 = vector.extract_strided_slice %2 {offsets = [0, 0], sizes = [128, 64], strides = [1, 1]} : vector<128x192xf32> to vector<128x64xf32>
    %4 = vector.extract_strided_slice %2 {offsets = [0, 64], sizes = [128, 64], strides = [1, 1]} : vector<128x192xf32> to vector<128x64xf32>
    %5 = vector.extract_strided_slice %2 {offsets = [0, 128], sizes = [128, 64], strides = [1, 1]} : vector<128x192xf32> to vector<128x64xf32>
    %cst_3 = arith.constant 2.500000e-01 : f32
    %6 = vector.broadcast %cst_3 : f32 to vector<128x64xf32>
    %7 = arith.mulf %3, %6 : vector<128x64xf32>
    %c0_4 = arith.constant 0 : index
    %c0_5 = arith.constant 0 : index
    %8 = vector.load %arg5[%c0_4, %c0_5] : memref<128x64xf32, #tpu.memory_space<vmem>>, vector<128x64xf32>
    tpu.vector_store %arg5[%c0_4, %c0_5], %7 {strides = array<i32>} : memref<128x64xf32, #tpu.memory_space<vmem>>, vector<128x64xf32>,
    %9 = arith.truncf %4 : vector<128x64xf32> to vector<128x64xbf16>
    %c0_6 = arith.constant 0 : index
    %c0_7 = arith.constant 0 : index
    %10 = vector.load %arg6[%c0_6, %c0_7] : memref<128x64xbf16, #tpu.memory_space<vmem>>, vector<128x64xbf16>
    tpu.vector_store %arg6[%c0_6, %c0_7], %9 {strides = array<i32>} : memref<128x64xbf16, #tpu.memory_space<vmem>>, vector<128x64xbf16>,
    %11 = arith.truncf %5 : vector<128x64xf32> to vector<128x64xbf16>
    %c0_8 = arith.constant 0 : index
    %c0_9 = arith.constant 0 : index
    %12 = vector.load %arg7[%c0_8, %c0_9] : memref<128x64xbf16, #tpu.memory_space<vmem>>, vector<128x64xbf16>
    tpu.vector_store %arg7[%c0_8, %c0_9], %11 {strides = array<i32>} : memref<128x64xbf16, #tpu.memory_space<vmem>>, vector<128x64xbf16>,
    return
  }
  func.func @transform_0(%arg0: i32) -> (i32, i32) {
    %c0_i32 = arith.constant 0 : i32
    %c0_i32_0 = arith.constant 0 : i32
    return %arg0, %c0_i32 : i32, i32
  }
  func.func @transform_1(%arg0: i32) -> (i32, i32) {
    %c0_i32 = arith.constant 0 : i32
    %c0_i32_0 = arith.constant 0 : i32
    %c0_i32_1 = arith.constant 0 : i32
    return %c0_i32, %c0_i32_0 : i32, i32
  }
  func.func @transform_2(%arg0: i32) -> (i32, i32) {
    %c0_i32 = arith.constant 0 : i32
    %c0_i32_0 = arith.constant 0 : i32
    %c0_i32_1 = arith.constant 0 : i32
    return %c0_i32, %c0_i32_0 : i32, i32
  }
  func.func @transform_3(%arg0: i32) -> (i32, i32) {
    %c0_i32 = arith.constant 0 : i32
    %c0_i32_0 = arith.constant 0 : i32
    %c0_i32_1 = arith.constant 0 : i32
    return %c0_i32, %c0_i32_0 : i32, i32
  }
  func.func @transform_4(%arg0: i32) -> (i32, i32) {
    %c0_i32 = arith.constant 0 : i32
    %c0_i32_0 = arith.constant 0 : i32
    return %arg0, %c0_i32 : i32, i32
  }
  func.func @transform_5(%arg0: i32) -> (i32, i32) {
    %c0_i32 = arith.constant 0 : i32
    %c0_i32_0 = arith.constant 0 : i32
    return %arg0, %c0_i32 : i32, i32
  }
  func.func @transform_6(%arg0: i32) -> (i32, i32) {
    %c0_i32 = arith.constant 0 : i32
    %c0_i32_0 = arith.constant 0 : i32
    return %arg0, %c0_i32 : i32, i32
  }
}

module attributes {stable_mosaic.version = 11 : i64} {
  func.func @_m_kernel(%arg0: i32, %arg1: i32, %arg2: memref<1x64x64xf32, #tpu.memory_space<vmem>>, %arg3: memref<1x64x64xbf16, #tpu.memory_space<vmem>>, %arg4: memref<64x64xbf16, #tpu.memory_space<vmem>>, %arg5: memref<1x4x64xf32, #tpu.memory_space<vmem>>, %arg6: memref<4x64xf32, #tpu.memory_space<vmem>>, %arg7: memref<4x64xf32, #tpu.memory_space<vmem>>) attributes {dimension_semantics = [#tpu.dimension_semantics<parallel>, #tpu.dimension_semantics<arbitrary>], iteration_bounds = array<i64: 2, 1>, scalar_prefetch = 0 : i64, scratch_operands = 2 : i64, tpu.core_type = #tpu.core_type<tc>, window_params = [{transform_indices = @transform_0, window_bounds = array<i64: 1, 64, 64>}, {transform_indices = @transform_1, window_bounds = array<i64: 1, 64, 64>}, {transform_indices = @transform_2, window_bounds = array<i64: 64, 64>}, {transform_indices = @transform_3, window_bounds = array<i64: 1, 4, 64>}]} {
    %c0_i32 = arith.constant 0 : i32
    %0 = arith.cmpi eq, %arg1, %c0_i32 : i32
    %1 = arith.extui %0 : i1 to i32
    %c0_i32_0 = arith.constant 0 : i32
    %2 = arith.cmpi ne, %1, %c0_i32_0 : i32
    scf.if %2 {
      %cst_55 = arith.constant -1.000000e+30 : f32
      %82 = vector.broadcast %cst_55 : f32 to vector<4x64xf32>
      %c0_56 = arith.constant 0 : index
      %c0_57 = arith.constant 0 : index
      %83 = vector.load %arg6[%c0_56, %c0_57] : memref<4x64xf32, #tpu.memory_space<vmem>>, vector<4x64xf32>
      tpu.vector_store %arg6[%c0_56, %c0_57], %82 {strides = array<i32>} : memref<4x64xf32, #tpu.memory_space<vmem>>, vector<4x64xf32>,
      %cst_58 = arith.constant 0.000000e+00 : f32
      %84 = vector.broadcast %cst_58 : f32 to vector<4x64xf32>
      %c0_59 = arith.constant 0 : index
      %c0_60 = arith.constant 0 : index
      %85 = vector.load %arg7[%c0_59, %c0_60] : memref<4x64xf32, #tpu.memory_space<vmem>>, vector<4x64xf32>
      tpu.vector_store %arg7[%c0_59, %c0_60], %84 {strides = array<i32>} : memref<4x64xf32, #tpu.memory_space<vmem>>, vector<4x64xf32>,
    } else {
    }
    %c0 = arith.constant 0 : index
    %c0_1 = arith.constant 0 : index
    %c0_2 = arith.constant 0 : index
    %3 = vector.load %arg2[%c0, %c0_1, %c0_2] : memref<1x64x64xf32, #tpu.memory_space<vmem>>, vector<1x64x64xf32>
    %4 = vector.shape_cast %3 : vector<1x64x64xf32> to vector<64x64xf32>
    %c0_3 = arith.constant 0 : index
    %c0_4 = arith.constant 0 : index
    %c0_5 = arith.constant 0 : index
    %5 = vector.load %arg3[%c0_3, %c0_4, %c0_5] : memref<1x64x64xbf16, #tpu.memory_space<vmem>>, vector<1x64x64xbf16>
    %6 = vector.shape_cast %5 : vector<1x64x64xbf16> to vector<64x64xbf16>
    %c0_6 = arith.constant 0 : index
    %c0_7 = arith.constant 0 : index
    %7 = vector.load %arg4[%c0_6, %c0_7] : memref<64x64xbf16, #tpu.memory_space<vmem>>, vector<64x64xbf16>
    %8 = arith.extf %7 : vector<64x64xbf16> to vector<64x64xf32>
    %cst = arith.constant 0.000000e+00 : f32
    %9 = vector.broadcast %cst : f32 to vector<64x64xf32>
    %10 = arith.cmpf ogt, %8, %9 : vector<64x64xf32>
    %11 = vector.extract_strided_slice %4 {offsets = [0, 0], sizes = [64, 16], strides = [1, 1]} : vector<64x64xf32> to vector<64x16xf32>
    %12 = arith.truncf %11 : vector<64x16xf32> to vector<64x16xbf16>
    %13 = vector.extract_strided_slice %6 {offsets = [0, 0], sizes = [64, 16], strides = [1, 1]} : vector<64x64xbf16> to vector<64x16xbf16>
    %cst_8 = arith.constant dense<0.000000e+00> : vector<64x64xf32>
    %14 = tpu.matmul %13, %12, %cst_8 {dimension_numbers = #tpu.dot_dimension_numbers<[1], [1], [0], [0], [0, 0, 1, 0], [], []>} : vector<64x16xbf16>, vector<64x16xbf16>, vector<64x64xf32> -> vector<64x64xf32>
    %cst_9 = arith.constant -1.000000e+30 : f32
    %15 = vector.broadcast %cst_9 : f32 to vector<64x64xf32>
    %16 = arith.select %10, %14, %15 : vector<64x64xi1>, vector<64x64xf32>
    %cst_10 = arith.constant dense<0xFF800000> : vector<64xf32>
    %17 = vector.multi_reduction <maximumf>, %16, %cst_10 [0] : vector<64x64xf32> to vector<64xf32>
    %18 = vector.shape_cast %17 : vector<64xf32> to vector<1x64xf32>
    %19 = arith.mulf %14, %8 : vector<64x64xf32>
    %cst_11 = arith.constant dense<0.000000e+00> : vector<64xf32>
    %20 = vector.multi_reduction <add>, %19, %cst_11 [0] : vector<64x64xf32> to vector<64xf32>
    %21 = vector.shape_cast %20 : vector<64xf32> to vector<1x64xf32>
    %c0_12 = arith.constant 0 : index
    %c0_13 = arith.constant 0 : index
    %22 = vector.load %arg6[%c0_12, %c0_13] : memref<4x64xf32, #tpu.memory_space<vmem>>, vector<1x64xf32>
    %23 = arith.maximumf %22, %18 : vector<1x64xf32>
    %c0_14 = arith.constant 0 : index
    %c0_15 = arith.constant 0 : index
    %24 = vector.load %arg6[%c0_14, %c0_15] : memref<4x64xf32, #tpu.memory_space<vmem>>, vector<1x64xf32>
    tpu.vector_store %arg6[%c0_14, %c0_15], %23 {strides = array<i32>} : memref<4x64xf32, #tpu.memory_space<vmem>>, vector<1x64xf32>,
    %c0_16 = arith.constant 0 : index
    %c0_17 = arith.constant 0 : index
    %25 = vector.load %arg7[%c0_16, %c0_17] : memref<4x64xf32, #tpu.memory_space<vmem>>, vector<1x64xf32>
    %26 = arith.addf %25, %21 : vector<1x64xf32>
    %c0_18 = arith.constant 0 : index
    %c0_19 = arith.constant 0 : index
    %27 = vector.load %arg7[%c0_18, %c0_19] : memref<4x64xf32, #tpu.memory_space<vmem>>, vector<1x64xf32>
    tpu.vector_store %arg7[%c0_18, %c0_19], %26 {strides = array<i32>} : memref<4x64xf32, #tpu.memory_space<vmem>>, vector<1x64xf32>,
    %28 = vector.extract_strided_slice %4 {offsets = [0, 16], sizes = [64, 16], strides = [1, 1]} : vector<64x64xf32> to vector<64x16xf32>
    %29 = arith.truncf %28 : vector<64x16xf32> to vector<64x16xbf16>
    %30 = vector.extract_strided_slice %6 {offsets = [0, 16], sizes = [64, 16], strides = [1, 1]} : vector<64x64xbf16> to vector<64x16xbf16>
    %cst_20 = arith.constant dense<0.000000e+00> : vector<64x64xf32>
    %31 = tpu.matmul %30, %29, %cst_20 {dimension_numbers = #tpu.dot_dimension_numbers<[1], [1], [0], [0], [0, 0, 1, 0], [], []>} : vector<64x16xbf16>, vector<64x16xbf16>, vector<64x64xf32> -> vector<64x64xf32>
    %cst_21 = arith.constant -1.000000e+30 : f32
    %32 = vector.broadcast %cst_21 : f32 to vector<64x64xf32>
    %33 = arith.select %10, %31, %32 : vector<64x64xi1>, vector<64x64xf32>
    %cst_22 = arith.constant dense<0xFF800000> : vector<64xf32>
    %34 = vector.multi_reduction <maximumf>, %33, %cst_22 [0] : vector<64x64xf32> to vector<64xf32>
    %35 = vector.shape_cast %34 : vector<64xf32> to vector<1x64xf32>
    %36 = arith.mulf %31, %8 : vector<64x64xf32>
    %cst_23 = arith.constant dense<0.000000e+00> : vector<64xf32>
    %37 = vector.multi_reduction <add>, %36, %cst_23 [0] : vector<64x64xf32> to vector<64xf32>
    %38 = vector.shape_cast %37 : vector<64xf32> to vector<1x64xf32>
    %c1 = arith.constant 1 : index
    %c0_24 = arith.constant 0 : index
    %39 = vector.load %arg6[%c1, %c0_24] : memref<4x64xf32, #tpu.memory_space<vmem>>, vector<1x64xf32>
    %40 = arith.maximumf %39, %35 : vector<1x64xf32>
    %c1_25 = arith.constant 1 : index
    %c0_26 = arith.constant 0 : index
    %41 = vector.load %arg6[%c1_25, %c0_26] : memref<4x64xf32, #tpu.memory_space<vmem>>, vector<1x64xf32>
    tpu.vector_store %arg6[%c1_25, %c0_26], %40 {strides = array<i32>} : memref<4x64xf32, #tpu.memory_space<vmem>>, vector<1x64xf32>,
    %c1_27 = arith.constant 1 : index
    %c0_28 = arith.constant 0 : index
    %42 = vector.load %arg7[%c1_27, %c0_28] : memref<4x64xf32, #tpu.memory_space<vmem>>, vector<1x64xf32>
    %43 = arith.addf %42, %38 : vector<1x64xf32>
    %c1_29 = arith.constant 1 : index
    %c0_30 = arith.constant 0 : index
    %44 = vector.load %arg7[%c1_29, %c0_30] : memref<4x64xf32, #tpu.memory_space<vmem>>, vector<1x64xf32>
    tpu.vector_store %arg7[%c1_29, %c0_30], %43 {strides = array<i32>} : memref<4x64xf32, #tpu.memory_space<vmem>>, vector<1x64xf32>,
    %45 = vector.extract_strided_slice %4 {offsets = [0, 32], sizes = [64, 16], strides = [1, 1]} : vector<64x64xf32> to vector<64x16xf32>
    %46 = arith.truncf %45 : vector<64x16xf32> to vector<64x16xbf16>
    %47 = vector.extract_strided_slice %6 {offsets = [0, 32], sizes = [64, 16], strides = [1, 1]} : vector<64x64xbf16> to vector<64x16xbf16>
    %cst_31 = arith.constant dense<0.000000e+00> : vector<64x64xf32>
    %48 = tpu.matmul %47, %46, %cst_31 {dimension_numbers = #tpu.dot_dimension_numbers<[1], [1], [0], [0], [0, 0, 1, 0], [], []>} : vector<64x16xbf16>, vector<64x16xbf16>, vector<64x64xf32> -> vector<64x64xf32>
    %cst_32 = arith.constant -1.000000e+30 : f32
    %49 = vector.broadcast %cst_32 : f32 to vector<64x64xf32>
    %50 = arith.select %10, %48, %49 : vector<64x64xi1>, vector<64x64xf32>
    %cst_33 = arith.constant dense<0xFF800000> : vector<64xf32>
    %51 = vector.multi_reduction <maximumf>, %50, %cst_33 [0] : vector<64x64xf32> to vector<64xf32>
    %52 = vector.shape_cast %51 : vector<64xf32> to vector<1x64xf32>
    %53 = arith.mulf %48, %8 : vector<64x64xf32>
    %cst_34 = arith.constant dense<0.000000e+00> : vector<64xf32>
    %54 = vector.multi_reduction <add>, %53, %cst_34 [0] : vector<64x64xf32> to vector<64xf32>
    %55 = vector.shape_cast %54 : vector<64xf32> to vector<1x64xf32>
    %c2 = arith.constant 2 : index
    %c0_35 = arith.constant 0 : index
    %56 = vector.load %arg6[%c2, %c0_35] : memref<4x64xf32, #tpu.memory_space<vmem>>, vector<1x64xf32>
    %57 = arith.maximumf %56, %52 : vector<1x64xf32>
    %c2_36 = arith.constant 2 : index
    %c0_37 = arith.constant 0 : index
    %58 = vector.load %arg6[%c2_36, %c0_37] : memref<4x64xf32, #tpu.memory_space<vmem>>, vector<1x64xf32>
    tpu.vector_store %arg6[%c2_36, %c0_37], %57 {strides = array<i32>} : memref<4x64xf32, #tpu.memory_space<vmem>>, vector<1x64xf32>,
    %c2_38 = arith.constant 2 : index
    %c0_39 = arith.constant 0 : index
    %59 = vector.load %arg7[%c2_38, %c0_39] : memref<4x64xf32, #tpu.memory_space<vmem>>, vector<1x64xf32>
    %60 = arith.addf %59, %55 : vector<1x64xf32>
    %c2_40 = arith.constant 2 : index
    %c0_41 = arith.constant 0 : index
    %61 = vector.load %arg7[%c2_40, %c0_41] : memref<4x64xf32, #tpu.memory_space<vmem>>, vector<1x64xf32>
    tpu.vector_store %arg7[%c2_40, %c0_41], %60 {strides = array<i32>} : memref<4x64xf32, #tpu.memory_space<vmem>>, vector<1x64xf32>,
    %62 = vector.extract_strided_slice %4 {offsets = [0, 48], sizes = [64, 16], strides = [1, 1]} : vector<64x64xf32> to vector<64x16xf32>
    %63 = arith.truncf %62 : vector<64x16xf32> to vector<64x16xbf16>
    %64 = vector.extract_strided_slice %6 {offsets = [0, 48], sizes = [64, 16], strides = [1, 1]} : vector<64x64xbf16> to vector<64x16xbf16>
    %cst_42 = arith.constant dense<0.000000e+00> : vector<64x64xf32>
    %65 = tpu.matmul %64, %63, %cst_42 {dimension_numbers = #tpu.dot_dimension_numbers<[1], [1], [0], [0], [0, 0, 1, 0], [], []>} : vector<64x16xbf16>, vector<64x16xbf16>, vector<64x64xf32> -> vector<64x64xf32>
    %cst_43 = arith.constant -1.000000e+30 : f32
    %66 = vector.broadcast %cst_43 : f32 to vector<64x64xf32>
    %67 = arith.select %10, %65, %66 : vector<64x64xi1>, vector<64x64xf32>
    %cst_44 = arith.constant dense<0xFF800000> : vector<64xf32>
    %68 = vector.multi_reduction <maximumf>, %67, %cst_44 [0] : vector<64x64xf32> to vector<64xf32>
    %69 = vector.shape_cast %68 : vector<64xf32> to vector<1x64xf32>
    %70 = arith.mulf %65, %8 : vector<64x64xf32>
    %cst_45 = arith.constant dense<0.000000e+00> : vector<64xf32>
    %71 = vector.multi_reduction <add>, %70, %cst_45 [0] : vector<64x64xf32> to vector<64xf32>
    %72 = vector.shape_cast %71 : vector<64xf32> to vector<1x64xf32>
    %c3 = arith.constant 3 : index
    %c0_46 = arith.constant 0 : index
    %73 = vector.load %arg6[%c3, %c0_46] : memref<4x64xf32, #tpu.memory_space<vmem>>, vector<1x64xf32>
    %74 = arith.maximumf %73, %69 : vector<1x64xf32>
    %c3_47 = arith.constant 3 : index
    %c0_48 = arith.constant 0 : index
    %75 = vector.load %arg6[%c3_47, %c0_48] : memref<4x64xf32, #tpu.memory_space<vmem>>, vector<1x64xf32>
    tpu.vector_store %arg6[%c3_47, %c0_48], %74 {strides = array<i32>} : memref<4x64xf32, #tpu.memory_space<vmem>>, vector<1x64xf32>,
    %c3_49 = arith.constant 3 : index
    %c0_50 = arith.constant 0 : index
    %76 = vector.load %arg7[%c3_49, %c0_50] : memref<4x64xf32, #tpu.memory_space<vmem>>, vector<1x64xf32>
    %77 = arith.addf %76, %72 : vector<1x64xf32>
    %c3_51 = arith.constant 3 : index
    %c0_52 = arith.constant 0 : index
    %78 = vector.load %arg7[%c3_51, %c0_52] : memref<4x64xf32, #tpu.memory_space<vmem>>, vector<1x64xf32>
    tpu.vector_store %arg7[%c3_51, %c0_52], %77 {strides = array<i32>} : memref<4x64xf32, #tpu.memory_space<vmem>>, vector<1x64xf32>,
    %c0_i32_53 = arith.constant 0 : i32
    %79 = arith.cmpi eq, %arg1, %c0_i32_53 : i32
    %80 = arith.extui %79 : i1 to i32
    %c0_i32_54 = arith.constant 0 : i32
    %81 = arith.cmpi ne, %80, %c0_i32_54 : i32
    scf.if %81 {
      %c0_55 = arith.constant 0 : index
      %c0_56 = arith.constant 0 : index
      %82 = vector.load %arg6[%c0_55, %c0_56] : memref<4x64xf32, #tpu.memory_space<vmem>>, vector<4x64xf32>
      %c0_57 = arith.constant 0 : index
      %c0_58 = arith.constant 0 : index
      %83 = vector.load %arg7[%c0_57, %c0_58] : memref<4x64xf32, #tpu.memory_space<vmem>>, vector<4x64xf32>
      %cst_59 = arith.constant 1.562500e-02 : f32
      %84 = vector.broadcast %cst_59 : f32 to vector<4x64xf32>
      %85 = arith.mulf %83, %84 : vector<4x64xf32>
      %86 = arith.subf %82, %85 : vector<4x64xf32>
      %c0_60 = arith.constant 0 : index
      %c0_61 = arith.constant 0 : index
      %c0_62 = arith.constant 0 : index
      %87 = vector.load %arg5[%c0_60, %c0_61, %c0_62] : memref<1x4x64xf32, #tpu.memory_space<vmem>>, vector<1x4x64xf32>
      %88 = vector.shape_cast %87 : vector<1x4x64xf32> to vector<4x64xf32>
      %89 = vector.shape_cast %86 : vector<4x64xf32> to vector<1x4x64xf32>
      tpu.vector_store %arg5[%c0_60, %c0_61, %c0_62], %89 {strides = array<i32>} : memref<1x4x64xf32, #tpu.memory_space<vmem>>, vector<1x4x64xf32>,
    } else {
    }
    return
  }
  func.func @transform_0(%arg0: i32, %arg1: i32) -> (i32, i32, i32) {
    %c0_i32 = arith.constant 0 : i32
    %c0_i32_0 = arith.constant 0 : i32
    %c0_i32_1 = arith.constant 0 : i32
    return %arg0, %c0_i32, %c0_i32_0 : i32, i32, i32
  }
  func.func @transform_1(%arg0: i32, %arg1: i32) -> (i32, i32, i32) {
    %c0_i32 = arith.constant 0 : i32
    %c0_i32_0 = arith.constant 0 : i32
    return %arg0, %arg1, %c0_i32 : i32, i32, i32
  }
  func.func @transform_2(%arg0: i32, %arg1: i32) -> (i32, i32) {
    %c0_i32 = arith.constant 0 : i32
    %c0_i32_0 = arith.constant 0 : i32
    return %arg1, %c0_i32 : i32, i32
  }
  func.func @transform_3(%arg0: i32, %arg1: i32) -> (i32, i32, i32) {
    %c0_i32 = arith.constant 0 : i32
    %c0_i32_0 = arith.constant 0 : i32
    %c0_i32_1 = arith.constant 0 : i32
    return %arg0, %c0_i32, %c0_i32_0 : i32, i32, i32
  }
}

module attributes {stable_mosaic.version = 11 : i64} {
  func.func @_attn_kernel(%arg0: i32, %arg1: memref<1x10x64xf32, #tpu.memory_space<vmem>>, %arg2: memref<1x64x64xbf16, #tpu.memory_space<vmem>>, %arg3: memref<1x64x64xbf16, #tpu.memory_space<vmem>>, %arg4: memref<1x10x64xf32, #tpu.memory_space<vmem>>, %arg5: memref<1x1x64xf32, #tpu.memory_space<vmem>>) attributes {dimension_semantics = [#tpu.dimension_semantics<parallel>], iteration_bounds = array<i64: 2>, scalar_prefetch = 0 : i64, scratch_operands = 0 : i64, tpu.core_type = #tpu.core_type<tc>, window_params = [{transform_indices = @transform_0, window_bounds = array<i64: 1, 10, 64>}, {transform_indices = @transform_1, window_bounds = array<i64: 1, 64, 64>}, {transform_indices = @transform_2, window_bounds = array<i64: 1, 64, 64>}, {transform_indices = @transform_3, window_bounds = array<i64: 1, 10, 64>}, {transform_indices = @transform_4, window_bounds = array<i64: 1, 1, 64>}]} {
    %c0 = arith.constant 0 : index
    %c0_0 = arith.constant 0 : index
    %c0_1 = arith.constant 0 : index
    %0 = vector.load %arg1[%c0, %c0_0, %c0_1] : memref<1x10x64xf32, #tpu.memory_space<vmem>>, vector<1x10x64xf32>
    %1 = vector.shape_cast %0 : vector<1x10x64xf32> to vector<10x64xf32>
    %c0_2 = arith.constant 0 : index
    %c0_3 = arith.constant 0 : index
    %c0_4 = arith.constant 0 : index
    %2 = vector.load %arg2[%c0_2, %c0_3, %c0_4] : memref<1x64x64xbf16, #tpu.memory_space<vmem>>, vector<1x64x64xbf16>
    %3 = vector.shape_cast %2 : vector<1x64x64xbf16> to vector<64x64xbf16>
    %c0_5 = arith.constant 0 : index
    %c0_6 = arith.constant 0 : index
    %c0_7 = arith.constant 0 : index
    %4 = vector.load %arg3[%c0_5, %c0_6, %c0_7] : memref<1x64x64xbf16, #tpu.memory_space<vmem>>, vector<1x64x64xbf16>
    %5 = vector.shape_cast %4 : vector<1x64x64xbf16> to vector<64x64xbf16>
    %6 = vector.extract_strided_slice %1 {offsets = [0, 0], sizes = [10, 16], strides = [1, 1]} : vector<10x64xf32> to vector<10x16xf32>
    %7 = arith.truncf %6 : vector<10x16xf32> to vector<10x16xbf16>
    %8 = vector.extract_strided_slice %3 {offsets = [0, 0], sizes = [64, 16], strides = [1, 1]} : vector<64x64xbf16> to vector<64x16xbf16>
    %9 = vector.extract_strided_slice %5 {offsets = [0, 0], sizes = [64, 16], strides = [1, 1]} : vector<64x64xbf16> to vector<64x16xbf16>
    %cst = arith.constant dense<0.000000e+00> : vector<10x64xf32>
    %10 = tpu.matmul %7, %8, %cst {dimension_numbers = #tpu.dot_dimension_numbers<[1], [1], [0], [0], [0, 0, 1, 0], [], []>} : vector<10x16xbf16>, vector<64x16xbf16>, vector<10x64xf32> -> vector<10x64xf32>
    %cst_8 = arith.constant dense<0xFF800000> : vector<10xf32>
    %11 = vector.multi_reduction <maximumf>, %10, %cst_8 [1] : vector<10x64xf32> to vector<10xf32>
    %12 = vector.shape_cast %11 : vector<10xf32> to vector<10x1xf32>
    %13 = vector.broadcast %12 : vector<10x1xf32> to vector<10x64xf32>
    %14 = arith.subf %10, %13 : vector<10x64xf32>
    %15 = math.exp %14 : vector<10x64xf32>
    %cst_9 = arith.constant dense<0.000000e+00> : vector<10xf32>
    %16 = vector.multi_reduction <add>, %15, %cst_9 [1] : vector<10x64xf32> to vector<10xf32>
    %17 = vector.shape_cast %16 : vector<10xf32> to vector<10x1xf32>
    %18 = tpu.reciprocal %17 {approx = true} : vector<10x1xf32> -> vector<10x1xf32>
    %19 = vector.broadcast %18 : vector<10x1xf32> to vector<10x64xf32>
    %20 = arith.mulf %15, %19 : vector<10x64xf32>
    %21 = arith.truncf %20 : vector<10x64xf32> to vector<10x64xbf16>
    %cst_10 = arith.constant dense<0.000000e+00> : vector<10x16xf32>
    %22 = tpu.matmul %21, %9, %cst_10 {dimension_numbers = #tpu.dot_dimension_numbers<[1], [0], [0], [1], [0, 0, 1, 1], [], []>} : vector<10x64xbf16>, vector<64x16xbf16>, vector<10x16xf32> -> vector<10x16xf32>
    %23 = vector.extract_strided_slice %1 {offsets = [0, 16], sizes = [10, 16], strides = [1, 1]} : vector<10x64xf32> to vector<10x16xf32>
    %24 = arith.truncf %23 : vector<10x16xf32> to vector<10x16xbf16>
    %25 = vector.extract_strided_slice %3 {offsets = [0, 16], sizes = [64, 16], strides = [1, 1]} : vector<64x64xbf16> to vector<64x16xbf16>
    %26 = vector.extract_strided_slice %5 {offsets = [0, 16], sizes = [64, 16], strides = [1, 1]} : vector<64x64xbf16> to vector<64x16xbf16>
    %cst_11 = arith.constant dense<0.000000e+00> : vector<10x64xf32>
    %27 = tpu.matmul %24, %25, %cst_11 {dimension_numbers = #tpu.dot_dimension_numbers<[1], [1], [0], [0], [0, 0, 1, 0], [], []>} : vector<10x16xbf16>, vector<64x16xbf16>, vector<10x64xf32> -> vector<10x64xf32>
    %cst_12 = arith.constant dense<0xFF800000> : vector<10xf32>
    %28 = vector.multi_reduction <maximumf>, %27, %cst_12 [1] : vector<10x64xf32> to vector<10xf32>
    %29 = vector.shape_cast %28 : vector<10xf32> to vector<10x1xf32>
    %30 = vector.broadcast %29 : vector<10x1xf32> to vector<10x64xf32>
    %31 = arith.subf %27, %30 : vector<10x64xf32>
    %32 = math.exp %31 : vector<10x64xf32>
    %cst_13 = arith.constant dense<0.000000e+00> : vector<10xf32>
    %33 = vector.multi_reduction <add>, %32, %cst_13 [1] : vector<10x64xf32> to vector<10xf32>
    %34 = vector.shape_cast %33 : vector<10xf32> to vector<10x1xf32>
    %35 = tpu.reciprocal %34 {approx = true} : vector<10x1xf32> -> vector<10x1xf32>
    %36 = vector.broadcast %35 : vector<10x1xf32> to vector<10x64xf32>
    %37 = arith.mulf %32, %36 : vector<10x64xf32>
    %38 = arith.truncf %37 : vector<10x64xf32> to vector<10x64xbf16>
    %cst_14 = arith.constant dense<0.000000e+00> : vector<10x16xf32>
    %39 = tpu.matmul %38, %26, %cst_14 {dimension_numbers = #tpu.dot_dimension_numbers<[1], [0], [0], [1], [0, 0, 1, 1], [], []>} : vector<10x64xbf16>, vector<64x16xbf16>, vector<10x16xf32> -> vector<10x16xf32>
    %40 = vector.extract_strided_slice %1 {offsets = [0, 32], sizes = [10, 16], strides = [1, 1]} : vector<10x64xf32> to vector<10x16xf32>
    %41 = arith.truncf %40 : vector<10x16xf32> to vector<10x16xbf16>
    %42 = vector.extract_strided_slice %3 {offsets = [0, 32], sizes = [64, 16], strides = [1, 1]} : vector<64x64xbf16> to vector<64x16xbf16>
    %43 = vector.extract_strided_slice %5 {offsets = [0, 32], sizes = [64, 16], strides = [1, 1]} : vector<64x64xbf16> to vector<64x16xbf16>
    %cst_15 = arith.constant dense<0.000000e+00> : vector<10x64xf32>
    %44 = tpu.matmul %41, %42, %cst_15 {dimension_numbers = #tpu.dot_dimension_numbers<[1], [1], [0], [0], [0, 0, 1, 0], [], []>} : vector<10x16xbf16>, vector<64x16xbf16>, vector<10x64xf32> -> vector<10x64xf32>
    %cst_16 = arith.constant dense<0xFF800000> : vector<10xf32>
    %45 = vector.multi_reduction <maximumf>, %44, %cst_16 [1] : vector<10x64xf32> to vector<10xf32>
    %46 = vector.shape_cast %45 : vector<10xf32> to vector<10x1xf32>
    %47 = vector.broadcast %46 : vector<10x1xf32> to vector<10x64xf32>
    %48 = arith.subf %44, %47 : vector<10x64xf32>
    %49 = math.exp %48 : vector<10x64xf32>
    %cst_17 = arith.constant dense<0.000000e+00> : vector<10xf32>
    %50 = vector.multi_reduction <add>, %49, %cst_17 [1] : vector<10x64xf32> to vector<10xf32>
    %51 = vector.shape_cast %50 : vector<10xf32> to vector<10x1xf32>
    %52 = tpu.reciprocal %51 {approx = true} : vector<10x1xf32> -> vector<10x1xf32>
    %53 = vector.broadcast %52 : vector<10x1xf32> to vector<10x64xf32>
    %54 = arith.mulf %49, %53 : vector<10x64xf32>
    %55 = arith.truncf %54 : vector<10x64xf32> to vector<10x64xbf16>
    %cst_18 = arith.constant dense<0.000000e+00> : vector<10x16xf32>
    %56 = tpu.matmul %55, %43, %cst_18 {dimension_numbers = #tpu.dot_dimension_numbers<[1], [0], [0], [1], [0, 0, 1, 1], [], []>} : vector<10x64xbf16>, vector<64x16xbf16>, vector<10x16xf32> -> vector<10x16xf32>
    %57 = vector.extract_strided_slice %1 {offsets = [0, 48], sizes = [10, 16], strides = [1, 1]} : vector<10x64xf32> to vector<10x16xf32>
    %58 = arith.truncf %57 : vector<10x16xf32> to vector<10x16xbf16>
    %59 = vector.extract_strided_slice %3 {offsets = [0, 48], sizes = [64, 16], strides = [1, 1]} : vector<64x64xbf16> to vector<64x16xbf16>
    %60 = vector.extract_strided_slice %5 {offsets = [0, 48], sizes = [64, 16], strides = [1, 1]} : vector<64x64xbf16> to vector<64x16xbf16>
    %cst_19 = arith.constant dense<0.000000e+00> : vector<10x64xf32>
    %61 = tpu.matmul %58, %59, %cst_19 {dimension_numbers = #tpu.dot_dimension_numbers<[1], [1], [0], [0], [0, 0, 1, 0], [], []>} : vector<10x16xbf16>, vector<64x16xbf16>, vector<10x64xf32> -> vector<10x64xf32>
    %cst_20 = arith.constant dense<0xFF800000> : vector<10xf32>
    %62 = vector.multi_reduction <maximumf>, %61, %cst_20 [1] : vector<10x64xf32> to vector<10xf32>
    %63 = vector.shape_cast %62 : vector<10xf32> to vector<10x1xf32>
    %64 = vector.broadcast %63 : vector<10x1xf32> to vector<10x64xf32>
    %65 = arith.subf %61, %64 : vector<10x64xf32>
    %66 = math.exp %65 : vector<10x64xf32>
    %cst_21 = arith.constant dense<0.000000e+00> : vector<10xf32>
    %67 = vector.multi_reduction <add>, %66, %cst_21 [1] : vector<10x64xf32> to vector<10xf32>
    %68 = vector.shape_cast %67 : vector<10xf32> to vector<10x1xf32>
    %69 = tpu.reciprocal %68 {approx = true} : vector<10x1xf32> -> vector<10x1xf32>
    %70 = vector.broadcast %69 : vector<10x1xf32> to vector<10x64xf32>
    %71 = arith.mulf %66, %70 : vector<10x64xf32>
    %72 = arith.truncf %71 : vector<10x64xf32> to vector<10x64xbf16>
    %cst_22 = arith.constant dense<0.000000e+00> : vector<10x16xf32>
    %73 = tpu.matmul %72, %60, %cst_22 {dimension_numbers = #tpu.dot_dimension_numbers<[1], [0], [0], [1], [0, 0, 1, 1], [], []>} : vector<10x64xbf16>, vector<64x16xbf16>, vector<10x16xf32> -> vector<10x16xf32>
    %74 = tpu.concatenate %22, %39, %56, %73 in 1 : vector<10x16xf32>, vector<10x16xf32>, vector<10x16xf32>, vector<10x16xf32> -> vector<10x64xf32>
    %c0_23 = arith.constant 0 : index
    %c0_24 = arith.constant 0 : index
    %c0_25 = arith.constant 0 : index
    %75 = vector.load %arg4[%c0_23, %c0_24, %c0_25] : memref<1x10x64xf32, #tpu.memory_space<vmem>>, vector<1x10x64xf32>
    %76 = vector.shape_cast %75 : vector<1x10x64xf32> to vector<10x64xf32>
    %77 = vector.shape_cast %74 : vector<10x64xf32> to vector<1x10x64xf32>
    tpu.vector_store %arg4[%c0_23, %c0_24, %c0_25], %77 {strides = array<i32>} : memref<1x10x64xf32, #tpu.memory_space<vmem>>, vector<1x10x64xf32>,
    %78 = arith.extf %5 : vector<64x64xbf16> to vector<64x64xf32>
    %cst_26 = arith.constant dense<0.000000e+00> : vector<64xf32>
    %79 = vector.multi_reduction <add>, %78, %cst_26 [0] : vector<64x64xf32> to vector<64xf32>
    %80 = vector.shape_cast %79 : vector<64xf32> to vector<1x64xf32>
    %cst_27 = arith.constant 6.400000e+01 : f32
    %81 = vector.broadcast %cst_27 : f32 to vector<1x64xf32>
    %82 = arith.divf %80, %81 : vector<1x64xf32>
    %c0_28 = arith.constant 0 : index
    %c0_29 = arith.constant 0 : index
    %c0_30 = arith.constant 0 : index
    %83 = vector.load %arg5[%c0_28, %c0_29, %c0_30] : memref<1x1x64xf32, #tpu.memory_space<vmem>>, vector<1x1x64xf32>
    %84 = vector.shape_cast %83 : vector<1x1x64xf32> to vector<1x64xf32>
    %85 = vector.shape_cast %82 : vector<1x64xf32> to vector<1x1x64xf32>
    tpu.vector_store %arg5[%c0_28, %c0_29, %c0_30], %85 {strides = array<i32>} : memref<1x1x64xf32, #tpu.memory_space<vmem>>, vector<1x1x64xf32>,
    return
  }
  func.func @transform_0(%arg0: i32) -> (i32, i32, i32) {
    %c0_i32 = arith.constant 0 : i32
    %c0_i32_0 = arith.constant 0 : i32
    %c0_i32_1 = arith.constant 0 : i32
    return %arg0, %c0_i32, %c0_i32_0 : i32, i32, i32
  }
  func.func @transform_1(%arg0: i32) -> (i32, i32, i32) {
    %c0_i32 = arith.constant 0 : i32
    %c0_i32_0 = arith.constant 0 : i32
    %c0_i32_1 = arith.constant 0 : i32
    return %arg0, %c0_i32, %c0_i32_0 : i32, i32, i32
  }
  func.func @transform_2(%arg0: i32) -> (i32, i32, i32) {
    %c0_i32 = arith.constant 0 : i32
    %c0_i32_0 = arith.constant 0 : i32
    %c0_i32_1 = arith.constant 0 : i32
    return %arg0, %c0_i32, %c0_i32_0 : i32, i32, i32
  }
  func.func @transform_3(%arg0: i32) -> (i32, i32, i32) {
    %c0_i32 = arith.constant 0 : i32
    %c0_i32_0 = arith.constant 0 : i32
    %c0_i32_1 = arith.constant 0 : i32
    return %arg0, %c0_i32, %c0_i32_0 : i32, i32, i32
  }
  func.func @transform_4(%arg0: i32) -> (i32, i32, i32) {
    %c0_i32 = arith.constant 0 : i32
    %c0_i32_0 = arith.constant 0 : i32
    %c0_i32_1 = arith.constant 0 : i32
    return %arg0, %c0_i32, %c0_i32_0 : i32, i32, i32
  }
}

module attributes {stable_mosaic.version = 11 : i64} {
  func.func @_out_kernel(%arg0: i32, %arg1: memref<128x64xf32, #tpu.memory_space<vmem>>, %arg2: memref<64x64xf32, #tpu.memory_space<vmem>>, %arg3: memref<1x64xf32, #tpu.memory_space<vmem>>, %arg4: memref<128x64xf32, #tpu.memory_space<vmem>>, %arg5: memref<1x64xf32, #tpu.memory_space<vmem>>, %arg6: memref<1x64xf32, #tpu.memory_space<vmem>>, %arg7: memref<128x64xf32, #tpu.memory_space<vmem>>) attributes {dimension_semantics = [#tpu.dimension_semantics<parallel>], iteration_bounds = array<i64: 1>, scalar_prefetch = 0 : i64, scratch_operands = 0 : i64, tpu.core_type = #tpu.core_type<tc>, window_params = [{transform_indices = @transform_0, window_bounds = array<i64: 128, 64>}, {pipeline_mode = #tpu.pipeline_mode<synchronous>, transform_indices = @transform_1, window_bounds = array<i64: 64, 64>}, {pipeline_mode = #tpu.pipeline_mode<synchronous>, transform_indices = @transform_2, window_bounds = array<i64: 1, 64>}, {transform_indices = @transform_3, window_bounds = array<i64: 128, 64>}, {pipeline_mode = #tpu.pipeline_mode<synchronous>, transform_indices = @transform_4, window_bounds = array<i64: 1, 64>}, {pipeline_mode = #tpu.pipeline_mode<synchronous>, transform_indices = @transform_5, window_bounds = array<i64: 1, 64>}, {transform_indices = @transform_6, window_bounds = array<i64: 128, 64>}]} {
    %c0 = arith.constant 0 : index
    %c0_0 = arith.constant 0 : index
    %0 = vector.load %arg1[%c0, %c0_0] : memref<128x64xf32, #tpu.memory_space<vmem>>, vector<128x64xf32>
    %c0_1 = arith.constant 0 : index
    %c0_2 = arith.constant 0 : index
    %1 = vector.load %arg2[%c0_1, %c0_2] : memref<64x64xf32, #tpu.memory_space<vmem>>, vector<64x64xf32>
    %cst = arith.constant dense<0.000000e+00> : vector<128x64xf32>
    %2 = tpu.matmul %0, %1, %cst {dimension_numbers = #tpu.dot_dimension_numbers<[1], [0], [0], [1], [0, 0, 1, 1], [], []>} : vector<128x64xf32>, vector<64x64xf32>, vector<128x64xf32> -> vector<128x64xf32>
    %c0_3 = arith.constant 0 : index
    %c0_4 = arith.constant 0 : index
    %3 = vector.load %arg3[%c0_3, %c0_4] : memref<1x64xf32, #tpu.memory_space<vmem>>, vector<1x64xf32>
    %4 = vector.broadcast %3 : vector<1x64xf32> to vector<128x64xf32>
    %5 = arith.addf %2, %4 : vector<128x64xf32>
    %c0_5 = arith.constant 0 : index
    %c0_6 = arith.constant 0 : index
    %6 = vector.load %arg4[%c0_5, %c0_6] : memref<128x64xf32, #tpu.memory_space<vmem>>, vector<128x64xf32>
    %7 = arith.addf %5, %6 : vector<128x64xf32>
    %cst_7 = arith.constant dense<0.000000e+00> : vector<128xf32>
    %8 = vector.multi_reduction <add>, %7, %cst_7 [1] : vector<128x64xf32> to vector<128xf32>
    %9 = vector.shape_cast %8 : vector<128xf32> to vector<128x1xf32>
    %cst_8 = arith.constant 6.400000e+01 : f32
    %10 = vector.broadcast %cst_8 : f32 to vector<128x1xf32>
    %11 = arith.divf %9, %10 : vector<128x1xf32>
    %12 = vector.broadcast %11 : vector<128x1xf32> to vector<128x64xf32>
    %13 = arith.subf %7, %12 : vector<128x64xf32>
    %14 = arith.mulf %13, %13 : vector<128x64xf32>
    %cst_9 = arith.constant dense<0.000000e+00> : vector<128xf32>
    %15 = vector.multi_reduction <add>, %14, %cst_9 [1] : vector<128x64xf32> to vector<128xf32>
    %16 = vector.shape_cast %15 : vector<128xf32> to vector<128x1xf32>
    %cst_10 = arith.constant 6.400000e+01 : f32
    %17 = vector.broadcast %cst_10 : f32 to vector<128x1xf32>
    %18 = arith.divf %16, %17 : vector<128x1xf32>
    %cst_11 = arith.constant 9.99999997E-7 : f32
    %19 = vector.broadcast %cst_11 : f32 to vector<128x1xf32>
    %20 = arith.addf %18, %19 : vector<128x1xf32>
    %21 = math.rsqrt %20 : vector<128x1xf32>
    %22 = vector.broadcast %21 : vector<128x1xf32> to vector<128x64xf32>
    %23 = arith.mulf %13, %22 : vector<128x64xf32>
    %c0_12 = arith.constant 0 : index
    %c0_13 = arith.constant 0 : index
    %24 = vector.load %arg5[%c0_12, %c0_13] : memref<1x64xf32, #tpu.memory_space<vmem>>, vector<1x64xf32>
    %25 = vector.broadcast %24 : vector<1x64xf32> to vector<128x64xf32>
    %26 = arith.mulf %23, %25 : vector<128x64xf32>
    %c0_14 = arith.constant 0 : index
    %c0_15 = arith.constant 0 : index
    %27 = vector.load %arg6[%c0_14, %c0_15] : memref<1x64xf32, #tpu.memory_space<vmem>>, vector<1x64xf32>
    %28 = vector.broadcast %27 : vector<1x64xf32> to vector<128x64xf32>
    %29 = arith.addf %26, %28 : vector<128x64xf32>
    %c0_16 = arith.constant 0 : index
    %c0_17 = arith.constant 0 : index
    %30 = vector.load %arg7[%c0_16, %c0_17] : memref<128x64xf32, #tpu.memory_space<vmem>>, vector<128x64xf32>
    tpu.vector_store %arg7[%c0_16, %c0_17], %29 {strides = array<i32>} : memref<128x64xf32, #tpu.memory_space<vmem>>, vector<128x64xf32>,
    return
  }
  func.func @transform_0(%arg0: i32) -> (i32, i32) {
    %c0_i32 = arith.constant 0 : i32
    %c0_i32_0 = arith.constant 0 : i32
    return %arg0, %c0_i32 : i32, i32
  }
  func.func @transform_1(%arg0: i32) -> (i32, i32) {
    %c0_i32 = arith.constant 0 : i32
    %c0_i32_0 = arith.constant 0 : i32
    %c0_i32_1 = arith.constant 0 : i32
    return %c0_i32, %c0_i32_0 : i32, i32
  }
  func.func @transform_2(%arg0: i32) -> (i32, i32) {
    %c0_i32 = arith.constant 0 : i32
    %c0_i32_0 = arith.constant 0 : i32
    %c0_i32_1 = arith.constant 0 : i32
    return %c0_i32, %c0_i32_0 : i32, i32
  }
  func.func @transform_3(%arg0: i32) -> (i32, i32) {
    %c0_i32 = arith.constant 0 : i32
    %c0_i32_0 = arith.constant 0 : i32
    return %arg0, %c0_i32 : i32, i32
  }
  func.func @transform_4(%arg0: i32) -> (i32, i32) {
    %c0_i32 = arith.constant 0 : i32
    %c0_i32_0 = arith.constant 0 : i32
    %c0_i32_1 = arith.constant 0 : i32
    return %c0_i32, %c0_i32_0 : i32, i32
  }
  func.func @transform_5(%arg0: i32) -> (i32, i32) {
    %c0_i32 = arith.constant 0 : i32
    %c0_i32_0 = arith.constant 0 : i32
    %c0_i32_1 = arith.constant 0 : i32
    return %c0_i32, %c0_i32_0 : i32, i32
  }
  func.func @transform_6(%arg0: i32) -> (i32, i32) {
    %c0_i32 = arith.constant 0 : i32
    %c0_i32_0 = arith.constant 0 : i32
    return %arg0, %c0_i32 : i32, i32
  }
}

</mosaic_0001>

<bundles_post_ra>
// kernel: prob_sparse_attention.4
= control target key start
LH: loop header
LB: loop body
LE: loop exit
PB: predicated region body
PF: predicated region fallthrough
CT: control target
= control target key end

     0   :  { %v605_v3 = vmov 0.0   ;;  %vm52_vm0 = vcmask 523264   ;;  %vm390_vm1 = vcmask 519168   ;;  %s606_s8 = smov 64   ;;  %s978_s1 = inlined_call_operand.vmem [shape: f32[64,192], index: 1, kind: input, shape index: {}]   ;;  %s979_s2 = inlined_call_operand.vmem [shape: f32[1,64], index: 2, kind: input, shape index: {}]   ;;  %s980_s3 = inlined_call_operand.vmem [shape: f32[1,64], index: 3, kind: input, shape index: {}]   ;;  %s981_s0 = inlined_call_operand.vmem [shape: f32[128,64], index: 0, kind: input, shape index: {}]   ;;  %s982_s4 = inlined_call_operand.vmem [shape: f32[128,64], index: 4, kind: output, shape index: {0}]   ;;  %s983_s6 = inlined_call_operand.vmem [shape: bf16[128,64], index: 6, kind: output, shape index: {2}]   ;;  %s984_s5 = inlined_call_operand.vmem [shape: bf16[128,64], index: 5, kind: output, shape index: {1}]  }
   0x1   :  { %v37_v0 = vld [vmem:[%s978_s1 + $0x8] sm:$0xff]  ;;  %v39_v1 = vld [vmem:[%s978_s1 + $0x18] sm:$0xff]  ;;  %v36_v2 = vld [vmem:[%s978_s1] sm:$0xff]  ;;  %165 = vmatprep.mubr.f32.mxu0 %v605_v3  ;;  %213 = vmatprep.mubr.f32.mxu1 %v605_v3 }
   0x2   :  { %v579_v4 = vpack.c.bf16 %v39_v1, %v37_v0  ;;  %v38_v5 = vld [vmem:[%s978_s1 + $0x10] sm:$0xff]  ;;  %v41_v6 = vld [vmem:[%s978_s1 + $0x28] sm:$0xff]  ;;  %v43_v7 = vld [vmem:[%s978_s1 + $0x38] sm:$0xff] }
   0x3   :  { %v581_v8 = vpack.c.bf16 %v38_v5, %v36_v2  ;;  %v583_v9 = vpack.c.bf16 %v43_v7, %v41_v6  ;;  %v40_v10 = vld [vmem:[%s978_s1 + $0x20] sm:$0xff]  ;;  %v42_v11 = vld [vmem:[%s978_s1 + $0x30] sm:$0xff]  ;;  %v45_v12 = vld [vmem:[%s978_s1 + $0x48] sm:$0xff] }
   0x4   :  { %580 = vmatprep.subr.bf16.mxu0 %v579_v4  ;;  %595 = vmatprep.subr.bf16.mxu1 %v579_v4  ;;  %v47_v13 = vld [vmem:[%s978_s1 + $0x58] sm:$0xff]  ;;  %v585_v14 = vpack.c.bf16 %v42_v11, %v40_v10  ;;  %v44_v16 = vld [vmem:[%s978_s1 + $0x40] sm:$0xff]  ;;  %v46_v17 = vld [vmem:[%s978_s1 + $0x50] sm:$0xff] }
   0x5   :  { %582 = vmatpush1.bf16.msra.mxu0 %v581_v8  ;;  %599 = vmatpush1.bf16.msra.mxu1 %v581_v8  ;;  %v587_v15 = vpack.c.bf16 %v47_v13, %v45_v12  ;;  %v49_v18 = vld [vmem:[%s978_s1 + $0x68] sm:$0xff]  ;;  %v51_v19 = vld [vmem:[%s978_s1 + $0x78] sm:$0xff]  ;;  %v589_v20 = vpack.c.bf16 %v46_v17, %v44_v16  ;;  %v48_v22 = vld [vmem:[%s978_s1 + $0x60] sm:$0xff] }
   0x6   :  { %584 = vmatprep.subr.bf16.mxu0 %v583_v9  ;;  %596 = vmatprep.subr.bf16.mxu1 %v583_v9  ;;  %v591_v21 = vpack.c.bf16 %v51_v19, %v49_v18  ;;  %v50_v23 = vld [vmem:[%s978_s1 + $0x70] sm:$0xff]  ;;  %v20_v25 = vld [vmem:[%s981_s0] sm:$0xff]  ;;  %v21_v27 = vld [vmem:[%s981_s0 + $0x8] sm:$0xff] }
   0x7   :  { %v593_v24 = vpack.c.bf16 %v50_v23, %v48_v22  ;;  %v28_v26 = vld [vmem:[%s981_s0 + $0x40] sm:$0xff]  ;;  %v29_v28 = vld [vmem:[%s981_s0 + $0x48] sm:$0xff]  ;;  %v22_v29 = vld [vmem:[%s981_s0 + $0x10] sm:$0xff] }
   0x8   :  { %v30_v30 = vld [vmem:[%s981_s0 + $0x50] sm:$0xff]  ;;  %v23_v31 = vld [vmem:[%s981_s0 + $0x18] sm:$0xff]  ;;  %v24_v33 = vld [vmem:[%s981_s0 + $0x20] sm:$0xff] }
   0x9   :  { %586 = vmatpush1.bf16.msra.mxu0 %v585_v14  ;;  %600 = vmatpush1.bf16.msra.mxu1 %v585_v14  ;;  %v31_v32 = vld [vmem:[%s981_s0 + $0x58] sm:$0xff]  ;;  %v32_v34 = vld [vmem:[%s981_s0 + $0x60] sm:$0xff]  ;;  %v25_v35 = vld [vmem:[%s981_s0 + $0x28] sm:$0xff] }
   0xa   :  { %588 = vmatprep.subr.bf16.mxu0 %v587_v15  ;;  %597 = vmatprep.subr.bf16.mxu1 %v587_v15  ;;  %v33_v36 = vld [vmem:[%s981_s0 + $0x68] sm:$0xff]  ;;  %v26_v37 = vld [vmem:[%s981_s0 + $0x30] sm:$0xff]  ;;  %v27_v39 = vld [vmem:[%s981_s0 + $0x38] sm:$0xff] }
   0xb   :  { %v34_v38 = vld [vmem:[%s981_s0 + $0x70] sm:$0xff]  ;;  %v35_v40 = vld [vmem:[%s981_s0 + $0x78] sm:$0xff] }
   0xd   :  { %590 = vmatpush1.bf16.msra.mxu0 %v589_v20  ;;  %601 = vmatpush1.bf16.msra.mxu1 %v589_v20 }
   0xe   :  { %592 = vmatprep.subr.bf16.mxu0 %v591_v21  ;;  %598 = vmatprep.subr.bf16.mxu1 %v591_v21 }
  0x11   :  { %594 = vmatpush1.bf16.msra.mxu0 %v593_v24  ;;  %602 = vmatpush1.bf16.msra.mxu1 %v593_v24 }
  0x14   :  { %499 = vmatmul.mubr.msk.f32.vlgmr.msra.gmra.mrb[0].mxu0 %vm52_vm0, %v20_v25  ;;  %507 = vmatmul.mubr.msk.f32.vlgmr.msra.gmra.mrb[0].mxu1 %vm52_vm0, %v28_v26 }
  0x15   :  { %171 = vmatprep.mubr.f32.mxu0 %v605_v3  ;;  %219 = vmatprep.mubr.f32.mxu1 %v605_v3 }
  0x18   :  { %500 = vmatmul.mubr.msk.f32.gmra.mrb[2].mxu0 %vm52_vm0, %v21_v27  ;;  %508 = vmatmul.mubr.msk.f32.gmra.mrb[2].mxu1 %vm52_vm0, %v29_v28 }
  0x19   :  { %177 = vmatprep.mubr.f32.mxu0 %v605_v3  ;;  %225 = vmatprep.mubr.f32.mxu1 %v605_v3 }
  0x1c   :  { %501 = vmatmul.mubr.msk.f32.gmra.mrb[4].mxu0 %vm52_vm0, %v22_v29  ;;  %509 = vmatmul.mubr.msk.f32.gmra.mrb[4].mxu1 %vm52_vm0, %v30_v30 }
  0x1d   :  { %183 = vmatprep.mubr.f32.mxu0 %v605_v3  ;;  %231 = vmatprep.mubr.f32.mxu1 %v605_v3 }
  0x20   :  { %502 = vmatmul.mubr.msk.f32.gmra.mrb[6].mxu0 %vm52_vm0, %v23_v31  ;;  %510 = vmatmul.mubr.msk.f32.gmra.mrb[6].mxu1 %vm52_vm0, %v31_v32 }
  0x21   :  { %189 = vmatprep.mubr.f32.mxu0 %v605_v3  ;;  %237 = vmatprep.mubr.f32.mxu1 %v605_v3 }
  0x24   :  { %503 = vmatmul.mubr.msk.f32.gmra.mrb[8].mxu0 %vm52_vm0, %v24_v33  ;;  %511 = vmatmul.mubr.msk.f32.gmra.mrb[8].mxu1 %vm52_vm0, %v32_v34 }
  0x25   :  { %195 = vmatprep.mubr.f32.mxu0 %v605_v3  ;;  %243 = vmatprep.mubr.f32.mxu1 %v605_v3 }
  0x28   :  { %504 = vmatmul.mubr.msk.f32.gmra.mrb[10].mxu0 %vm52_vm0, %v25_v35  ;;  %512 = vmatmul.mubr.msk.f32.gmra.mrb[10].mxu1 %vm52_vm0, %v33_v36 }
  0x29   :  { %201 = vmatprep.mubr.f32.mxu0 %v605_v3  ;;  %249 = vmatprep.mubr.f32.mxu1 %v605_v3 }
  0x2c   :  { %505 = vmatmul.mubr.msk.f32.gmra.mrb[12].mxu0 %vm52_vm0, %v26_v37  ;;  %513 = vmatmul.mubr.msk.f32.gmra.mrb[12].mxu1 %vm52_vm0, %v34_v38 }
  0x2d   :  { %207 = vmatprep.mubr.f32.mxu0 %v605_v3  ;;  %255 = vmatprep.mubr.f32.mxu1 %v605_v3 }
  0x30   :  { %506 = vmatmul.mubr.msk.f32.gmra.mrb[14].mxu0 %vm52_vm0, %v27_v39  ;;  %514 = vmatmul.mubr.msk.f32.gmra.mrb[14].mxu1 %vm52_vm0, %v35_v40 }
  0xe7   :  { %v167_v41 = vpop.f32.mrb[0].mxu0  ;;  %v215_v42 = vpop.f32.mrb[0].mxu1 }
  0xe8   :  { %v262_v43 = vmul.f32 0.25, %v167_v41  ;;  %v270_v44 = vmul.f32 0.25, %v215_v42  ;;  %v169_v45 = vpop.f32.mrb[1].mxu0  ;;  %v217_v46 = vpop.f32.mrb[1].mxu1  ;;  %v547_v47 = vpack.c.bf16 %v167_v41, %v167_v41  ;;  %v555_v52 = vpack.c.bf16 %v215_v42, %v215_v42 }
  0xe9   :  { %v563_v48 = vpack.c.bf16 %v169_v45, %v169_v45  ;;  %v571_v49 = vpack.c.bf16 %v217_v46, %v217_v46 }
  0xea   :  { %278 = vst.msk [vmem:[%s982_s4] sm:$0xff] %vm52_vm0, %v262_v43  ;;  %286 = vst.msk [vmem:[%s982_s4 + $0x40] sm:$0xff] %vm52_vm0, %v270_v44  ;;  %342 = vrot.lane.b32.xlu0 %v547_v47, %s606_s8 }
  0xeb   :  { %471 = vst.msk [vmem:[%s983_s6] sm:$0xf] %vm390_vm1, %v563_v48  ;;  %479 = vst.msk [vmem:[%s983_s6 + $0x20] sm:$0xf] %vm390_vm1, %v571_v49  ;;  %v173_v50 = vpop.f32.mrb[2].mxu0  ;;  %v221_v51 = vpop.f32.mrb[2].mxu1 }
  0xec   :  { %v263_v53 = vmul.f32 0.25, %v173_v50  ;;  %v271_v54 = vmul.f32 0.25, %v221_v51  ;;  %v175_v55 = vpop.f32.mrb[3].mxu0  ;;  %v223_v56 = vpop.f32.mrb[3].mxu1  ;;  %v556_v57 = vpack.c.bf16 %v221_v51, %v221_v51  ;;  %v548_v62 = vpack.c.bf16 %v173_v50, %v173_v50 }
  0xed   :  { %v564_v58 = vpack.c.bf16 %v175_v55, %v175_v55  ;;  %v572_v59 = vpack.c.bf16 %v223_v56, %v223_v56 }
  0xee   :  { %279 = vst.msk [vmem:[%s982_s4 + $0x8] sm:$0xff] %vm52_vm0, %v263_v53  ;;  %287 = vst.msk [vmem:[%s982_s4 + $0x48] sm:$0xff] %vm52_vm0, %v271_v54  ;;  %360 = vrot.lane.b32.xlu1 %v556_v57, %s606_s8  ;;  %358 = vrot.lane.b32.xlu0 %v555_v52, %s606_s8 }
  0xef   :  { %472 = vst.msk [vmem:[%s983_s6 + $0x4] sm:$0xf] %vm390_vm1, %v564_v58  ;;  %480 = vst.msk [vmem:[%s983_s6 + $0x24] sm:$0xf] %vm390_vm1, %v572_v59  ;;  %v179_v60 = vpop.f32.mrb[4].mxu0  ;;  %v227_v61 = vpop.f32.mrb[4].mxu1 }
  0xf0   :  { %v264_v63 = vmul.f32 0.25, %v179_v60  ;;  %v549_v0 = vpack.c.bf16 %v179_v60, %v179_v60  ;;  %v181_v1 = vpop.f32.mrb[5].mxu0  ;;  %v272_v2 = vmul.f32 0.25, %v227_v61  ;;  %v229_v3 = vpop.f32.mrb[5].mxu1  ;;  %v557_v6 = vpack.c.bf16 %v227_v61, %v227_v61 }
  0xf1   :  { %v565_v4 = vpack.c.bf16 %v181_v1, %v181_v1  ;;  %v573_v5 = vpack.c.bf16 %v229_v3, %v229_v3 }
  0xf2   :  { %280 = vst.msk [vmem:[%s982_s4 + $0x10] sm:$0xff] %vm52_vm0, %v264_v63  ;;  %288 = vst.msk [vmem:[%s982_s4 + $0x50] sm:$0xff] %vm52_vm0, %v272_v2  ;;  %344 = vrot.lane.b32.xlu0 %v548_v62, %s606_s8  ;;  %346 = vrot.lane.b32.xlu1 %v549_v0, %s606_s8 }
  0xf3   :  { %473 = vst.msk [vmem:[%s983_s6 + $0x8] sm:$0xf] %vm390_vm1, %v565_v4  ;;  %v185_v7 = vpop.f32.mrb[6].mxu0  ;;  %481 = vst.msk [vmem:[%s983_s6 + $0x28] sm:$0xf] %vm390_vm1, %v573_v5  ;;  %v233_v8 = vpop.f32.mrb[6].mxu1 }
  0xf4   :  { %v265_v9 = vmul.f32 0.25, %v185_v7  ;;  %v550_v10 = vpack.c.bf16 %v185_v7, %v185_v7  ;;  %v187_v11 = vpop.f32.mrb[7].mxu0  ;;  %v273_v12 = vmul.f32 0.25, %v233_v8  ;;  %v235_v13 = vpop.f32.mrb[7].mxu1  ;;  %v558_v16 = vpack.c.bf16 %v233_v8, %v233_v8 }
  0xf5   :  { %v566_v14 = vpack.c.bf16 %v187_v11, %v187_v11  ;;  %v574_v15 = vpack.c.bf16 %v235_v13, %v235_v13 }
  0xf6   :  { %281 = vst.msk [vmem:[%s982_s4 + $0x18] sm:$0xff] %vm52_vm0, %v265_v9  ;;  %289 = vst.msk [vmem:[%s982_s4 + $0x58] sm:$0xff] %vm52_vm0, %v273_v12  ;;  %362 = vrot.lane.b32.xlu0 %v557_v6, %s606_s8  ;;  %348 = vrot.lane.b32.xlu1 %v550_v10, %s606_s8 }
  0xf7   :  { %474 = vst.msk [vmem:[%s983_s6 + $0xc] sm:$0xf] %vm390_vm1, %v566_v14  ;;  %v191_v17 = vpop.f32.mrb[8].mxu0  ;;  %482 = vst.msk [vmem:[%s983_s6 + $0x2c] sm:$0xf] %vm390_vm1, %v574_v15  ;;  %v239_v18 = vpop.f32.mrb[8].mxu1 }
  0xf8   :  { %v266_v19 = vmul.f32 0.25, %v191_v17  ;;  %v551_v20 = vpack.c.bf16 %v191_v17, %v191_v17  ;;  %v193_v21 = vpop.f32.mrb[9].mxu0  ;;  %v274_v22 = vmul.f32 0.25, %v239_v18  ;;  %v241_v23 = vpop.f32.mrb[9].mxu1  ;;  %v559_v26 = vpack.c.bf16 %v239_v18, %v239_v18 }
  0xf9   :  { %v567_v24 = vpack.c.bf16 %v193_v21, %v193_v21  ;;  %v575_v25 = vpack.c.bf16 %v241_v23, %v241_v23 }
  0xfa   :  { %282 = vst.msk [vmem:[%s982_s4 + $0x20] sm:$0xff] %vm52_vm0, %v266_v19  ;;  %290 = vst.msk [vmem:[%s982_s4 + $0x60] sm:$0xff] %vm52_vm0, %v274_v22  ;;  %364 = vrot.lane.b32.xlu1 %v558_v16, %s606_s8  ;;  %350 = vrot.lane.b32.xlu0 %v551_v20, %s606_s8 }
  0xfb   :  { %475 = vst.msk [vmem:[%s983_s6 + $0x10] sm:$0xf] %vm390_vm1, %v567_v24  ;;  %v197_v27 = vpop.f32.mrb[10].mxu0  ;;  %483 = vst.msk [vmem:[%s983_s6 + $0x30] sm:$0xf] %vm390_vm1, %v575_v25  ;;  %v245_v28 = vpop.f32.mrb[10].mxu1 }
  0xfc   :  { %v267_v29 = vmul.f32 0.25, %v197_v27  ;;  %v552_v30 = vpack.c.bf16 %v197_v27, %v197_v27  ;;  %v199_v31 = vpop.f32.mrb[11].mxu0  ;;  %v275_v32 = vmul.f32 0.25, %v245_v28  ;;  %v247_v33 = vpop.f32.mrb[11].mxu1  ;;  %v560_v36 = vpack.c.bf16 %v245_v28, %v245_v28 }
  0xfd   :  { %v568_v34 = vpack.c.bf16 %v199_v31, %v199_v31  ;;  %v576_v35 = vpack.c.bf16 %v247_v33, %v247_v33 }
  0xfe   :  { %283 = vst.msk [vmem:[%s982_s4 + $0x28] sm:$0xff] %vm52_vm0, %v267_v29  ;;  %291 = vst.msk [vmem:[%s982_s4 + $0x68] sm:$0xff] %vm52_vm0, %v275_v32  ;;  %366 = vrot.lane.b32.xlu0 %v559_v26, %s606_s8  ;;  %352 = vrot.lane.b32.xlu1 %v552_v30, %s606_s8 }
  0xff   :  { %476 = vst.msk [vmem:[%s983_s6 + $0x14] sm:$0xf] %vm390_vm1, %v568_v34  ;;  %v203_v37 = vpop.f32.mrb[12].mxu0  ;;  %484 = vst.msk [vmem:[%s983_s6 + $0x34] sm:$0xf] %vm390_vm1, %v576_v35  ;;  %v251_v38 = vpop.f32.mrb[12].mxu1 }
 0x100   :  { %v268_v39 = vmul.f32 0.25, %v203_v37  ;;  %v553_v40 = vpack.c.bf16 %v203_v37, %v203_v37  ;;  %v205_v41 = vpop.f32.mrb[13].mxu0  ;;  %v276_v42 = vmul.f32 0.25, %v251_v38  ;;  %v253_v43 = vpop.f32.mrb[13].mxu1  ;;  %v561_v46 = vpack.c.bf16 %v251_v38, %v251_v38 }
 0x101   :  { %v569_v44 = vpack.c.bf16 %v205_v41, %v205_v41  ;;  %v577_v45 = vpack.c.bf16 %v253_v43, %v253_v43 }
 0x102   :  { %284 = vst.msk [vmem:[%s982_s4 + $0x30] sm:$0xff] %vm52_vm0, %v268_v39  ;;  %292 = vst.msk [vmem:[%s982_s4 + $0x70] sm:$0xff] %vm52_vm0, %v276_v42  ;;  %368 = vrot.lane.b32.xlu1 %v560_v36, %s606_s8  ;;  %354 = vrot.lane.b32.xlu0 %v553_v40, %s606_s8 }
 0x103   :  { %477 = vst.msk [vmem:[%s983_s6 + $0x18] sm:$0xf] %vm390_vm1, %v569_v44  ;;  %v209_v47 = vpop.f32.mrb[14].mxu0  ;;  %485 = vst.msk [vmem:[%s983_s6 + $0x38] sm:$0xf] %vm390_vm1, %v577_v45  ;;  %v257_v48 = vpop.f32.mrb[14].mxu1 }
 0x104   :  { %v269_v49 = vmul.f32 0.25, %v209_v47  ;;  %v554_v50 = vpack.c.bf16 %v209_v47, %v209_v47  ;;  %v211_v51 = vpop.f32.mrb[15].mxu0  ;;  %v277_v52 = vmul.f32 0.25, %v257_v48  ;;  %v259_v53 = vpop.f32.mrb[15].mxu1  ;;  %v562_v56 = vpack.c.bf16 %v257_v48, %v257_v48 }
 0x105   :  { %v570_v54 = vpack.c.bf16 %v211_v51, %v211_v51  ;;  %v578_v55 = vpack.c.bf16 %v259_v53, %v259_v53 }
 0x106   :  { %285 = vst.msk [vmem:[%s982_s4 + $0x38] sm:$0xff] %vm52_vm0, %v269_v49  ;;  %293 = vst.msk [vmem:[%s982_s4 + $0x78] sm:$0xff] %vm52_vm0, %v277_v52  ;;  %370 = vrot.lane.b32.xlu0 %v561_v46, %s606_s8  ;;  %356 = vrot.lane.b32.xlu1 %v554_v50, %s606_s8 }
 0x107   :  { %478 = vst.msk [vmem:[%s983_s6 + $0x1c] sm:$0xf] %vm390_vm1, %v570_v54  ;;  %486 = vst.msk [vmem:[%s983_s6 + $0x3c] sm:$0xf] %vm390_vm1, %v578_v55 }
 0x10a   :  { %372 = vrot.lane.b32.xlu1 %v562_v56, %s606_s8 }
 0x15c   :  { %v343_v57 = vpop.permute.xlu0 %342 }
 0x15d   :  { %391 = vst.msk [vmem:[%s984_s5] sm:$0xf] %vm390_vm1, %v343_v57 }
 0x160   :  { %v361_v58 = vpop.permute.xlu1 %360  ;;  %v359_v59 = vpop.permute.xlu0 %358 }
 0x161   :  { %400 = vst.msk [vmem:[%s984_s5 + $0x24] sm:$0xf] %vm390_vm1, %v361_v58  ;;  %399 = vst.msk [vmem:[%s984_s5 + $0x20] sm:$0xf] %vm390_vm1, %v359_v59 }
 0x164   :  { %v345_v60 = vpop.permute.xlu0 %344  ;;  %v347_v61 = vpop.permute.xlu1 %346 }
 0x165   :  { %392 = vst.msk [vmem:[%s984_s5 + $0x4] sm:$0xf] %vm390_vm1, %v345_v60  ;;  %393 = vst.msk [vmem:[%s984_s5 + $0x8] sm:$0xf] %vm390_vm1, %v347_v61 }
 0x168   :  { %v363_v62 = vpop.permute.xlu0 %362  ;;  %v349_v63 = vpop.permute.xlu1 %348 }
 0x169   :  { %401 = vst.msk [vmem:[%s984_s5 + $0x28] sm:$0xf] %vm390_vm1, %v363_v62  ;;  %394 = vst.msk [vmem:[%s984_s5 + $0xc] sm:$0xf] %vm390_vm1, %v349_v63 }
 0x16c   :  { %v365_v0 = vpop.permute.xlu1 %364  ;;  %v351_v1 = vpop.permute.xlu0 %350 }
 0x16d   :  { %402 = vst.msk [vmem:[%s984_s5 + $0x2c] sm:$0xf] %vm390_vm1, %v365_v0  ;;  %395 = vst.msk [vmem:[%s984_s5 + $0x10] sm:$0xf] %vm390_vm1, %v351_v1 }
 0x170   :  { %v367_v2 = vpop.permute.xlu0 %366  ;;  %v353_v3 = vpop.permute.xlu1 %352 }
 0x171   :  { %403 = vst.msk [vmem:[%s984_s5 + $0x30] sm:$0xf] %vm390_vm1, %v367_v2  ;;  %396 = vst.msk [vmem:[%s984_s5 + $0x14] sm:$0xf] %vm390_vm1, %v353_v3 }
 0x174   :  { %v369_v4 = vpop.permute.xlu1 %368  ;;  %v355_v5 = vpop.permute.xlu0 %354 }
 0x175   :  { %404 = vst.msk [vmem:[%s984_s5 + $0x34] sm:$0xf] %vm390_vm1, %v369_v4  ;;  %397 = vst.msk [vmem:[%s984_s5 + $0x18] sm:$0xf] %vm390_vm1, %v355_v5 }
 0x178   :  { %v371_v6 = vpop.permute.xlu0 %370  ;;  %v357_v7 = vpop.permute.xlu1 %356 }
 0x179   :  { %405 = vst.msk [vmem:[%s984_s5 + $0x38] sm:$0xf] %vm390_vm1, %v371_v6  ;;  %398 = vst.msk [vmem:[%s984_s5 + $0x1c] sm:$0xf] %vm390_vm1, %v357_v7 }
 0x17c   :  { %v373_v8 = vpop.permute.xlu1 %372 }
 0x17d   :  { %406 = vst.msk [vmem:[%s984_s5 + $0x3c] sm:$0xf] %vm390_vm1, %v373_v8 }

// kernel: prob_sparse_attention.5
= control target key start
LH: loop header
LB: loop body
LE: loop exit
PB: predicated region body
PF: predicated region fallthrough
CT: control target
= control target key end

     0   :  { %s1330_s12 = smov 0   ;;  %s1332_s13 = smov 0   ;;  %s1648_s0 = inlined_call_operand.vmem [shape: f32[2,64,64], index: 0, kind: input, shape index: {}]   ;;  %s1649_s1 = inlined_call_operand.vmem [shape: bf16[2,64,64], index: 1, kind: input, shape index: {}]   ;;  %s1650_s2 = inlined_call_operand.vmem [shape: bf16[64,64], index: 2, kind: input, shape index: {}]   ;;  %s1651_s3 = inlined_call_operand.vmem [shape: f32[2,4,64], index: 3, kind: output, shape index: {}]  }
   0x1   :  { %s1334_s14 = smov 0  }
   0x2 LB: > { %s25_s15 = sadd.s32 1, %s1299_s13  ;;  %p1087_p0 = scmp.ge.s32.totalorder %s1303_s14, 1  ;;  %s1303_s14 = sphi %s1334_s14, %s13_s14   ;;  %s1299_s13 = sphi %s1332_s13, %s1653_s13   ;;  %s1295_s12 = sphi %s1330_s12, %s1652_s12  }
   0x3   : > { %p27_p1 = scmp.ge.s32.totalorder %s25_s15, 2  ;;  %p177_p2 = scmp.lt.s32.totalorder %s1303_s14, 3 }
   0x5   : > { %s1655_s15 = smov (%p27_p1, %s25_s15), 0  ;;  %p178_p3 = pnand %p1087_p0, %p177_p2 }
   0x6   : > { %p214_p4 = scmp.lt.s32.totalorder (!%p178_p3), %s1295_s12, 1  ;;  %vm311_vm0 = vcmask (!%p178_p3), 130048   ;;  %s1305_s24 = smov (!%p178_p3), 112   ;;  %vm244_vm1 = vcmask (!%p178_p3), 519168   ;;  %v1308_v34 = vmov (!%p178_p3), -1e+30  }
   0x7   : > { %181 = sbr.rel (%p178_p3) target bundleno = 459 (0x1cb), region = 32  ;;  %s1306_s25 = smov (!%p178_p3), 96   ;;  %245 = vst.msk [vmem:[#allocation2] sm:$0xf] (!%p178_p3), %vm244_vm1, %v1308_v34  ;;  %v1309_v35 = vmov (!%p178_p3), 0.0   ;;  %v1133_v58 = vld [vmem:[%s1650_s2 + $0x8] sm:$0xff] (!%p178_p3)  }
   0x8   : > { %s1307_s26 = smov (!%p178_p3), 80   ;;  %246 = vst.msk [vmem:[#allocation3] sm:$0xf] (!%p178_p3), %vm244_vm1, %v1309_v35  ;;  %v1118_v59 = vld [vmem:[%s1650_s2] sm:$0xff] (!%p178_p3)   ;;  %v1436_v60 = vunpack.c.l.bf16 (!%p178_p3), %v1133_v58  ;;  %v1135_v62 = vld [vmem:[%s1650_s2 + $0x18] sm:$0xff] (!%p178_p3)   ;;  %v1443_v63 = vunpack.c.h.bf16 (!%p178_p3), %v1133_v58  ;;  %vm409_vm2 = vcmask (!%p178_p3), 523264  }
   0x9   : > { %v1438_v61 = vunpack.c.l.bf16 (!%p178_p3), %v1118_v59  ;;  %vm462_vm11 = vcmask (!%p178_p3), 516096  }
   0xa   : > { %vm281_vm3 = vcmp.gt.f32.partialorder (!%p178_p3), %v1436_v60, 0.0  ;;  %vm282_vm5 = vcmp.gt.f32.partialorder (!%p178_p3), %v1443_v63, 0.0 }
   0xb   : > { %vm279_vm4 = vcmp.gt.f32.partialorder (!%p178_p3), %v1438_v61, 0.0 }
   0xe   : > { %s1657_s12 = smov (!%p214_p4, %s1295_s12), 1 }
   0xf   : > { %s1115_s16 = sshll.u32 %s1657_s12, 6  ;;  %s1116_s20 = sshll.u32 %s1657_s12, 5 }
  0x10   : > { %s218_s19 = scalar_lea.vmem %s1648_s0, %s1115_s16  ;;  %s1358_s23 = scalar_lea.vmem %s1649_s1, %s1116_s20 }
  0x11   : > { %v247_v0 = vld [vmem:[%s218_s19] sm:$0xff]  ;;  %v248_v1 = vld [vmem:[%s218_s19 + $0x8] sm:$0xff]  ;;  %v249_v5 = vld [vmem:[%s218_s19 + $0x10] sm:$0xff]  ;;  %s1092_s8 = sshll.u32 %s1657_s12, 2 }
  0x12   : > { %v251_v2 = vld [vmem:[%s218_s19 + $0x20] sm:$0xff]  ;;  %v287_v3 = vpack.c.bf16 %v248_v1, %v247_v0  ;;  %v252_v4 = vld [vmem:[%s218_s19 + $0x28] sm:$0xff]  ;;  %v250_v6 = vld [vmem:[%s218_s19 + $0x18] sm:$0xff]  ;;  %v1445_v1 = vunpack.c.h.bf16 %v1118_v59  ;;  %s238_s11 = scalar_lea.vmem %s1651_s3, %s1092_s8 }
  0x13   : > { %v289_v7 = vpack.c.bf16 %v252_v4, %v251_v2  ;;  %v253_v8 = vld [vmem:[%s218_s19 + $0x30] sm:$0xff]  ;;  %v254_v9 = vld [vmem:[%s218_s19 + $0x38] sm:$0xff]  ;;  %v288_v10 = vpack.c.bf16 %v250_v6, %v249_v5  ;;  %v1277_v11 = vld [vmem:[%s1358_s23] sm:$0xff]   ;;  %v1450_v4 = vunpack.c.l.bf16 %v1135_v62 }
  0x14   : > { %479 = vrot.lane.b32.xlu0 %v287_v3, %s1305_s24  ;;  %1232 = vmatprep.subr.msk.bf16.mxu0 %vm311_vm0, %v287_v3  ;;  %v325_v12 = vsel %vm311_vm0, %v287_v3, 0  ;;  %v290_v13 = vpack.c.bf16 %v254_v9, %v253_v8  ;;  %v1278_v15 = vld [vmem:[%s1358_s23 + $0x8] sm:$0xff]   ;;  %v1279_v17 = vld [vmem:[%s1358_s23 + $0x10] sm:$0xff]   ;;  %v1280_v18 = vld [vmem:[%s1358_s23 + $0x18] sm:$0xff]   ;;  %vm280_vm6 = vcmp.gt.f32.partialorder %v1445_v1, 0.0 }
  0x15   : > { %483 = vrot.lane.b32.xlu1 %v289_v7, %s1305_s24  ;;  %1169 = vmatpush3.bf16.xpose.msra.mxu0 %v325_v12  ;;  %v328_v14 = vsel %vm311_vm0, %v288_v10, 0  ;;  %v331_v16 = vsel %vm311_vm0, %v289_v7, 0  ;;  %v1134_v2 = vld [vmem:[%s1650_s2 + $0x10] sm:$0xff]   ;;  %vm285_vm7 = vcmp.gt.f32.partialorder %v1450_v4, 0.0 }
  0x16   : > { %1233 = vmatprep.subr.msk.bf16.mxu0 %vm311_vm0, %v288_v10  ;;  %1176 = vmatprep.mubr.msk.bf16.mxu0 %vm311_vm0, %v1277_v11  ;;  %v334_v19 = vsel %vm311_vm0, %v290_v13, 0  ;;  %v1458_v9 = vunpack.c.l.bf16 %v1134_v2 }
  0x18   : > { %481 = vrot.lane.b32.xlu0 %v288_v10, %s1305_s24  ;;  %vm283_vm8 = vcmp.gt.f32.partialorder %v1458_v9, 0.0 }
  0x19   : > { %485 = vrot.lane.b32.xlu1 %v290_v13, %s1305_s24 }
  0x1c   : > { %467 = vrot.lane.b32.xlu0 %v1277_v11, %s1305_s24 }
  0x1d   : > { %648 = vrot.lane.b32.xlu1 %v287_v3, %s1306_s25  ;;  %1171 = vmatpush3.bf16.xpose.msra.mxu0 %v328_v14  ;;  %v1465_v14 = vunpack.c.h.bf16 %v1134_v2 }
  0x1e   : > { %1234 = vmatprep.subr.msk.bf16.mxu0 %vm311_vm0, %v289_v7 }
  0x1f   : > { %vm284_vm10 = vcmp.gt.f32.partialorder %v1465_v14, 0.0 }
  0x20   : > { %817 = vrot.lane.b32.xlu0 %v287_v3, %s1307_s26 }
  0x21   : > { %469 = vrot.lane.b32.xlu1 %v1278_v15, %s1305_s24 }
  0x24   : > { %650 = vrot.lane.b32.xlu0 %v288_v10, %s1306_s25 }
  0x25   : > { %819 = vrot.lane.b32.xlu1 %v288_v10, %s1307_s26  ;;  %1173 = vmatpush3.bf16.xpose.msra.mxu0 %v331_v16  ;;  %v1460_v10 = vunpack.c.h.bf16 %v1135_v62 }
  0x26   : > { %1235 = vmatprep.subr.msk.bf16.mxu0 %vm311_vm0, %v290_v13 }
  0x27   : > { %vm286_vm9 = vcmp.gt.f32.partialorder %v1460_v10, 0.0 }
  0x28   : > { %652 = vrot.lane.b32.xlu0 %v289_v7, %s1306_s25 }
  0x29   : > { %821 = vrot.lane.b32.xlu1 %v289_v7, %s1307_s26 }
  0x2c   : > { %471 = vrot.lane.b32.xlu0 %v1279_v17, %s1305_s24 }
  0x2d   : > { %473 = vrot.lane.b32.xlu1 %v1280_v18, %s1305_s24  ;;  %1175 = vmatpush3.bf16.xpose.msra.mxu0 %v334_v19 }
  0x30   : > { %654 = vrot.lane.b32.xlu0 %v290_v13, %s1306_s25 }
  0x31   : > { %823 = vrot.lane.b32.xlu1 %v290_v13, %s1307_s26 }
  0x34   : > { %640 = vrot.lane.b32.xlu0 %v1277_v11, %s1306_s25  ;;  %1177 = vmatmul.mubr.msk.bf16.vlgmr.msra.gmra.mrb[0].mxu0 %vm311_vm0, %v1278_v15 }
  0x35   : > { %809 = vrot.lane.b32.xlu1 %v1277_v11, %s1307_s26  ;;  %1180 = vmatprep.mubr.msk.bf16.mxu0 %vm311_vm0, %v1279_v17 }
  0x38   : > { %642 = vrot.lane.b32.xlu0 %v1278_v15, %s1306_s25 }
  0x39   : > { %811 = vrot.lane.b32.xlu1 %v1278_v15, %s1307_s26 }
  0x3c   : > { %644 = vrot.lane.b32.xlu0 %v1279_v17, %s1306_s25  ;;  %1181 = vmatmul.mubr.msk.bf16.gmra.mrb[4].mxu0 %vm311_vm0, %v1280_v18 }
  0x3d   : > { %813 = vrot.lane.b32.xlu1 %v1279_v17, %s1307_s26 }
  0x40   : > { %646 = vrot.lane.b32.xlu0 %v1280_v18, %s1306_s25 }
  0x41   : > { %815 = vrot.lane.b32.xlu1 %v1280_v18, %s1307_s26 }
  0x86   : > { %v480_v20 = vpop.permute.xlu0 %479 }
  0x87   : > { %1236 = vmatprep.subr.msk.bf16.mxu1 %vm311_vm0, %v480_v20  ;;  %v500_v21 = vsel %vm311_vm0, %v480_v20, 0  ;;  %v484_v22 = vpop.permute.xlu1 %483 }
  0x88   : > { %1185 = vmatpush3.bf16.xpose.msra.mxu1 %v500_v21  ;;  %v506_v31 = vsel %vm311_vm0, %v484_v22, 0 }
  0x8a   : > { %v482_v23 = vpop.permute.xlu0 %481 }
  0x8b   : > { %1237 = vmatprep.subr.msk.bf16.mxu1 %vm311_vm0, %v482_v23  ;;  %v486_v24 = vpop.permute.xlu1 %485  ;;  %v503_v25 = vsel %vm311_vm0, %v482_v23, 0 }
  0x8c   : > { %v509_v38 = vsel %vm311_vm0, %v486_v24, 0 }
  0x8e   : > { %v468_v26 = vpop.permute.xlu0 %467 }
  0x8f   : > { %v649_v27 = vpop.permute.xlu1 %648  ;;  %1192 = vmatprep.mubr.msk.bf16.mxu1 %vm311_vm0, %v468_v26 }
  0x90   : > { %1187 = vmatpush3.bf16.xpose.msra.mxu1 %v503_v25  ;;  %v669_v28 = vsel %vm311_vm0, %v649_v27, 0  ;;  %1240 = vmatprep.subr.msk.bf16.mxu0 %vm311_vm0, %v649_v27 }
  0x91   : > { %1238 = vmatprep.subr.msk.bf16.mxu1 %vm311_vm0, %v484_v22  ;;  %1201 = vmatpush3.bf16.xpose.msra.mxu0 %v669_v28 }
  0x92   : > { %v818_v29 = vpop.permute.xlu0 %817 }
  0x93   : > { %v470_v30 = vpop.permute.xlu1 %469  ;;  %v838_v43 = vsel %vm311_vm0, %v818_v29, 0 }
  0x96   : > { %v651_v32 = vpop.permute.xlu0 %650 }
  0x97   : > { %v672_v33 = vsel %vm311_vm0, %v651_v32, 0  ;;  %1241 = vmatprep.subr.msk.bf16.mxu0 %vm311_vm0, %v651_v32  ;;  %v820_v36 = vpop.permute.xlu1 %819 }
  0x98   : > { %1189 = vmatpush3.bf16.xpose.msra.mxu1 %v506_v31  ;;  %v841_v49 = vsel %vm311_vm0, %v820_v36, 0 }
  0x99   : > { %1239 = vmatprep.subr.msk.bf16.mxu1 %vm311_vm0, %v486_v24  ;;  %1203 = vmatpush3.bf16.xpose.msra.mxu0 %v672_v33 }
  0x9a   : > { %v653_v37 = vpop.permute.xlu0 %652 }
  0x9b   : > { %1242 = vmatprep.subr.msk.bf16.mxu0 %vm311_vm0, %v653_v37  ;;  %v675_v39 = vsel %vm311_vm0, %v653_v37, 0  ;;  %v822_v41 = vpop.permute.xlu1 %821 }
  0x9c   : > { %v844_v52 = vsel %vm311_vm0, %v822_v41, 0 }
  0x9e   : > { %v472_v40 = vpop.permute.xlu0 %471 }
  0x9f   : > { %v474_v44 = vpop.permute.xlu1 %473 }
  0xa0   : > { %1191 = vmatpush3.bf16.xpose.msra.mxu1 %v509_v38 }
  0xa1   : > { %1205 = vmatpush3.bf16.xpose.msra.mxu0 %v675_v39  ;;  %1244 = vmatprep.subr.msk.bf16.mxu1 %vm311_vm0, %v818_v29 }
  0xa2   : > { %v655_v42 = vpop.permute.xlu0 %654 }
  0xa3   : > { %1243 = vmatprep.subr.msk.bf16.mxu0 %vm311_vm0, %v655_v42  ;;  %v678_v45 = vsel %vm311_vm0, %v655_v42, 0  ;;  %v824_v47 = vpop.permute.xlu1 %823 }
  0xa4   : > { %v847_v54 = vsel %vm311_vm0, %v824_v47, 0 }
  0xa6   : > { %v641_v46 = vpop.permute.xlu0 %640 }
  0xa7   : > { %1193 = vmatmul.mubr.msk.bf16.vlgmr.msra.gmra.mrb[0].mxu1 %vm311_vm0, %v470_v30  ;;  %1208 = vmatprep.mubr.msk.bf16.mxu0 %vm311_vm0, %v641_v46  ;;  %v810_v51 = vpop.permute.xlu1 %809 }
  0xa8   : > { %1217 = vmatpush3.bf16.xpose.msra.mxu1 %v838_v43  ;;  %1196 = vmatprep.mubr.msk.bf16.mxu1 %vm311_vm0, %v472_v40 }
  0xa9   : > { %1207 = vmatpush3.bf16.xpose.msra.mxu0 %v678_v45  ;;  %1245 = vmatprep.subr.msk.bf16.mxu1 %vm311_vm0, %v820_v36 }
  0xaa   : > { %v643_v48 = vpop.permute.xlu0 %642 }
  0xab   : > { %v812_v55 = vpop.permute.xlu1 %811 }
  0xae   : > { %v645_v50 = vpop.permute.xlu0 %644 }
  0xaf   : > { %1197 = vmatmul.mubr.msk.bf16.gmra.mrb[4].mxu1 %vm311_vm0, %v474_v44  ;;  %v814_v56 = vpop.permute.xlu1 %813 }
  0xb0   : > { %1219 = vmatpush3.bf16.xpose.msra.mxu1 %v841_v49  ;;  %1209 = vmatmul.mubr.msk.bf16.vlgmr.msra.gmra.mrb[8].mxu0 %vm311_vm0, %v643_v48 }
  0xb1   : > { %1246 = vmatprep.subr.msk.bf16.mxu1 %vm311_vm0, %v822_v41  ;;  %1212 = vmatprep.mubr.msk.bf16.mxu0 %vm311_vm0, %v645_v50 }
  0xb2   : > { %1224 = vmatprep.mubr.msk.bf16.mxu1 %vm311_vm0, %v810_v51  ;;  %v647_v53 = vpop.permute.xlu0 %646 }
  0xb3   : > { %v816_v57 = vpop.permute.xlu1 %815 }
  0xb8   : > { %1221 = vmatpush3.bf16.xpose.msra.mxu1 %v844_v52  ;;  %1213 = vmatmul.mubr.msk.bf16.gmra.mrb[12].mxu0 %vm311_vm0, %v647_v53 }
  0xb9   : > { %1247 = vmatprep.subr.msk.bf16.mxu1 %vm311_vm0, %v824_v47 }
  0xc0   : > { %1223 = vmatpush3.bf16.xpose.msra.mxu1 %v847_v54 }
  0xc7   : > { %1225 = vmatmul.mubr.msk.bf16.vlgmr.msra.gmra.mrb[8].mxu1 %vm311_vm0, %v812_v55 }
  0xc8   : > { %1228 = vmatprep.mubr.msk.bf16.mxu1 %vm311_vm0, %v814_v56 }
  0xcf   : > { %1229 = vmatmul.mubr.msk.bf16.gmra.mrb[12].mxu1 %vm311_vm0, %v816_v57 }
 0x107   : > { %v1178_v0 = vpop.f32.mrb[0].mxu0 }
 0x108   : > { %v370_v3 = vpop.f32.mrb[1].mxu0  ;;  %v433_v5 = vmul.f32 %v1178_v0, %v1436_v60  ;;  %v403_v15 = vsel %vm281_vm3, %v1178_v0, -1e+30 }
 0x109   : > { %v431_v6 = vmul.f32 %v1438_v61, %v370_v3  ;;  %v1179_v7 = vpop.f32.mrb[2].mxu0  ;;  %v401_v17 = vsel %vm279_vm4, %v370_v3, -1e+30  ;;  %v412_v22 = vsel %vm409_vm2, %v403_v15, -inf }
 0x10a   : > { %v373_v8 = vpop.f32.mrb[3].mxu0  ;;  %v434_v12 = vmul.f32 %v1179_v7, %v1443_v63  ;;  %v442_v16 = vsel %vm409_vm2, %v433_v5, 0.0  ;;  %v404_v18 = vsel %vm282_vm5, %v1179_v7, -1e+30  ;;  %v410_v25 = vsel %vm409_vm2, %v401_v17, -inf }
 0x10b   : > { %v439_v11 = vsel %vm409_vm2, %v431_v6, 0.0  ;;  %v432_v13 = vmul.f32 %v1445_v1, %v373_v8  ;;  %v402_v20 = vsel %vm280_vm6, %v373_v8, -1e+30  ;;  %v413_v26 = vsel %vm409_vm2, %v404_v18, -inf }
 0x10c   : > { %v444_v23 = vsel %vm409_vm2, %v434_v12, 0.0  ;;  %v411_v30 = vsel %vm409_vm2, %v402_v20, -inf }
 0x10d   : > { %v440_v19 = vsel %vm409_vm2, %v432_v13, 0.0  ;;  %v460_v13 = vld [vmem:[#allocation2] sm:$0x1] }
 0x10e   : > { %v441_v21 = vadd.f32 %v440_v19, %v439_v11 }
 0x10f   : > { %v1182_v24 = vpop.f32.mrb[4].mxu0 }
 0x110   : > { %v443_v27 = vadd.f32 %v442_v16, %v441_v21  ;;  %v407_v28 = vsel %vm285_vm7, %v1182_v24, -1e+30  ;;  %v386_v29 = vpop.f32.mrb[5].mxu0  ;;  %v437_v36 = vmul.f32 %v1182_v24, %v1450_v4  ;;  %v464_v16 = vld [vmem:[#allocation3] sm:$0x1] }
 0x111   : > { %v418_v31 = vsel %vm409_vm2, %v407_v28, -inf  ;;  %v405_v32 = vsel %vm283_vm8, %v386_v29, -1e+30  ;;  %v435_v33 = vmul.f32 %v1458_v9, %v386_v29  ;;  %v1183_v34 = vpop.f32.mrb[6].mxu0 }
 0x112   : > { %v419_v35 = vmax.f32 %v412_v22, %v418_v31  ;;  %v414_v37 = vsel %vm409_vm2, %v405_v32, -inf  ;;  %v445_v38 = vadd.f32 %v444_v23, %v443_v27  ;;  %v389_v39 = vpop.f32.mrb[7].mxu0  ;;  %v408_v42 = vsel %vm286_vm9, %v1183_v34, -1e+30 }
 0x113   : > { %v415_v40 = vmax.f32 %v410_v25, %v414_v37  ;;  %v446_v41 = vsel %vm409_vm2, %v435_v33, 0.0  ;;  %v438_v43 = vmul.f32 %v1183_v34, %v1460_v10  ;;  %v420_v45 = vsel %vm409_vm2, %v408_v42, -inf }
 0x114   : > { %v447_v44 = vadd.f32 %v446_v41, %v445_v38  ;;  %v406_v46 = vsel %vm284_vm10, %v389_v39, -1e+30  ;;  %v436_v47 = vmul.f32 %v1465_v14, %v389_v39  ;;  %v421_v48 = vmax.f32 %v413_v26, %v420_v45 }
 0x115   : > { %v416_v49 = vsel %vm409_vm2, %v406_v46, -inf  ;;  %v450_v50 = vsel %vm409_vm2, %v437_v36, 0.0  ;;  %v452_v55 = vsel %vm409_vm2, %v438_v43, 0.0 }
 0x116   : > { %v417_v51 = vmax.f32 %v411_v30, %v416_v49  ;;  %v448_v52 = vsel %vm409_vm2, %v436_v47, 0.0  ;;  %v423_v53 = vmax.f32 %v419_v35, %v421_v48 }
 0x117   : > { %v449_v54 = vadd.f32 %v448_v52, %v447_v44 }
 0x118   : > { %v422_v56 = vmax.f32 %v415_v40, %v417_v51 }
 0x119   : > { %v451_v57 = vadd.f32 %v450_v50, %v449_v54 }
 0x11a   : > { %v424_v58 = vmax.f32 %v422_v56, %v423_v53 }
 0x11b   : > { %v453_v59 = vadd.f32 %v452_v55, %v451_v57 }
 0x11c   : > { %v425_v62 = vrot.slane %v424_v58, 4 }
 0x11d   : > { %v454_v0 = vrot.slane %v453_v59, 4 }
 0x11e   : > { %v426_v2 = vmax.f32 %v424_v58, %v425_v62 }
 0x11f   : > { %v455_v3 = vadd.f32 %v454_v0, %v453_v59 }
 0x120   : > { %v427_v5 = vrot.slane %v426_v2, 2 }
 0x121   : > { %v456_v6 = vrot.slane %v455_v3, 2 }
 0x122   : > { %v428_v7 = vmax.f32 %v426_v2, %v427_v5 }
 0x123   : > { %v457_v8 = vadd.f32 %v456_v6, %v455_v3 }
 0x124   : > { %v429_v11 = vrot.slane %v428_v7, 1 }
 0x125   : > { %v458_v12 = vrot.slane %v457_v8, 1 }
 0x126   : > { %v430_v15 = vmax.f32 %v428_v7, %v429_v11 }
 0x127   : > { %v459_v17 = vadd.f32 %v458_v12, %v457_v8 }
 0x128   : > { %v461_v18 = vmax.f32 %v460_v13, %v430_v15 }
 0x129   : > { %v465_v19 = vadd.f32 %v464_v16, %v459_v17 }
 0x12a   : > { %463 = vst.msk [vmem:[#allocation2] sm:$0x1] %vm462_vm11, %v461_v18 }
 0x12b   : > { %466 = vst.msk [vmem:[#allocation3] sm:$0x1] %vm462_vm11, %v465_v19 }
 0x17a   : > { %v1194_v20 = vpop.f32.mrb[0].mxu1 }
 0x17b   : > { %v545_v21 = vpop.f32.mrb[1].mxu1  ;;  %v607_v25 = vmul.f32 %v1194_v20, %v1436_v60  ;;  %v578_v27 = vsel %vm281_vm3, %v1194_v20, -1e+30 }
 0x17c   : > { %v605_v22 = vmul.f32 %v1438_v61, %v545_v21  ;;  %v1195_v23 = vpop.f32.mrb[2].mxu1  ;;  %v576_v28 = vsel %vm279_vm4, %v545_v21, -1e+30  ;;  %v586_v34 = vsel %vm409_vm2, %v578_v27, -inf }
 0x17d   : > { %v548_v24 = vpop.f32.mrb[3].mxu1  ;;  %v608_v29 = vmul.f32 %v1195_v23, %v1443_v63  ;;  %v579_v31 = vsel %vm282_vm5, %v1195_v23, -1e+30  ;;  %v616_v35 = vsel %vm409_vm2, %v607_v25, 0.0  ;;  %v584_v36 = vsel %vm409_vm2, %v576_v28, -inf }
 0x17e   : > { %v606_v26 = vmul.f32 %v1445_v1, %v548_v24  ;;  %v613_v30 = vsel %vm409_vm2, %v605_v22, 0.0  ;;  %v577_v37 = vsel %vm280_vm6, %v548_v24, -1e+30  ;;  %v587_v39 = vsel %vm409_vm2, %v579_v31, -inf }
 0x17f   : > { %v618_v40 = vsel %vm409_vm2, %v608_v29, 0.0  ;;  %v585_v50 = vsel %vm409_vm2, %v577_v37, -inf }
 0x180   : > { %v614_v32 = vsel %vm409_vm2, %v606_v26, 0.0 }
 0x181   : > { %v615_v33 = vadd.f32 %v614_v32, %v613_v30 }
 0x182   : > { %v1198_v38 = vpop.f32.mrb[4].mxu1 }
 0x183   : > { %v617_v41 = vadd.f32 %v616_v35, %v615_v33  ;;  %v582_v42 = vsel %vm285_vm7, %v1198_v38, -1e+30  ;;  %v561_v43 = vpop.f32.mrb[5].mxu1  ;;  %v1210_v44 = vpop.f32.mrb[8].mxu0  ;;  %v611_v46 = vmul.f32 %v1198_v38, %v1450_v4 }
 0x184   : > { %v592_v45 = vsel %vm409_vm2, %v582_v42, -inf  ;;  %v580_v47 = vsel %vm283_vm8, %v561_v43, -1e+30  ;;  %v609_v48 = vmul.f32 %v1458_v9, %v561_v43  ;;  %v1199_v49 = vpop.f32.mrb[6].mxu1  ;;  %v714_v55 = vpop.f32.mrb[9].mxu0  ;;  %v776_v16 = vmul.f32 %v1210_v44, %v1436_v60 }
 0x185   : > { %v593_v51 = vmax.f32 %v586_v34, %v592_v45  ;;  %v588_v52 = vsel %vm409_vm2, %v580_v47, -inf  ;;  %v619_v53 = vadd.f32 %v618_v40, %v617_v41  ;;  %v564_v54 = vpop.f32.mrb[7].mxu1  ;;  %v583_v58 = vsel %vm286_vm9, %v1199_v49, -1e+30  ;;  %v1211_v62 = vpop.f32.mrb[10].mxu0 }
 0x186   : > { %v589_v56 = vmax.f32 %v584_v36, %v588_v52  ;;  %v620_v57 = vsel %vm409_vm2, %v609_v48, 0.0  ;;  %v612_v59 = vmul.f32 %v1199_v49, %v1460_v10  ;;  %v594_v2 = vsel %vm409_vm2, %v583_v58, -inf  ;;  %v717_v6 = vpop.f32.mrb[11].mxu0 }
 0x187   : > { %v621_v0 = vadd.f32 %v620_v57, %v619_v53  ;;  %v581_v3 = vsel %vm284_vm10, %v564_v54, -1e+30  ;;  %v610_v5 = vmul.f32 %v1465_v14, %v564_v54  ;;  %v624_v7 = vsel %vm409_vm2, %v611_v46, 0.0 }
 0x188   : > { %v595_v8 = vmax.f32 %v587_v39, %v594_v2  ;;  %v590_v11 = vsel %vm409_vm2, %v581_v3, -inf  ;;  %v747_v12 = vsel %vm281_vm3, %v1210_v44, -1e+30  ;;  %v745_v17 = vsel %vm279_vm4, %v714_v55, -1e+30 }
 0x189   : > { %v591_v13 = vmax.f32 %v585_v50, %v590_v11  ;;  %v622_v15 = vsel %vm409_vm2, %v610_v5, 0.0  ;;  %v626_v19 = vsel %vm409_vm2, %v612_v59, 0.0  ;;  %v774_v21 = vmul.f32 %v1438_v61, %v714_v55 }
 0x18a   : > { %v597_v18 = vmax.f32 %v593_v51, %v595_v8  ;;  %v623_v20 = vadd.f32 %v622_v15, %v621_v0  ;;  %v755_v23 = vsel %vm409_vm2, %v747_v12, -inf  ;;  %v748_v24 = vsel %vm282_vm5, %v1211_v62, -1e+30 }
 0x18b   : > { %v596_v22 = vmax.f32 %v589_v56, %v591_v13  ;;  %v777_v25 = vmul.f32 %v1211_v62, %v1443_v63  ;;  %v1214_v26 = vpop.f32.mrb[12].mxu0  ;;  %v785_v28 = vsel %vm409_vm2, %v776_v16, 0.0  ;;  %v753_v29 = vsel %vm409_vm2, %v745_v17, -inf }
 0x18c   : > { %v625_v27 = vadd.f32 %v624_v7, %v623_v20  ;;  %v782_v30 = vsel %vm409_vm2, %v774_v21, 0.0  ;;  %v730_v31 = vpop.f32.mrb[13].mxu0  ;;  %v756_v33 = vsel %vm409_vm2, %v748_v24, -inf  ;;  %v746_v34 = vsel %vm280_vm6, %v717_v6, -1e+30 }
 0x18d   : > { %v598_v32 = vmax.f32 %v596_v22, %v597_v18  ;;  %v775_v35 = vmul.f32 %v1445_v1, %v717_v6  ;;  %v1215_v36 = vpop.f32.mrb[14].mxu0  ;;  %v787_v38 = vsel %vm409_vm2, %v777_v25, 0.0  ;;  %v751_v39 = vsel %vm285_vm7, %v1214_v26, -1e+30  ;;  %v634_v21 = vld [vmem:[#allocation2 + $0x1] sm:$0x1] }
 0x18e   : > { %v627_v37 = vadd.f32 %v626_v19, %v625_v27  ;;  %v749_v40 = vsel %vm283_vm8, %v730_v31, -1e+30  ;;  %v733_v41 = vpop.f32.mrb[15].mxu0  ;;  %v761_v44 = vsel %vm409_vm2, %v751_v39, -inf  ;;  %v754_v47 = vsel %vm409_vm2, %v746_v34, -inf }
 0x18f   : > { %v599_v42 = vrot.slane %v598_v32, 4  ;;  %v783_v43 = vsel %vm409_vm2, %v775_v35, 0.0  ;;  %v757_v45 = vsel %vm409_vm2, %v749_v40, -inf  ;;  %v762_v49 = vmax.f32 %v755_v23, %v761_v44  ;;  %v637_v24 = vld [vmem:[#allocation3 + $0x1] sm:$0x1] }
 0x190   : > { %v628_v46 = vrot.slane %v627_v37, 4  ;;  %v784_v48 = vadd.f32 %v783_v43, %v782_v30  ;;  %v758_v51 = vmax.f32 %v753_v29, %v757_v45  ;;  %v778_v52 = vmul.f32 %v1458_v9, %v730_v31 }
 0x191   : > { %v600_v50 = vmax.f32 %v598_v32, %v599_v42  ;;  %v752_v53 = vsel %vm286_vm9, %v1215_v36, -1e+30  ;;  %v780_v56 = vmul.f32 %v1214_v26, %v1450_v4  ;;  %v750_v0 = vsel %vm284_vm10, %v733_v41, -1e+30 }
 0x192   : > { %v629_v54 = vadd.f32 %v628_v46, %v627_v37  ;;  %v786_v55 = vadd.f32 %v785_v28, %v784_v48  ;;  %v763_v57 = vsel %vm409_vm2, %v752_v53, -inf  ;;  %v789_v59 = vsel %vm409_vm2, %v778_v52, 0.0 }
 0x193   : > { %v601_v58 = vrot.slane %v600_v50, 2  ;;  %v764_v62 = vmax.f32 %v756_v33, %v763_v57  ;;  %v781_v5 = vmul.f32 %v1215_v36, %v1460_v10  ;;  %v759_v6 = vsel %vm409_vm2, %v750_v0, -inf  ;;  %v803_v0 = vld [vmem:[#allocation2 + $0x2] sm:$0x1] }
 0x194   : > { %v630_v2 = vrot.slane %v629_v54, 2  ;;  %v788_v3 = vadd.f32 %v787_v38, %v786_v55  ;;  %v760_v11 = vmax.f32 %v754_v47, %v759_v6  ;;  %v779_v12 = vmul.f32 %v1465_v14, %v733_v41 }
 0x195   : > { %v602_v7 = vmax.f32 %v600_v50, %v601_v58  ;;  %v766_v8 = vmax.f32 %v762_v49, %v764_v62  ;;  %v793_v17 = vsel %vm409_vm2, %v780_v56, 0.0  ;;  %v795_v25 = vsel %vm409_vm2, %v781_v5, 0.0 }
 0x196   : > { %v631_v13 = vadd.f32 %v630_v2, %v629_v54  ;;  %v790_v15 = vadd.f32 %v789_v59, %v788_v3  ;;  %v765_v18 = vmax.f32 %v758_v51, %v760_v11  ;;  %v791_v19 = vsel %vm409_vm2, %v779_v12, 0.0 }
 0x197   : > { %v603_v16 = vrot.slane %v602_v7, 1 }
 0x198   : > { %v632_v20 = vrot.slane %v631_v13, 1  ;;  %v792_v22 = vadd.f32 %v791_v19, %v790_v15  ;;  %v767_v26 = vmax.f32 %v765_v18, %v766_v8  ;;  %v806_v18 = vld [vmem:[#allocation3 + $0x2] sm:$0x1] }
 0x199   : > { %v604_v23 = vmax.f32 %v602_v7, %v603_v16 }
 0x19a   : > { %v633_v27 = vadd.f32 %v632_v20, %v631_v13  ;;  %v794_v28 = vadd.f32 %v793_v17, %v792_v22  ;;  %v1226_v29 = vpop.f32.mrb[8].mxu1  ;;  %v768_v31 = vrot.slane %v767_v26, 4 }
 0x19b   : > { %v635_v30 = vmax.f32 %v634_v21, %v604_v23  ;;  %v883_v32 = vpop.f32.mrb[9].mxu1  ;;  %v916_v37 = vsel %vm281_vm3, %v1226_v29, -1e+30  ;;  %v945_v38 = vmul.f32 %v1226_v29, %v1436_v60 }
 0x19c   : > { %v638_v33 = vadd.f32 %v637_v24, %v633_v27  ;;  %v796_v34 = vadd.f32 %v795_v25, %v794_v28  ;;  %v1227_v35 = vpop.f32.mrb[10].mxu1  ;;  %v769_v36 = vmax.f32 %v767_v26, %v768_v31  ;;  %v914_v41 = vsel %vm279_vm4, %v883_v32, -1e+30 }
 0x19d   : > { %636 = vst.msk [vmem:[#allocation2 + $0x1] sm:$0x1] %vm462_vm11, %v635_v30  ;;  %v886_v39 = vpop.f32.mrb[11].mxu1  ;;  %v943_v42 = vmul.f32 %v1438_v61, %v883_v32  ;;  %v924_v45 = vsel %vm409_vm2, %v916_v37, -inf  ;;  %v917_v46 = vsel %vm282_vm5, %v1227_v35, -1e+30  ;;  %v946_v50 = vmul.f32 %v1227_v35, %v1443_v63 }
 0x19e   : > { %639 = vst.msk [vmem:[#allocation3 + $0x1] sm:$0x1] %vm462_vm11, %v638_v33  ;;  %v797_v40 = vrot.slane %v796_v34, 4  ;;  %v770_v43 = vrot.slane %v769_v36, 2  ;;  %v944_v47 = vmul.f32 %v1445_v1, %v886_v39  ;;  %v954_v60 = vsel %vm409_vm2, %v945_v38, 0.0 }
 0x19f   : > { %v922_v49 = vsel %vm409_vm2, %v914_v41, -inf  ;;  %v951_v52 = vsel %vm409_vm2, %v943_v42, 0.0  ;;  %v915_v61 = vsel %vm280_vm6, %v886_v39, -1e+30  ;;  %v925_v56 = vsel %vm409_vm2, %v917_v46, -inf }
 0x1a0   : > { %v798_v44 = vadd.f32 %v797_v40, %v796_v34  ;;  %v771_v48 = vmax.f32 %v769_v36, %v770_v43  ;;  %v952_v53 = vsel %vm409_vm2, %v944_v47, 0.0  ;;  %v956_v6 = vsel %vm409_vm2, %v946_v50, 0.0  ;;  %v972_v47 = vld [vmem:[#allocation2 + $0x3] sm:$0x1] }
 0x1a1   : > { %v953_v57 = vadd.f32 %v952_v53, %v951_v52  ;;  %v923_v22 = vsel %vm409_vm2, %v915_v61, -inf }
 0x1a2   : > { %v799_v51 = vrot.slane %v798_v44, 2  ;;  %v1230_v54 = vpop.f32.mrb[12].mxu1  ;;  %v772_v55 = vrot.slane %v771_v48, 1 }
 0x1a3   : > { %v920_v58 = vsel %vm285_vm7, %v1230_v54, -1e+30  ;;  %v899_v59 = vpop.f32.mrb[13].mxu1  ;;  %v955_v7 = vadd.f32 %v954_v60, %v953_v57  ;;  %v949_v25 = vmul.f32 %v1230_v54, %v1450_v4 }
 0x1a4   : > { %v800_v62 = vadd.f32 %v799_v51, %v798_v44  ;;  %v930_v63 = vsel %vm409_vm2, %v920_v58, -inf  ;;  %v918_v2 = vsel %vm283_vm8, %v899_v59, -1e+30  ;;  %v947_v1 = vmul.f32 %v1458_v9, %v899_v59  ;;  %v1231_v3 = vpop.f32.mrb[14].mxu1 }
 0x1a5   : > { %v773_v5 = vmax.f32 %v771_v48, %v772_v55  ;;  %v931_v8 = vmax.f32 %v924_v45, %v930_v63  ;;  %v902_v11 = vpop.f32.mrb[15].mxu1  ;;  %v926_v13 = vsel %vm409_vm2, %v918_v2, -inf  ;;  %v921_v16 = vsel %vm286_vm9, %v1231_v3, -1e+30 }
 0x1a6   : > { %v801_v12 = vrot.slane %v800_v62, 1  ;;  %v958_v15 = vsel %vm409_vm2, %v947_v1, 0.0  ;;  %v927_v19 = vmax.f32 %v922_v49, %v926_v13  ;;  %v957_v20 = vadd.f32 %v956_v6, %v955_v7  ;;  %v975_v49 = vld [vmem:[#allocation3 + $0x3] sm:$0x1] }
 0x1a7   : > { %v804_v17 = vmax.f32 %v803_v0, %v773_v5  ;;  %v932_v9 = vsel %vm409_vm2, %v921_v16, -inf  ;;  %v919_v24 = vsel %vm284_vm10, %v902_v11, -1e+30  ;;  %v948_v28 = vmul.f32 %v1465_v14, %v902_v11 }
 0x1a8   : > { %v802_v21 = vadd.f32 %v801_v12, %v800_v62  ;;  %v933_v23 = vmax.f32 %v925_v56, %v932_v9  ;;  %v959_v26 = vadd.f32 %v958_v15, %v957_v20  ;;  %v928_v27 = vsel %vm409_vm2, %v919_v24, -inf }
 0x1a9   : > { %805 = vst.msk [vmem:[#allocation2 + $0x2] sm:$0x1] %vm462_vm11, %v804_v17  ;;  %v929_v31 = vmax.f32 %v923_v22, %v928_v27  ;;  %v950_v32 = vmul.f32 %v1231_v3, %v1460_v10  ;;  %v960_v33 = vsel %vm409_vm2, %v948_v28, 0.0  ;;  %v962_v36 = vsel %vm409_vm2, %v949_v25, 0.0 }
 0x1aa   : > { %v807_v29 = vadd.f32 %v806_v18, %v802_v21  ;;  %v935_v30 = vmax.f32 %v931_v8, %v933_v23  ;;  %v961_v35 = vadd.f32 %v960_v33, %v959_v26 }
 0x1ab   : > { %v934_v34 = vmax.f32 %v927_v19, %v929_v31  ;;  %v964_v38 = vsel %vm409_vm2, %v950_v32, 0.0 }
 0x1ac   : > { %808 = vst.msk [vmem:[#allocation3 + $0x2] sm:$0x1] %vm462_vm11, %v807_v29  ;;  %v963_v4 = vadd.f32 %v962_v36, %v961_v35 }
 0x1ad   : > { %v936_v37 = vmax.f32 %v934_v34, %v935_v30 }
 0x1ae   : > { %v965_v40 = vadd.f32 %v964_v38, %v963_v4 }
 0x1af   : > { %v937_v39 = vrot.slane %v936_v37, 4 }
 0x1b0   : > { %v966_v41 = vrot.slane %v965_v40, 4 }
 0x1b1   : > { %v938_v14 = vmax.f32 %v936_v37, %v937_v39 }
 0x1b2   : > { %v967_v43 = vadd.f32 %v966_v41, %v965_v40 }
 0x1b3   : > { %v939_v42 = vrot.slane %v938_v14, 2 }
 0x1b4   : > { %v968_v44 = vrot.slane %v967_v43, 2 }
 0x1b5   : > { %v940_v10 = vmax.f32 %v938_v14, %v939_v42 }
 0x1b6   : > { %v969_v46 = vadd.f32 %v968_v44, %v967_v43 }
 0x1b7   : > { %v941_v45 = vrot.slane %v940_v10, 1 }
 0x1b8   : > { %v970_v60 = vrot.slane %v969_v46, 1 }
 0x1b9   : > { %v942_v48 = vmax.f32 %v940_v10, %v941_v45 }
 0x1ba   : > { %v971_v50 = vadd.f32 %v970_v60, %v969_v46 }
 0x1bb   : > { %v973_v51 = vmax.f32 %v972_v47, %v942_v48 }
 0x1bc   : > { %v976_v52 = vadd.f32 %v975_v49, %v971_v50 }
 0x1bd   : > { %974 = vst.msk [vmem:[#allocation2 + $0x3] sm:$0x1] %vm462_vm11, %v973_v51 }
 0x1be   : > { %977 = vst.msk [vmem:[#allocation3 + $0x3] sm:$0x1] %vm462_vm11, %v976_v52 }
 0x1c4   : > { %v981_v54 = vld [vmem:[#allocation2] sm:$0xf] }
 0x1c5   : > { %v982_v61 = vld [vmem:[#allocation3] sm:$0xf] }
 0x1c6   : > { %v983_v53 = vmul.f32 0.015625, %v982_v61 }
 0x1c8   : > { %v984_v55 = vsub.f32 %v981_v54, %v983_v53 }
 0x1ca   : > { %986 = vst.msk [vmem:[%s238_s11] sm:$0xf] %vm244_vm1, %v984_v55 }
 0x1cb PF: > { %s13_s14 = sadd.s32 1, %s1303_s14   ;;  %s1652_s12 = smov %s1299_s13 }
 0x1cc   : > { %p10_p5 = scmp.ge.s32.totalorder %s13_s14, 4   ;;  %s1653_s13 = smov %s1655_s15 }
 0x1ce   :  { %12 = sbr.rel (!%p10_p5) target bundleno = 2 (0x2), region = 76 }

// kernel: prob_sparse_attention.6
= control target key start
LH: loop header
LB: loop body
LE: loop exit
PB: predicated region body
PF: predicated region fallthrough
CT: control target
= control target key end

     0   :  { %s1316_s15 = smov 0   ;;  %s1562_s0 = inlined_call_operand.vmem [shape: f32[2,10,64], index: 0, kind: input, shape index: {}]   ;;  %s1563_s1 = inlined_call_operand.vmem [shape: bf16[2,64,64], index: 1, kind: input, shape index: {}]   ;;  %s1564_s2 = inlined_call_operand.vmem [shape: bf16[2,64,64], index: 2, kind: input, shape index: {}]   ;;  %s1565_s3 = inlined_call_operand.vmem [shape: f32[2,10,64], index: 3, kind: output, shape index: {0}]   ;;  %s1566_s4 = inlined_call_operand.vmem [shape: f32[2,1,64], index: 4, kind: output, shape index: {1}]  }
   0x1 LB: > { %s1044_s16 = sadd.s32 4294967295, %s1281_s15   ;;  %p1048_p0 = scmp.ge.s32.totalorder %s1281_s15, 1  ;;  %s1281_s15 = sphi %s1316_s15, %s15_s15  }
   0x2   : > { %p185_p1 = scmp.lt.s32.totalorder %s1281_s15, 3 }
   0x4   : > { %p186_p2 = pnand %p1048_p0, %p185_p1 }
   0x5   : > { %p224_p3 = scmp.lt.s32.totalorder (!%p186_p2), %s1044_s16, 1  ;;  %v1283_v0 = vmov (!%p186_p2), 0.0   ;;  %vm1284_vm0 = vmmov (!%p186_p2), 0   ;;  %vm287_vm1 = vcmask (!%p186_p2), 130048   ;;  %vm344_vm2 = vcmask (!%p186_p2), 523264   ;;  %s1285_s25 = smov (!%p186_p2), 112  }
   0x6   : > { %189 = sbr.rel (%p186_p2) target bundleno = 2609 (0xa31), region = 32  ;;  %1119 = vmatprep.subr.bf16.mxu0 (!%p186_p2), %v1283_v0  ;;  %1127 = vmatprep.mubr.msk.bf16.mxu0 (!%p186_p2), %vm1284_vm0, %v1283_v0  ;;  %vm348_vm3 = vcmask (!%p186_p2), 517120   ;;  %vm938_vm4 = vcmask (!%p186_p2), 516096   ;;  %s1286_s6 = smov (!%p186_p2), 96   ;;  %vm899_vm5 = vcmask (!%p186_p2), 261120   ;;  %vm902_vm6 = vcmask (!%p186_p2), 392192  }
   0x7   : > { %1131 = vmatprep.subr.bf16.mxu1 (!%p186_p2), %v1283_v0  ;;  %1139 = vmatprep.mubr.msk.bf16.mxu1 (!%p186_p2), %vm1284_vm0, %v1283_v0  ;;  %s1287_s7 = smov (!%p186_p2), 80   ;;  %s1288_s8 = smov (!%p186_p2), 16  }
   0x8   : > { %s1289_s9 = smov (!%p186_p2), 32   ;;  %s1290_s10 = smov (!%p186_p2), 48  }
   0xd   : > { %s1568_s16 = smov (!%p224_p3, %s1044_s16), 1 }
   0xe   : > { %s1076_s17 = sshll.u32 %s1568_s16, 5  ;;  %s1075_s21 = sshll.u32 %s1568_s16, 4 }
   0xf   : > { %s233_s20 = scalar_lea.vmem %s1563_s1, %s1076_s17  ;;  %s228_s24 = scalar_lea.vmem %s1562_s0, %s1075_s21 }
  0x10   : > { %v1338_v1 = vld [vmem:[%s233_s20] sm:$0xff]   ;;  %v1343_v3 = vld [vmem:[%s233_s20 + $0x8] sm:$0xff]   ;;  %v1348_v5 = vld [vmem:[%s233_s20 + $0x10] sm:$0xff]   ;;  %s1381_s28 = scalar_lea.vmem %s1564_s2, %s1076_s17  ;;  %s246_s5 = scalar_lea.vmem %s1566_s4, %s1568_s16 }
  0x11   : > { %v292_v2 = vsel %vm287_vm1, %v1338_v1, 0  ;;  %v295_v4 = vsel %vm287_vm1, %v1343_v3, 0  ;;  %v298_v6 = vsel %vm287_vm1, %v1348_v5, 0  ;;  %v1353_v7 = vld [vmem:[%s233_s20 + $0x18] sm:$0xff]   ;;  %v248_v9 = vld [vmem:[%s228_s24] sm:$0xff]  ;;  %v1395_v34 = vld [vmem:[%s1381_s28 + $0x8] sm:$0xff]   ;;  %s243_s13 = scalar_lea.vmem %s1565_s3, %s1075_s21 }
  0x12   : > { %1120 = vmatpush3.bf16.xpose.msra.mxu0 %v292_v2  ;;  %v301_v8 = vsel %vm287_vm1, %v1353_v7, 0  ;;  %v249_v10 = vld [vmem:[%s228_s24 + $0x8] sm:$0x3]  ;;  %v1384_v18 = vld [vmem:[%s1381_s28] sm:$0xff]   ;;  %v909_v35 = vunpack.c.l.bf16 %v1395_v34  ;;  %v910_v36 = vunpack.c.h.bf16 %v1395_v34  ;;  %v1404_v40 = vld [vmem:[%s1381_s28 + $0x10] sm:$0xff]  }
  0x13   : > { %1121 = vmatprep.subr.bf16.mxu0 %v1283_v0  ;;  %v1364_v11 = vpack.c.bf16 %v249_v10, %v248_v9  ;;  %1132 = vmatpush3.bf16.msra.mxu1 %v1384_v18  ;;  %v907_v29 = vunpack.c.l.bf16 %v1384_v18  ;;  %v908_v30 = vunpack.c.h.bf16 %v1384_v18  ;;  %v911_v41 = vunpack.c.l.bf16 %v1404_v40  ;;  %v1409_v43 = vld [vmem:[%s1381_s28 + $0x18] sm:$0xff]  }
  0x14   : > { %1133 = vmatprep.subr.bf16.mxu1 %v1283_v0  ;;  %v918_v37 = vsel %vm344_vm2, %v909_v35, 0.0  ;;  %v920_v38 = vsel %vm344_vm2, %v910_v36, 0.0  ;;  %v912_v42 = vunpack.c.h.bf16 %v1404_v40  ;;  %v913_v45 = vunpack.c.l.bf16 %v1409_v43 }
  0x15   : > { %v915_v31 = vsel %vm344_vm2, %v907_v29, 0.0  ;;  %v916_v32 = vsel %vm344_vm2, %v908_v30, 0.0  ;;  %v922_v46 = vsel %vm344_vm2, %v911_v41, 0.0  ;;  %v914_v48 = vunpack.c.h.bf16 %v1409_v43 }
  0x16   : > { %v917_v33 = vadd.f32 %v916_v32, %v915_v31  ;;  %v924_v47 = vsel %vm344_vm2, %v912_v42, 0.0  ;;  %v926_v50 = vsel %vm344_vm2, %v913_v45, 0.0 }
  0x17   : > { %1134 = vmatpush3.bf16.msra.mxu1 %v1395_v34  ;;  %v928_v52 = vsel %vm344_vm2, %v914_v48, 0.0 }
  0x18   : > { %v919_v39 = vadd.f32 %v918_v37, %v917_v33  ;;  %1135 = vmatprep.subr.bf16.mxu1 %v1283_v0 }
  0x1a   : > { %1122 = vmatpush3.bf16.xpose.msra.mxu0 %v295_v4  ;;  %v921_v44 = vadd.f32 %v920_v38, %v919_v39 }
  0x1b   : > { %1123 = vmatprep.subr.bf16.mxu0 %v1283_v0  ;;  %1136 = vmatpush3.bf16.msra.mxu1 %v1404_v40 }
  0x1c   : > { %v923_v49 = vadd.f32 %v922_v46, %v921_v44  ;;  %1137 = vmatprep.subr.bf16.mxu1 %v1283_v0 }
  0x1e   : > { %v925_v51 = vadd.f32 %v924_v47, %v923_v49 }
  0x1f   : > { %1138 = vmatpush3.bf16.msra.mxu1 %v1409_v43 }
  0x20   : > { %v927_v53 = vadd.f32 %v926_v50, %v925_v51  ;;  %1143 = vmatprep.subr.bf16.mxu1 %v1283_v0 }
  0x22   : > { %1124 = vmatpush3.bf16.xpose.msra.mxu0 %v298_v6  ;;  %v929_v54 = vadd.f32 %v928_v52, %v927_v53 }
  0x23   : > { %1125 = vmatprep.subr.bf16.mxu0 %v1283_v0 }
  0x24   : > { %v930_v55 = vrot.slane %v929_v54, 4 }
  0x26   : > { %v931_v56 = vadd.f32 %v930_v55, %v929_v54 }
  0x28   : > { %v932_v57 = vrot.slane %v931_v56, 2 }
  0x2a   : > { %1126 = vmatpush3.bf16.xpose.msra.mxu0 %v301_v8  ;;  %v933_v58 = vadd.f32 %v932_v57, %v931_v56 }
  0x2b   : > { %1155 = vmatprep.subr.bf16.mxu0 %v1283_v0 }
  0x2c   : > { %v934_v59 = vrot.slane %v933_v58, 1 }
  0x2e   : > { %v935_v60 = vadd.f32 %v934_v59, %v933_v58 }
  0x30   : > { %v937_v61 = vmul.f32 0.015625, %v935_v60 }
  0x31   : > { %1128 = vmatmul.mubr.msk.bf16.vlgmr.msra.gmra.mrb[0].mxu0 %vm287_vm1, %v1364_v11 }
  0x32   : > { %1163 = vmatprep.mubr.msk.bf16.mxu0 %vm1284_vm0, %v1283_v0  ;;  %939 = vst.msk [vmem:[%s246_s5] sm:$0x1] %vm938_vm4, %v937_v61 }
 0x104   : > { %v337_v12 = vpop.f32.mrb[0].mxu0 }
 0x105   : > { %v1129_v13 = vpop.f32.mrb[1].mxu0  ;;  %v345_v14 = vsel %vm344_vm2, %v337_v12, -inf }
 0x106   : > { %346 = vmax.xlane.f32.xlu0 %v345_v14  ;;  %v340_v15 = vpop.f32.mrb[2].mxu0 }
 0x107   : > { %v1130_v16 = vpop.f32.mrb[3].mxu0  ;;  %v349_v17 = vsel %vm348_vm3, %v340_v15, -inf }
 0x10a   : > { %350 = vmax.xlane.f32.xlu0 %v349_v17 }
 0x120   : > { %440 = vrot.lane.b32.xlu0 %v1338_v1, %s1285_s25 }
 0x124   : > { %438 = vrot.lane.b32.xlu0 %v1364_v11, %s1285_s25 }
 0x193   : > { %v347_v19 = vpop.xlane.xlu0 %346 }
 0x194   : > { %v352_v20 = vsub.f32 %v337_v12, %v347_v19 }
 0x196   : > { %v354_v21 = vmul.f32 1.442695, %v352_v20 }
 0x197   : > { %v351_v22 = vpop.xlane.xlu0 %350 }
 0x198   : > { %1243 = vpow2.f32 %v354_v21  ;;  %v353_v23 = vsub.f32 %v340_v15, %v351_v22 }
 0x19a   : > { %v356_v24 = vmul.f32 1.442695, %v353_v23 }
 0x19b   : > { %v441_v6 = vpop.permute.xlu0 %440 }
 0x19c   : > { %1245 = vpow2.f32 %v356_v24  ;;  %v452_v10 = vsel %vm287_vm1, %v441_v6, 0 }
 0x19f   : > { %v439_v20 = vpop.permute.xlu0 %438 }
 0x1a2   : > { %v1244_v25 = vpop.eup %1243 }
 0x1a3   : > { %v358_v26 = vsel %vm344_vm2, %v1244_v25, 0.0 }
 0x1a4   : > { %359 = vadd.xlane.f32.xlu1 %v358_v26 }
 0x1a6   : > { %v1246_v27 = vpop.eup %1245 }
 0x1a7   : > { %v361_v28 = vsel %vm348_vm3, %v1246_v27, 0.0 }
 0x1a8   : > { %362 = vadd.xlane.f32.xlu1 %v361_v28 }
 0x1b9   : > { %442 = vrot.lane.b32.xlu1 %v1343_v3, %s1285_s25 }
 0x1bd   : > { %444 = vrot.lane.b32.xlu1 %v1348_v5, %s1285_s25 }
 0x1c1   : > { %446 = vrot.lane.b32.xlu1 %v1353_v7, %s1285_s25 }
 0x231   : > { %v360_v62 = vpop.xlane.xlu1 %359 }
 0x232   : > { %1247 = vrcp.f32 %v360_v62 }
 0x235   : > { %v363_v63 = vpop.xlane.xlu1 %362 }
 0x236   : > { %1249 = vrcp.f32 %v363_v63 }
 0x239   : > { %v443_v13 = vpop.permute.xlu1 %442 }
 0x23a   : > { %v455_v14 = vsel %vm287_vm1, %v443_v13, 0 }
 0x23c   : > { %v1248_v2 = vpop.eup %1247 }
 0x23d   : > { %v366_v8 = vmul.f32 %v1248_v2, %v1244_v25  ;;  %v445_v15 = vpop.permute.xlu1 %444 }
 0x23e   : > { %v458_v16 = vsel %vm287_vm1, %v445_v15, 0 }
 0x240   : > { %v1250_v4 = vpop.eup %1249 }
 0x241   : > { %v367_v9 = vmul.f32 %v1250_v4, %v1246_v27  ;;  %v447_v17 = vpop.permute.xlu1 %446 }
 0x242   : > { %v461_v19 = vsel %vm287_vm1, %v447_v17, 0 }
 0x243   : > { %v368_v12 = vpack.c.bf16 %v367_v9, %v366_v8 }
 0x245   : > { %1140 = vmatmul.mubr.msk.bf16.vlgmr.msra.gmra.mrb[0].mxu1 %vm344_vm2, %v368_v12 }
 0x246   : > { %1144 = vmatpush3.bf16.xpose.msra.mxu1 %v452_v10  ;;  %1151 = vmatprep.mubr.msk.bf16.mxu1 %vm1284_vm0, %v1283_v0 }
 0x247   : > { %1145 = vmatprep.subr.bf16.mxu1 %v1283_v0 }
 0x24e   : > { %1146 = vmatpush3.bf16.xpose.msra.mxu1 %v455_v14 }
 0x24f   : > { %1147 = vmatprep.subr.bf16.mxu1 %v1283_v0 }
 0x256   : > { %1148 = vmatpush3.bf16.xpose.msra.mxu1 %v458_v16 }
 0x257   : > { %1149 = vmatprep.subr.bf16.mxu1 %v1283_v0 }
 0x25e   : > { %1150 = vmatpush3.bf16.xpose.msra.mxu1 %v461_v19 }
 0x25f   : > { %1179 = vmatprep.subr.bf16.mxu1 %v1283_v0 }
 0x265   : > { %1152 = vmatmul.mubr.msk.bf16.vlgmr.msra.gmra.mrb[4].mxu1 %vm287_vm1, %v439_v20 }
 0x266   : > { %1187 = vmatprep.mubr.msk.bf16.mxu1 %vm1284_vm0, %v1283_v0 }
 0x318   : > { %v1445_v21 = vpop.f32.mrb[0].mxu1 }
 0x319   : > { %v1141_v22 = vpop.f32.mrb[1].mxu1 }
 0x31a   : > { %v1447_v23 = vpop.f32.mrb[2].mxu1 }
 0x31b   : > { %v1142_v24 = vpop.f32.mrb[3].mxu1 }
 0x338   : > { %v497_v25 = vpop.f32.mrb[4].mxu1 }
 0x339   : > { %v1153_v26 = vpop.f32.mrb[5].mxu1  ;;  %v504_v27 = vsel %vm344_vm2, %v497_v25, -inf }
 0x33a   : > { %505 = vmax.xlane.f32.xlu1 %v504_v27  ;;  %v500_v28 = vpop.f32.mrb[6].mxu1 }
 0x33b   : > { %v1154_v29 = vpop.f32.mrb[7].mxu1  ;;  %v507_v30 = vsel %vm348_vm3, %v500_v28, -inf }
 0x33c   : > { %508 = vmax.xlane.f32.xlu0 %v507_v30 }
 0x34b   : > { %527 = vrot.lane.b32.xlu1 %v1384_v18, %s1285_s25 }
 0x34f   : > { %531 = vrot.lane.b32.xlu1 %v1404_v40, %s1285_s25 }
 0x353   : > { %533 = vrot.lane.b32.xlu1 %v1409_v43, %s1285_s25 }
 0x357   : > { %585 = vrot.lane.b32.xlu1 %v1338_v1, %s1286_s6 }
 0x35b   : > { %589 = vrot.lane.b32.xlu1 %v1348_v5, %s1286_s6 }
 0x35f   : > { %583 = vrot.lane.b32.xlu1 %v1364_v11, %s1286_s6 }
 0x3c7   : > { %v506_v31 = vpop.xlane.xlu1 %505 }
 0x3c8   : > { %v510_v32 = vsub.f32 %v497_v25, %v506_v31 }
 0x3c9   : > { %v509_v33 = vpop.xlane.xlu0 %508 }
 0x3ca   : > { %v512_v35 = vmul.f32 1.442695, %v510_v32  ;;  %v511_v36 = vsub.f32 %v500_v28, %v509_v33 }
 0x3cb   : > { %v528_v44 = vpop.permute.xlu1 %527 }
 0x3cc   : > { %1251 = vpow2.f32 %v512_v35  ;;  %v514_v37 = vmul.f32 1.442695, %v511_v36  ;;  %1156 = vmatpush3.bf16.msra.mxu0 %v528_v44 }
 0x3cd   : > { %1157 = vmatprep.subr.bf16.mxu0 %v1283_v0 }
 0x3ce   : > { %1253 = vpow2.f32 %v514_v37 }
 0x3cf   : > { %v532_v48 = vpop.permute.xlu1 %531 }
 0x3d3   : > { %v534_v50 = vpop.permute.xlu1 %533 }
 0x3d6   : > { %v1252_v38 = vpop.eup %1251 }
 0x3d7   : > { %v516_v39 = vsel %vm344_vm2, %v1252_v38, 0.0  ;;  %v586_v55 = vpop.permute.xlu1 %585 }
 0x3d8   : > { %v1254_v41 = vpop.eup %1253  ;;  %517 = vadd.xlane.f32.xlu0 %v516_v39  ;;  %v597_v56 = vsel %vm287_vm1, %v586_v55, 0 }
 0x3d9   : > { %v519_v42 = vsel %vm348_vm3, %v1254_v41, 0.0 }
 0x3db   : > { %v590_v59 = vpop.permute.xlu1 %589 }
 0x3dc   : > { %520 = vadd.xlane.f32.xlu0 %v519_v42  ;;  %v603_v60 = vsel %vm287_vm1, %v590_v59, 0 }
 0x3df   : > { %v584_v63 = vpop.permute.xlu1 %583 }
 0x3f2   : > { %529 = vrot.lane.b32.xlu0 %v1395_v34, %s1285_s25 }
 0x3f6   : > { %587 = vrot.lane.b32.xlu0 %v1343_v3, %s1286_s6 }
 0x3fa   : > { %591 = vrot.lane.b32.xlu0 %v1353_v7, %s1286_s6 }
 0x465   : > { %v518_v45 = vpop.xlane.xlu0 %517 }
 0x466   : > { %1255 = vrcp.f32 %v518_v45 }
 0x469   : > { %v521_v46 = vpop.xlane.xlu0 %520 }
 0x46a   : > { %1257 = vrcp.f32 %v521_v46 }
 0x46d   : > { %v530_v47 = vpop.permute.xlu0 %529 }
 0x46e   : > { %1158 = vmatpush3.bf16.msra.mxu0 %v530_v47 }
 0x46f   : > { %1159 = vmatprep.subr.bf16.mxu0 %v1283_v0 }
 0x470   : > { %v1256_v49 = vpop.eup %1255 }
 0x471   : > { %v524_v52 = vmul.f32 %v1256_v49, %v1252_v38  ;;  %v588_v57 = vpop.permute.xlu0 %587 }
 0x472   : > { %1160 = vmatpush3.bf16.msra.mxu0 %v532_v48  ;;  %v600_v58 = vsel %vm287_vm1, %v588_v57, 0 }
 0x473   : > { %1161 = vmatprep.subr.bf16.mxu0 %v1283_v0 }
 0x474   : > { %v1258_v51 = vpop.eup %1257 }
 0x475   : > { %v525_v53 = vmul.f32 %v1258_v51, %v1254_v41  ;;  %v592_v61 = vpop.permute.xlu0 %591 }
 0x476   : > { %1162 = vmatpush3.bf16.msra.mxu0 %v534_v50  ;;  %v606_v62 = vsel %vm287_vm1, %v592_v61, 0 }
 0x477   : > { %v526_v54 = vpack.c.bf16 %v525_v53, %v524_v52  ;;  %1167 = vmatprep.subr.bf16.mxu0 %v1283_v0 }
 0x479   : > { %1164 = vmatmul.mubr.msk.bf16.vlgmr.msra.gmra.mrb[4].mxu0 %vm344_vm2, %v526_v54 }
 0x47a   : > { %1175 = vmatprep.mubr.msk.bf16.mxu0 %vm1284_vm0, %v1283_v0 }
 0x47f   : > { %1168 = vmatpush3.bf16.xpose.msra.mxu0 %v597_v56 }
 0x480   : > { %1169 = vmatprep.subr.bf16.mxu0 %v1283_v0 }
 0x487   : > { %1170 = vmatpush3.bf16.xpose.msra.mxu0 %v600_v58 }
 0x488   : > { %1171 = vmatprep.subr.bf16.mxu0 %v1283_v0 }
 0x48f   : > { %1172 = vmatpush3.bf16.xpose.msra.mxu0 %v603_v60 }
 0x490   : > { %1173 = vmatprep.subr.bf16.mxu0 %v1283_v0 }
 0x497   : > { %1174 = vmatpush3.bf16.xpose.msra.mxu0 %v606_v62 }
 0x498   : > { %1203 = vmatprep.subr.bf16.mxu0 %v1283_v0 }
 0x49e   : > { %1176 = vmatmul.mubr.msk.bf16.vlgmr.msra.gmra.mrb[8].mxu0 %vm287_vm1, %v584_v63 }
 0x49f   : > { %1211 = vmatprep.mubr.msk.bf16.mxu0 %vm1284_vm0, %v1283_v0 }
 0x54c   : > { %v1489_v2 = vpop.f32.mrb[4].mxu0 }
 0x54d   : > { %v1165_v4 = vpop.f32.mrb[5].mxu0 }
 0x54e   : > { %v1491_v6 = vpop.f32.mrb[6].mxu0 }
 0x54f   : > { %v1166_v8 = vpop.f32.mrb[7].mxu0 }
 0x571   : > { %v642_v9 = vpop.f32.mrb[8].mxu0 }
 0x572   : > { %v1177_v10 = vpop.f32.mrb[9].mxu0  ;;  %v649_v12 = vsel %vm344_vm2, %v642_v9, -inf }
 0x573   : > { %650 = vmax.xlane.f32.xlu0 %v649_v12  ;;  %v645_v13 = vpop.f32.mrb[10].mxu0 }
 0x574   : > { %v1178_v14 = vpop.f32.mrb[11].mxu0  ;;  %v652_v15 = vsel %vm348_vm3, %v645_v13, -inf }
 0x575   : > { %653 = vmax.xlane.f32.xlu1 %v652_v15 }
 0x586   : > { %674 = vrot.lane.b32.xlu1 %v1395_v34, %s1286_s6 }
 0x589   : > { %672 = vrot.lane.b32.xlu0 %v1384_v18, %s1286_s6 }
 0x58a   : > { %676 = vrot.lane.b32.xlu1 %v1404_v40, %s1286_s6 }
 0x58e   : > { %678 = vrot.lane.b32.xlu1 %v1409_v43, %s1286_s6 }
 0x592   : > { %732 = vrot.lane.b32.xlu1 %v1343_v3, %s1287_s7 }
 0x596   : > { %736 = vrot.lane.b32.xlu1 %v1353_v7, %s1287_s7 }
 0x600   : > { %v651_v16 = vpop.xlane.xlu0 %650 }
 0x601   : > { %v655_v17 = vsub.f32 %v642_v9, %v651_v16 }
 0x602   : > { %v654_v19 = vpop.xlane.xlu1 %653 }
 0x603   : > { %v657_v20 = vmul.f32 1.442695, %v655_v17  ;;  %v656_v22 = vsub.f32 %v645_v13, %v654_v19 }
 0x604   : > { %v673_v24 = vpop.permute.xlu0 %672 }
 0x605   : > { %1259 = vpow2.f32 %v657_v20  ;;  %v659_v25 = vmul.f32 1.442695, %v656_v22  ;;  %1180 = vmatpush3.bf16.msra.mxu1 %v673_v24 }
 0x606   : > { %1181 = vmatprep.subr.bf16.mxu1 %v1283_v0  ;;  %v675_v7 = vpop.permute.xlu1 %674 }
 0x607   : > { %1261 = vpow2.f32 %v659_v25 }
 0x609   : > { %1182 = vmatpush3.bf16.msra.mxu1 %v675_v7 }
 0x60a   : > { %1183 = vmatprep.subr.bf16.mxu1 %v1283_v0  ;;  %v677_v29 = vpop.permute.xlu1 %676 }
 0x60d   : > { %1184 = vmatpush3.bf16.msra.mxu1 %v677_v29 }
 0x60e   : > { %1185 = vmatprep.subr.bf16.mxu1 %v1283_v0  ;;  %v679_v30 = vpop.permute.xlu1 %678 }
 0x60f   : > { %v1260_v26 = vpop.eup %1259 }
 0x610   : > { %v661_v27 = vsel %vm344_vm2, %v1260_v26, 0.0 }
 0x611   : > { %v1262_v28 = vpop.eup %1261  ;;  %662 = vadd.xlane.f32.xlu0 %v661_v27  ;;  %1186 = vmatpush3.bf16.msra.mxu1 %v679_v30 }
 0x612   : > { %v664_v3 = vsel %vm348_vm3, %v1262_v28, 0.0  ;;  %1191 = vmatprep.subr.bf16.mxu1 %v1283_v0 }
 0x615   : > { %665 = vadd.xlane.f32.xlu0 %v664_v3 }
 0x62b   : > { %730 = vrot.lane.b32.xlu0 %v1338_v1, %s1287_s7  ;;  %v733_v1 = vpop.permute.xlu1 %732 }
 0x62f   : > { %734 = vrot.lane.b32.xlu0 %v1348_v5, %s1287_s7  ;;  %v745_v5 = vsel %vm287_vm1, %v733_v1, 0  ;;  %v737_v44 = vpop.permute.xlu1 %736 }
 0x630   : > { %v751_v45 = vsel %vm287_vm1, %v737_v44, 0 }
 0x633   : > { %728 = vrot.lane.b32.xlu0 %v1364_v11, %s1287_s7 }
 0x69e   : > { %v663_v31 = vpop.xlane.xlu0 %662 }
 0x69f   : > { %1263 = vrcp.f32 %v663_v31 }
 0x6a2   : > { %v666_v32 = vpop.xlane.xlu0 %665 }
 0x6a3   : > { %1265 = vrcp.f32 %v666_v32 }
 0x6a6   : > { %v731_v36 = vpop.permute.xlu0 %730 }
 0x6a7   : > { %v742_v39 = vsel %vm287_vm1, %v731_v36, 0 }
 0x6a9   : > { %v1264_v33 = vpop.eup %1263 }
 0x6aa   : > { %v669_v37 = vmul.f32 %v1264_v33, %v1260_v26  ;;  %v735_v11 = vpop.permute.xlu0 %734 }
 0x6ab   : > { %v748_v42 = vsel %vm287_vm1, %v735_v11, 0 }
 0x6ad   : > { %v1266_v35 = vpop.eup %1265 }
 0x6ae   : > { %v670_v38 = vmul.f32 %v1266_v35, %v1262_v28  ;;  %v729_v46 = vpop.permute.xlu0 %728 }
 0x6b0   : > { %v671_v41 = vpack.c.bf16 %v670_v38, %v669_v37 }
 0x6b2   : > { %1188 = vmatmul.mubr.msk.bf16.vlgmr.msra.gmra.mrb[8].mxu1 %vm344_vm2, %v671_v41 }
 0x6b3   : > { %1192 = vmatpush3.bf16.xpose.msra.mxu1 %v742_v39  ;;  %1199 = vmatprep.mubr.msk.bf16.mxu1 %vm1284_vm0, %v1283_v0 }
 0x6b4   : > { %1193 = vmatprep.subr.bf16.mxu1 %v1283_v0 }
 0x6bb   : > { %1194 = vmatpush3.bf16.xpose.msra.mxu1 %v745_v5 }
 0x6bc   : > { %1195 = vmatprep.subr.bf16.mxu1 %v1283_v0 }
 0x6c3   : > { %1196 = vmatpush3.bf16.xpose.msra.mxu1 %v748_v42 }
 0x6c4   : > { %1197 = vmatprep.subr.bf16.mxu1 %v1283_v0 }
 0x6cb   : > { %1198 = vmatpush3.bf16.xpose.msra.mxu1 %v751_v45 }
 0x6d2   : > { %1200 = vmatmul.mubr.msk.bf16.vlgmr.msra.gmra.mrb[12].mxu1 %vm287_vm1, %v729_v46 }
 0x785   : > { %v721_v47 = vpop.f32.mrb[8].mxu1 }
 0x786   : > { %v1189_v48 = vpop.f32.mrb[9].mxu1 }
 0x787   : > { %v724_v49 = vpop.f32.mrb[10].mxu1 }
 0x788   : > { %v1190_v50 = vpop.f32.mrb[11].mxu1 }
 0x7a5   : > { %v787_v51 = vpop.f32.mrb[12].mxu1 }
 0x7a6   : > { %v1201_v52 = vpop.f32.mrb[13].mxu1  ;;  %v794_v53 = vsel %vm344_vm2, %v787_v51, -inf }
 0x7a7   : > { %795 = vmax.xlane.f32.xlu1 %v794_v53  ;;  %v790_v54 = vpop.f32.mrb[14].mxu1 }
 0x7a8   : > { %v1202_v55 = vpop.f32.mrb[15].mxu1  ;;  %v797_v56 = vsel %vm348_vm3, %v790_v54, -inf }
 0x7a9   : > { %798 = vmax.xlane.f32.xlu0 %v797_v56 }
 0x7b8   : > { %817 = vrot.lane.b32.xlu1 %v1384_v18, %s1287_s7 }
 0x7bc   : > { %821 = vrot.lane.b32.xlu1 %v1404_v40, %s1287_s7 }
 0x7c0   : > { %823 = vrot.lane.b32.xlu1 %v1409_v43, %s1287_s7 }
 0x7c4   : > { %875 = vrot.lane.b32.xlu1 %v1489_v2, %s1288_s8 }
 0x7c8   : > { %883 = vrot.lane.b32.xlu1 %v721_v47, %s1289_s9 }
 0x834   : > { %v796_v57 = vpop.xlane.xlu1 %795 }
 0x835   : > { %v800_v58 = vsub.f32 %v787_v51, %v796_v57 }
 0x836   : > { %v799_v59 = vpop.xlane.xlu0 %798 }
 0x837   : > { %v802_v60 = vmul.f32 1.442695, %v800_v58  ;;  %v801_v61 = vsub.f32 %v790_v54, %v799_v59 }
 0x838   : > { %v818_v62 = vpop.permute.xlu1 %817 }
 0x839   : > { %1267 = vpow2.f32 %v802_v60  ;;  %v804_v63 = vmul.f32 1.442695, %v801_v61  ;;  %1204 = vmatpush3.bf16.msra.mxu0 %v818_v62 }
 0x83a   : > { %1205 = vmatprep.subr.bf16.mxu0 %v1283_v0 }
 0x83b   : > { %1269 = vpow2.f32 %v804_v63 }
 0x83c   : > { %v822_v10 = vpop.permute.xlu1 %821 }
 0x840   : > { %v824_v14 = vpop.permute.xlu1 %823 }
 0x843   : > { %v1268_v18 = vpop.eup %1267 }
 0x844   : > { %v806_v40 = vsel %vm344_vm2, %v1268_v18, 0.0  ;;  %v876_v22 = vpop.permute.xlu1 %875 }
 0x845   : > { %v1270_v43 = vpop.eup %1269  ;;  %807 = vadd.xlane.f32.xlu0 %v806_v40  ;;  %v897_v26 = vsel %vm287_vm1, %v1445_v21, %v876_v22 }
 0x846   : > { %v809_v2 = vsel %vm348_vm3, %v1270_v43, 0.0 }
 0x848   : > { %v884_v25 = vpop.permute.xlu1 %883 }
 0x849   : > { %810 = vadd.xlane.f32.xlu0 %v809_v2  ;;  %v900_v27 = vsel %vm899_vm5, %v897_v26, %v884_v25 }
 0x85f   : > { %819 = vrot.lane.b32.xlu0 %v1395_v34, %s1287_s7 }
 0x863   : > { %877 = vrot.lane.b32.xlu0 %v1491_v6, %s1288_s8 }
 0x867   : > { %885 = vrot.lane.b32.xlu0 %v724_v49, %s1289_s9 }
 0x8d2   : > { %v808_v4 = vpop.xlane.xlu0 %807 }
 0x8d3   : > { %1271 = vrcp.f32 %v808_v4 }
 0x8d6   : > { %v811_v8 = vpop.xlane.xlu0 %810 }
 0x8d7   : > { %1273 = vrcp.f32 %v811_v8 }
 0x8da   : > { %v820_v9 = vpop.permute.xlu0 %819 }
 0x8db   : > { %1206 = vmatpush3.bf16.msra.mxu0 %v820_v9 }
 0x8dc   : > { %1207 = vmatprep.subr.bf16.mxu0 %v1283_v0 }
 0x8dd   : > { %v1272_v12 = vpop.eup %1271 }
 0x8de   : > { %v814_v15 = vmul.f32 %v1272_v12, %v1268_v18  ;;  %v878_v24 = vpop.permute.xlu0 %877 }
 0x8df   : > { %1208 = vmatpush3.bf16.msra.mxu0 %v822_v10  ;;  %v898_v3 = vsel %vm287_vm1, %v1447_v23, %v878_v24 }
 0x8e0   : > { %1209 = vmatprep.subr.bf16.mxu0 %v1283_v0 }
 0x8e1   : > { %v1274_v13 = vpop.eup %1273 }
 0x8e2   : > { %v815_v34 = vmul.f32 %v1274_v13, %v1270_v43  ;;  %v886_v0 = vpop.permute.xlu0 %885 }
 0x8e3   : > { %1210 = vmatpush3.bf16.msra.mxu0 %v824_v14  ;;  %v901_v29 = vsel %vm899_vm5, %v898_v3, %v886_v0 }
 0x8e4   : > { %v816_v6 = vpack.c.bf16 %v815_v34, %v814_v15 }
 0x8e6   : > { %1212 = vmatmul.mubr.msk.bf16.vlgmr.msra.gmra.mrb[12].mxu0 %vm344_vm2, %v816_v6 }
 0x9b9   : > { %v866_v16 = vpop.f32.mrb[12].mxu0 }
 0x9ba   : > { %891 = vrot.lane.b32.xlu1 %v866_v16, %s1290_s10  ;;  %v1213_v17 = vpop.f32.mrb[13].mxu0 }
 0x9bb   : > { %v869_v19 = vpop.f32.mrb[14].mxu0 }
 0x9bc   : > { %893 = vrot.lane.b32.xlu0 %v869_v19, %s1290_s10  ;;  %v1214_v20 = vpop.f32.mrb[15].mxu0 }
 0xa2c   : > { %v892_v28 = vpop.permute.xlu1 %891 }
 0xa2d   : > { %v903_v7 = vsel %vm902_vm6, %v900_v27, %v892_v28 }
 0xa2e   : > { %905 = vst.msk [vmem:[%s243_s13] sm:$0xff] %vm344_vm2, %v903_v7  ;;  %v894_v30 = vpop.permute.xlu0 %893 }
 0xa2f   : > { %v904_v31 = vsel %vm902_vm6, %v901_v29, %v894_v30 }
 0xa30   : > { %906 = vst.msk [vmem:[%s243_s13 + $0x8] sm:$0x3] %vm348_vm3, %v904_v31 }
 0xa31 PF: > { %s15_s15 = sadd.s32 1, %s1281_s15  }
 0xa32   : > { %p12_p4 = scmp.ge.s32.totalorder %s15_s15, 4  }
 0xa34   :  { %14 = sbr.rel (!%p12_p4) target bundleno = 1 (0x1), region = 80 }

// kernel: prob_sparse_attention.7
= control target key start
LH: loop header
LB: loop body
LE: loop exit
PB: predicated region body
PF: predicated region fallthrough
CT: control target
= control target key end

     0   :  { %vm55_vm0 = vcmask 523264   ;;  %s1175_s0 = inlined_call_operand.vmem [shape: f32[128,64], index: 0, kind: input, shape index: {}]   ;;  %s1176_s1 = inlined_call_operand.vmem [shape: f32[64,64], index: 1, kind: input, shape index: {}]   ;;  %s1177_s2 = inlined_call_operand.vmem [shape: f32[1,64], index: 2, kind: input, shape index: {}]   ;;  %s1178_s3 = inlined_call_operand.vmem [shape: f32[128,64], index: 3, kind: input, shape index: {}]   ;;  %s1179_s4 = inlined_call_operand.vmem [shape: f32[1,64], index: 4, kind: input, shape index: {}]   ;;  %s1180_s5 = inlined_call_operand.vmem [shape: f32[1,64], index: 5, kind: input, shape index: {}]   ;;  %s1181_s6 = inlined_call_operand.hbm [shape: f32[128,64], index: 6, kind: output, shape index: {}]  }
   0x1   :  { %v40_v0 = vld [vmem:[%s1176_s1] sm:$0xff]  ;;  %v41_v1 = vld [vmem:[%s1176_s1 + $0x8] sm:$0xff]  ;;  %v42_v2 = vld [vmem:[%s1176_s1 + $0x10] sm:$0xff] }
   0x2   :  { %v651_v3 = vpack.c.bf16 %v41_v1, %v40_v0  ;;  %v43_v4 = vld [vmem:[%s1176_s1 + $0x18] sm:$0xff]  ;;  %v44_v6 = vld [vmem:[%s1176_s1 + $0x20] sm:$0xff]  ;;  %v45_v7 = vld [vmem:[%s1176_s1 + $0x28] sm:$0xff] }
   0x3   :  { %v655_v5 = vpack.c.bf16 %v43_v4, %v42_v2  ;;  %v24_v8 = vld [vmem:[%s1175_s0] sm:$0xff]  ;;  %v659_v10 = vpack.c.bf16 %v45_v7, %v44_v6  ;;  %v46_v11 = vld [vmem:[%s1176_s1 + $0x30] sm:$0xff]  ;;  %v47_v12 = vld [vmem:[%s1176_s1 + $0x38] sm:$0xff] }
   0x4   :  { %652 = vmatprep.subr.bf16.mxu0 %v651_v3  ;;  %667 = vmatprep.subr.bf16.mxu1 %v651_v3  ;;  %v32_v9 = vld [vmem:[%s1175_s0 + $0x40] sm:$0xff] }
   0x5   :  { %654 = vmatpush3.bf16.msra.mxu0 %v651_v3  ;;  %671 = vmatpush3.bf16.msra.mxu1 %v651_v3 }
   0x6   :  { %656 = vmatprep.subr.bf16.mxu0 %v655_v5  ;;  %668 = vmatprep.subr.bf16.mxu1 %v655_v5 }
   0x7   :  { %627 = vmatprep.mubr.msk.f32.mxu0 %vm55_vm0, %v24_v8  ;;  %639 = vmatprep.mubr.msk.f32.mxu1 %vm55_vm0, %v32_v9 }
   0x9   :  { %658 = vmatpush3.bf16.msra.mxu0 %v655_v5  ;;  %672 = vmatpush3.bf16.msra.mxu1 %v655_v5 }
   0xa   :  { %11 = vsyncpa [#allocation3], 0  ;;  %660 = vmatprep.subr.bf16.mxu0 %v659_v10  ;;  %669 = vmatprep.subr.bf16.mxu1 %v659_v10  ;;  %v663_v13 = vpack.c.bf16 %v47_v12, %v46_v11  ;;  %v25_v14 = vld [vmem:[%s1175_s0 + $0x8] sm:$0xff]  ;;  %v26_v16 = vld [vmem:[%s1175_s0 + $0x10] sm:$0xff] }
   0xb   :  { %v33_v15 = vld [vmem:[%s1175_s0 + $0x48] sm:$0xff]  ;;  %v34_v17 = vld [vmem:[%s1175_s0 + $0x50] sm:$0xff]  ;;  %v27_v18 = vld [vmem:[%s1175_s0 + $0x18] sm:$0xff] }
   0xc   :  { %v35_v19 = vld [vmem:[%s1175_s0 + $0x58] sm:$0xff]  ;;  %v28_v20 = vld [vmem:[%s1175_s0 + $0x20] sm:$0xff]  ;;  %v29_v22 = vld [vmem:[%s1175_s0 + $0x28] sm:$0xff] }
   0xd   :  { %662 = vmatpush3.bf16.msra.mxu0 %v659_v10  ;;  %673 = vmatpush3.bf16.msra.mxu1 %v659_v10  ;;  %v36_v21 = vld [vmem:[%s1175_s0 + $0x60] sm:$0xff]  ;;  %v37_v23 = vld [vmem:[%s1175_s0 + $0x68] sm:$0xff]  ;;  %v30_v24 = vld [vmem:[%s1175_s0 + $0x30] sm:$0xff] }
   0xe   :  { %664 = vmatprep.subr.bf16.mxu0 %v663_v13  ;;  %670 = vmatprep.subr.bf16.mxu1 %v663_v13  ;;  %v38_v25 = vld [vmem:[%s1175_s0 + $0x70] sm:$0xff]  ;;  %v31_v26 = vld [vmem:[%s1175_s0 + $0x38] sm:$0xff]  ;;  %v863_v28 = vld [vmem:[%s1177_s2] ss:$0 sm:$0xff] }
   0xf   :  { %v39_v27 = vld [vmem:[%s1175_s0 + $0x78] sm:$0xff]  ;;  %v258_v31 = vld [vmem:[%s1178_s3 + $0x48] sm:$0xff]  ;;  %v249_v37 = vld [vmem:[%s1178_s3] sm:$0xff] }
  0x10   :  { %v250_v32 = vld [vmem:[%s1178_s3 + $0x8] sm:$0xff]  ;;  %v252_v44 = vld [vmem:[%s1178_s3 + $0x18] sm:$0xff]  ;;  %v257_v53 = vld [vmem:[%s1178_s3 + $0x40] sm:$0xff] }
  0x11   :  { %666 = vmatpush3.bf16.msra.mxu0 %v663_v13  ;;  %674 = vmatpush3.bf16.msra.mxu1 %v663_v13  ;;  %v260_v46 = vld [vmem:[%s1178_s3 + $0x58] sm:$0xff]  ;;  %v251_v1 = vld [vmem:[%s1178_s3 + $0x10] sm:$0xff]  ;;  %v254_v6 = vld [vmem:[%s1178_s3 + $0x28] sm:$0xff] }
  0x12   :  { %v259_v2 = vld [vmem:[%s1178_s3 + $0x50] sm:$0xff]  ;;  %v253_v7 = vld [vmem:[%s1178_s3 + $0x20] sm:$0xff] }
  0x14   :  { %628 = vmatmul.mubr.msk.f32.vlgmr.msra.gmra.mrb[0].mxu0 %vm55_vm0, %v25_v14  ;;  %640 = vmatmul.mubr.msk.f32.vlgmr.msra.gmra.mrb[0].mxu1 %vm55_vm0, %v33_v15 }
  0x15   :  { %630 = vmatprep.mubr.msk.f32.mxu0 %vm55_vm0, %v26_v16  ;;  %642 = vmatprep.mubr.msk.f32.mxu1 %vm55_vm0, %v34_v17 }
  0x18   :  { %631 = vmatmul.mubr.msk.f32.gmra.mrb[2].mxu0 %vm55_vm0, %v27_v18  ;;  %643 = vmatmul.mubr.msk.f32.gmra.mrb[2].mxu1 %vm55_vm0, %v35_v19  ;;  %v262_v19 = vld [vmem:[%s1178_s3 + $0x68] sm:$0xff] }
  0x19   :  { %633 = vmatprep.mubr.msk.f32.mxu0 %vm55_vm0, %v28_v20  ;;  %645 = vmatprep.mubr.msk.f32.mxu1 %vm55_vm0, %v36_v21  ;;  %v261_v20 = vld [vmem:[%s1178_s3 + $0x60] sm:$0xff] }
  0x1c   :  { %634 = vmatmul.mubr.msk.f32.gmra.mrb[4].mxu0 %vm55_vm0, %v29_v22  ;;  %646 = vmatmul.mubr.msk.f32.gmra.mrb[4].mxu1 %vm55_vm0, %v37_v23 }
  0x1d   :  { %636 = vmatprep.mubr.msk.f32.mxu0 %vm55_vm0, %v30_v24  ;;  %648 = vmatprep.mubr.msk.f32.mxu1 %vm55_vm0, %v38_v25 }
  0x20   :  { %637 = vmatmul.mubr.msk.f32.gmra.mrb[6].mxu0 %vm55_vm0, %v31_v26  ;;  %649 = vmatmul.mubr.msk.f32.gmra.mrb[6].mxu1 %vm55_vm0, %v39_v27 }
  0xe7   :  { %v629_v29 = vpop.f32.mrb[0].mxu0  ;;  %v641_v30 = vpop.f32.mrb[0].mxu1 }
  0xe8   :  { %v176_v33 = vadd.f32 %v629_v29, %v863_v28  ;;  %v216_v34 = vadd.f32 %v641_v30, %v863_v28  ;;  %v170_v35 = vpop.f32.mrb[1].mxu0  ;;  %v210_v36 = vpop.f32.mrb[1].mxu1  ;;  %v256_v30 = vld [vmem:[%s1178_s3 + $0x38] sm:$0xff] }
  0xe9   :  { %v171_v38 = vadd.f32 %v863_v28, %v170_v35  ;;  %v211_v41 = vadd.f32 %v863_v28, %v210_v36 }
  0xea   :  { %v877_v39 = vadd.f32 %v258_v31, %v216_v34  ;;  %v879_v40 = vadd.f32 %v250_v32, %v176_v33  ;;  %v255_v31 = vld [vmem:[%s1178_s3 + $0x30] sm:$0xff] }
  0xeb   :  { %v632_v42 = vpop.f32.mrb[2].mxu0  ;;  %v644_v43 = vpop.f32.mrb[2].mxu1  ;;  %v885_v45 = vadd.f32 %v249_v37, %v171_v38  ;;  %v903_v56 = vadd.f32 %v257_v53, %v211_v41  ;;  %v264_v38 = vld [vmem:[%s1178_s3 + $0x78] sm:$0xff]  ;;  %v263_v41 = vld [vmem:[%s1178_s3 + $0x70] sm:$0xff] }
  0xec   :  { %v186_v47 = vadd.f32 %v632_v42, %v863_v28  ;;  %v180_v48 = vpop.f32.mrb[3].mxu0  ;;  %v308_v49 = vsel %vm55_vm0, %v877_v39, 0.0  ;;  %v284_v50 = vsel %vm55_vm0, %v879_v40, 0.0  ;;  %v226_v51 = vadd.f32 %v644_v43, %v863_v28  ;;  %v220_v52 = vpop.f32.mrb[3].mxu1 }
  0xed   :  { %309 = vadd.xlane.f32.xlu1 %v308_v49  ;;  %285 = vadd.xlane.f32.xlu0 %v284_v50  ;;  %v181_v59 = vadd.f32 %v863_v28, %v180_v48  ;;  %v221_v60 = vadd.f32 %v863_v28, %v220_v52  ;;  %v281_v62 = vsel %vm55_vm0, %v885_v45, 0.0  ;;  %v305_v10 = vsel %vm55_vm0, %v903_v56, 0.0 }
  0xee   :  { %v899_v54 = vadd.f32 %v252_v44, %v186_v47  ;;  %v901_v55 = vadd.f32 %v260_v46, %v226_v51 }
  0xef   :  { %v635_v57 = vpop.f32.mrb[4].mxu0  ;;  %v647_v58 = vpop.f32.mrb[4].mxu1  ;;  %v929_v11 = vadd.f32 %v251_v1, %v181_v59  ;;  %v931_v12 = vadd.f32 %v259_v2, %v221_v60 }
  0xf0   :  { %v290_v61 = vsel %vm55_vm0, %v899_v54, 0.0  ;;  %v190_v63 = vpop.f32.mrb[5].mxu0  ;;  %v230_v0 = vpop.f32.mrb[5].mxu1  ;;  %v314_v3 = vsel %vm55_vm0, %v901_v55, 0.0  ;;  %v196_v4 = vadd.f32 %v635_v57, %v863_v28  ;;  %v236_v15 = vadd.f32 %v647_v58, %v863_v28 }
  0xf1   :  { %291 = vadd.xlane.f32.xlu1 %v290_v61  ;;  %282 = vadd.xlane.f32.xlu0 %v281_v62  ;;  %v191_v5 = vadd.f32 %v863_v28, %v190_v63  ;;  %v231_v16 = vadd.f32 %v863_v28, %v230_v0  ;;  %v287_v21 = vsel %vm55_vm0, %v929_v11, 0.0  ;;  %v311_v22 = vsel %vm55_vm0, %v931_v12, 0.0 }
  0xf2   :  { %v935_v17 = vadd.f32 %v254_v6, %v196_v4  ;;  %v949_v23 = vadd.f32 %v262_v19, %v236_v15 }
  0xf3   :  { %v638_v8 = vpop.f32.mrb[6].mxu0  ;;  %v650_v9 = vpop.f32.mrb[6].mxu1  ;;  %v937_v18 = vadd.f32 %v253_v7, %v191_v5  ;;  %v951_v24 = vadd.f32 %v261_v20, %v231_v16 }
  0xf4   :  { %v200_v13 = vpop.f32.mrb[7].mxu0  ;;  %v240_v14 = vpop.f32.mrb[7].mxu1  ;;  %v296_v25 = vsel %vm55_vm0, %v935_v17, 0.0  ;;  %v206_v27 = vadd.f32 %v638_v8, %v863_v28  ;;  %v320_v32 = vsel %vm55_vm0, %v949_v23, 0.0  ;;  %v246_v33 = vadd.f32 %v650_v9, %v863_v28 }
  0xf5   :  { %315 = vadd.xlane.f32.xlu1 %v314_v3  ;;  %306 = vadd.xlane.f32.xlu0 %v305_v10  ;;  %v293_v26 = vsel %vm55_vm0, %v937_v18, 0.0  ;;  %v201_v29 = vadd.f32 %v863_v28, %v200_v13  ;;  %v317_v34 = vsel %vm55_vm0, %v951_v24, 0.0  ;;  %v241_v35 = vadd.f32 %v863_v28, %v240_v14 }
  0xf6   :  { %v971_v36 = vadd.f32 %v256_v30, %v206_v27  ;;  %v985_v43 = vadd.f32 %v264_v38, %v246_v33 }
  0xf7   :  { %v973_v37 = vadd.f32 %v255_v31, %v201_v29  ;;  %v987_v44 = vadd.f32 %v263_v41, %v241_v35 }
  0xf8   :  { %v302_v42 = vsel %vm55_vm0, %v971_v36, 0.0  ;;  %v326_v46 = vsel %vm55_vm0, %v985_v43, 0.0 }
  0xf9   :  { %288 = vadd.xlane.f32.xlu1 %v287_v21  ;;  %312 = vadd.xlane.f32.xlu0 %v311_v22  ;;  %v299_v28 = vsel %vm55_vm0, %v973_v37, 0.0  ;;  %v323_v47 = vsel %vm55_vm0, %v987_v44, 0.0 }
  0xfd   :  { %297 = vadd.xlane.f32.xlu1 %v296_v25  ;;  %294 = vadd.xlane.f32.xlu0 %v293_v26 }
 0x101   :  { %321 = vadd.xlane.f32.xlu1 %v320_v32  ;;  %318 = vadd.xlane.f32.xlu0 %v317_v34 }
 0x105   :  { %303 = vadd.xlane.f32.xlu1 %v302_v42  ;;  %300 = vadd.xlane.f32.xlu0 %v299_v28 }
 0x109   :  { %327 = vadd.xlane.f32.xlu1 %v326_v46  ;;  %324 = vadd.xlane.f32.xlu0 %v323_v47 }
 0x17a   :  { %v310_v48 = vpop.xlane.xlu1 %309  ;;  %v286_v49 = vpop.xlane.xlu0 %285 }
 0x17b   :  { %v339_v50 = vmul.f32 0.015625, %v310_v48  ;;  %v331_v51 = vmul.f32 0.015625, %v286_v49 }
 0x17d   :  { %v994_v52 = vsub.f32 %v877_v39, %v339_v50  ;;  %v997_v53 = vsub.f32 %v879_v40, %v331_v51 }
 0x17e   :  { %v292_v57 = vpop.xlane.xlu1 %291  ;;  %v283_v58 = vpop.xlane.xlu0 %282 }
 0x17f   :  { %v333_v59 = vmul.f32 0.015625, %v292_v57  ;;  %v330_v60 = vmul.f32 0.015625, %v283_v58  ;;  %v363_v61 = vmul.f32 %v997_v53, %v997_v53  ;;  %v371_v39 = vmul.f32 %v994_v52, %v994_v52 }
 0x181   :  { %v1002_v62 = vsub.f32 %v899_v54, %v333_v59  ;;  %v1005_v63 = vsub.f32 %v885_v45, %v330_v60  ;;  %v381_v0 = vsel %vm55_vm0, %v363_v61, 0.0  ;;  %v405_v6 = vsel %vm55_vm0, %v371_v39, 0.0 }
 0x182   :  { %v316_v40 = vpop.xlane.xlu1 %315  ;;  %382 = vadd.xlane.f32.xlu1 %v381_v0  ;;  %v307_v1 = vpop.xlane.xlu0 %306 }
 0x183   :  { %v341_v2 = vmul.f32 0.015625, %v316_v40  ;;  %v338_v3 = vmul.f32 0.015625, %v307_v1  ;;  %v362_v4 = vmul.f32 %v1005_v63, %v1005_v63  ;;  %v365_v54 = vmul.f32 %v1002_v62, %v1002_v62 }
 0x185   :  { %v1015_v5 = vsub.f32 %v901_v55, %v341_v2  ;;  %v1018_v45 = vsub.f32 %v903_v56, %v338_v3  ;;  %v378_v7 = vsel %vm55_vm0, %v362_v4, 0.0  ;;  %v387_v15 = vsel %vm55_vm0, %v365_v54, 0.0 }
 0x186   :  { %406 = vadd.xlane.f32.xlu1 %v405_v6  ;;  %v289_v8 = vpop.xlane.xlu1 %288  ;;  %379 = vadd.xlane.f32.xlu0 %v378_v7  ;;  %v313_v9 = vpop.xlane.xlu0 %312 }
 0x187   :  { %v332_v10 = vmul.f32 0.015625, %v289_v8  ;;  %v340_v13 = vmul.f32 0.015625, %v313_v9  ;;  %v370_v14 = vmul.f32 %v1018_v45, %v1018_v45  ;;  %v373_v19 = vmul.f32 %v1015_v5, %v1015_v5 }
 0x189   :  { %v1026_v55 = vsub.f32 %v929_v11, %v332_v10  ;;  %v1029_v56 = vsub.f32 %v931_v12, %v340_v13  ;;  %v402_v16 = vsel %vm55_vm0, %v370_v14, 0.0  ;;  %v411_v29 = vsel %vm55_vm0, %v373_v19, 0.0 }
 0x18a   :  { %388 = vadd.xlane.f32.xlu1 %v387_v15  ;;  %v298_v20 = vpop.xlane.xlu1 %297  ;;  %403 = vadd.xlane.f32.xlu0 %v402_v16  ;;  %v295_v21 = vpop.xlane.xlu0 %294 }
 0x18b   :  { %v335_v22 = vmul.f32 0.015625, %v298_v20  ;;  %v334_v25 = vmul.f32 0.015625, %v295_v21  ;;  %v364_v26 = vmul.f32 %v1026_v55, %v1026_v55  ;;  %v372_v11 = vmul.f32 %v1029_v56, %v1029_v56 }
 0x18d   :  { %v1039_v12 = vsub.f32 %v935_v17, %v335_v22  ;;  %v1042_v27 = vsub.f32 %v937_v18, %v334_v25  ;;  %v384_v30 = vsel %vm55_vm0, %v364_v26, 0.0  ;;  %v408_v38 = vsel %vm55_vm0, %v372_v11, 0.0 }
 0x18e   :  { %412 = vadd.xlane.f32.xlu1 %v411_v29  ;;  %v322_v31 = vpop.xlane.xlu1 %321  ;;  %385 = vadd.xlane.f32.xlu0 %v384_v30  ;;  %v319_v32 = vpop.xlane.xlu0 %318 }
 0x18f   :  { %v343_v33 = vmul.f32 0.015625, %v322_v31  ;;  %v342_v34 = vmul.f32 0.015625, %v319_v32  ;;  %v367_v35 = vmul.f32 %v1039_v12, %v1039_v12  ;;  %v366_v42 = vmul.f32 %v1042_v27, %v1042_v27  ;;  %v1092_v32 = vld [vmem:[%s1179_s4] ss:$0 sm:$0xff]  ;;  %s734_s4 = smov [#allocation2]  }
 0x191   :  { %v1050_v17 = vsub.f32 %v949_v23, %v343_v33  ;;  %v1053_v18 = vsub.f32 %v951_v24, %v342_v34  ;;  %v393_v41 = vsel %vm55_vm0, %v367_v35, 0.0  ;;  %v390_v57 = vsel %vm55_vm0, %v366_v42, 0.0  ;;  %v1098_v42 = vld [vmem:[%s1180_s5] ss:$0 sm:$0xff]  ;;  %s557_s5 = sshll.u32 %s734_s4, 4  ;;  %s558_s5 = int_to_ptr.vmem [resolvable:$true] %s557_s5 }
 0x192   :  { %394 = vadd.xlane.f32.xlu1 %v393_v41  ;;  %v304_v28 = vpop.xlane.xlu1 %303  ;;  %409 = vadd.xlane.f32.xlu0 %v408_v38  ;;  %v301_v46 = vpop.xlane.xlu0 %300  ;;  %s710_s27 = scalar_lea.vmem %s558_s5, 2048  ;;  %p715_p1 = scmp.lt.s32.totalorder %s558_s5, %s558_s5 }
 0x193   :  { %v337_v47 = vmul.f32 0.015625, %v304_v28  ;;  %v336_v48 = vmul.f32 0.015625, %v301_v46  ;;  %v375_v49 = vmul.f32 %v1050_v17, %v1050_v17  ;;  %v374_v23 = vmul.f32 %v1053_v18, %v1053_v18  ;;  %p711_p0 = scmp.ne.s32.totalorder %s558_s5, %s710_s27  ;;  %p716_p2 = scmp.lt.s32.totalorder %s710_s27, %s710_s27 }
 0x195   :  { %v1063_v24 = vsub.f32 %v971_v36, %v337_v47  ;;  %v1066_v50 = vsub.f32 %v973_v37, %v336_v48  ;;  %v417_v51 = vsel %vm55_vm0, %v375_v49, 0.0  ;;  %v414_v39 = vsel %vm55_vm0, %v374_v23, 0.0  ;;  %p717_p3 = por %p716_p2, %p715_p1 }
 0x196   :  { %418 = vadd.xlane.f32.xlu1 %v417_v51  ;;  %v328_v58 = vpop.xlane.xlu1 %327  ;;  %391 = vadd.xlane.f32.xlu0 %v390_v57  ;;  %v325_v59 = vpop.xlane.xlu0 %324 }
 0x197   :  { %v345_v60 = vmul.f32 0.015625, %v328_v58  ;;  %v344_v61 = vmul.f32 0.015625, %v325_v59  ;;  %v369_v0 = vmul.f32 %v1063_v24, %v1063_v24  ;;  %v368_v1 = vmul.f32 %v1066_v50, %v1066_v50  ;;  %p718_p4 = pnand %p717_p3, %p711_p0 }
 0x199   :  { %v1074_v36 = vsub.f32 %v985_v43, %v345_v60  ;;  %v1077_v37 = vsub.f32 %v987_v44, %v344_v61  ;;  %v399_v40 = vsel %vm55_vm0, %v369_v0, 0.0  ;;  %v396_v4 = vsel %vm55_vm0, %v368_v1, 0.0 }
 0x19a   :  { %400 = vadd.xlane.f32.xlu1 %v399_v40  ;;  %415 = vadd.xlane.f32.xlu0 %v414_v39 }
 0x19b   :  { %v377_v2 = vmul.f32 %v1074_v36, %v1074_v36  ;;  %v376_v43 = vmul.f32 %v1077_v37, %v1077_v37 }
 0x19d   :  { %v423_v3 = vsel %vm55_vm0, %v377_v2, 0.0  ;;  %v420_v44 = vsel %vm55_vm0, %v376_v43, 0.0 }
 0x19e   :  { %424 = vadd.xlane.f32.xlu1 %v423_v3  ;;  %397 = vadd.xlane.f32.xlu0 %v396_v4 }
 0x1a2   :  { %421 = vadd.xlane.f32.xlu0 %v420_v44 }
 0x20f   :  { %v383_v54 = vpop.xlane.xlu1 %382 }
 0x210   :  { %v427_v6 = vmul.f32 0.015625, %v383_v54 }
 0x212   :  { %v443_v7 = vadd.f32 1e-06, %v427_v6 }
 0x213   :  { %v407_v8 = vpop.xlane.xlu1 %406  ;;  %v380_v9 = vpop.xlane.xlu0 %379 }
 0x214   :  { %678 = vrsqrt.f32 %v443_v7  ;;  %v435_v10 = vmul.f32 0.015625, %v407_v8  ;;  %v426_v13 = vmul.f32 0.015625, %v380_v9 }
 0x216   :  { %v451_v14 = vadd.f32 1e-06, %v435_v10  ;;  %v442_v15 = vadd.f32 1e-06, %v426_v13 }
 0x217   :  { %v389_v16 = vpop.xlane.xlu1 %388  ;;  %v404_v19 = vpop.xlane.xlu0 %403 }
 0x218   :  { %680 = vrsqrt.f32 %v451_v14  ;;  %v429_v20 = vmul.f32 0.015625, %v389_v16  ;;  %v434_v21 = vmul.f32 0.015625, %v404_v19 }
 0x219   :  { %682 = vrsqrt.f32 %v442_v15 }
 0x21a   :  { %v445_v22 = vadd.f32 1e-06, %v429_v20  ;;  %v450_v25 = vadd.f32 1e-06, %v434_v21 }
 0x21b   :  { %v413_v26 = vpop.xlane.xlu1 %412  ;;  %v386_v11 = vpop.xlane.xlu0 %385 }
 0x21c   :  { %684 = vrsqrt.f32 %v445_v22  ;;  %v437_v29 = vmul.f32 0.015625, %v413_v26  ;;  %v428_v30 = vmul.f32 0.015625, %v386_v11 }
 0x21d   :  { %686 = vrsqrt.f32 %v450_v25 }
 0x21e   :  { %v679_v31 = vpop.eup %678  ;;  %v453_v33 = vadd.f32 1e-06, %v437_v29  ;;  %v444_v34 = vadd.f32 1e-06, %v428_v30 }
 0x21f   :  { %v475_v35 = vmul.f32 %v679_v31, %v997_v53  ;;  %v395_v38 = vpop.xlane.xlu1 %394  ;;  %v410_v41 = vpop.xlane.xlu0 %409 }
 0x220   :  { %688 = vrsqrt.f32 %v453_v33  ;;  %v431_v28 = vmul.f32 0.015625, %v395_v38  ;;  %v436_v46 = vmul.f32 0.015625, %v410_v41 }
 0x221   :  { %v498_v47 = vmul.f32 %v1092_v32, %v475_v35  ;;  %690 = vrsqrt.f32 %v444_v34 }
 0x222   :  { %v681_v48 = vpop.eup %680  ;;  %v447_v49 = vadd.f32 1e-06, %v431_v28  ;;  %v452_v23 = vadd.f32 1e-06, %v436_v46 }
 0x223   :  { %v683_v51 = vpop.eup %682  ;;  %v521_v57 = vadd.f32 %v1098_v42, %v498_v47  ;;  %v483_v53 = vmul.f32 %v681_v48, %v994_v52  ;;  %v419_v58 = vpop.xlane.xlu1 %418 }
 0x224   :  { %v392_v59 = vpop.xlane.xlu0 %391  ;;  %v474_v60 = vmul.f32 %v683_v51, %v1005_v63  ;;  %692 = vrsqrt.f32 %v447_v49  ;;  %v439_v61 = vmul.f32 0.015625, %v419_v58 }
 0x225   :  { %v430_v0 = vmul.f32 0.015625, %v392_v59  ;;  %537 = vst.msk [vmem:[#allocation2 + $0x8] sm:$0xff] %vm55_vm0, %v521_v57  ;;  %v506_v39 = vmul.f32 %v1092_v32, %v483_v53  ;;  %694 = vrsqrt.f32 %v452_v23 }
 0x226   :  { %v685_v40 = vpop.eup %684  ;;  %v497_v1 = vmul.f32 %v1092_v32, %v474_v60  ;;  %v455_v2 = vadd.f32 1e-06, %v439_v61 }
 0x227   :  { %v446_v3 = vadd.f32 1e-06, %v430_v0  ;;  %v687_v4 = vpop.eup %686  ;;  %v529_v52 = vadd.f32 %v1098_v42, %v506_v39  ;;  %v477_v43 = vmul.f32 %v685_v40, %v1002_v62  ;;  %v401_v44 = vpop.xlane.xlu1 %400 }
 0x228   :  { %v416_v63 = vpop.xlane.xlu0 %415  ;;  %v520_v54 = vadd.f32 %v1098_v42, %v497_v1  ;;  %v482_v6 = vmul.f32 %v687_v4, %v1018_v45  ;;  %696 = vrsqrt.f32 %v455_v2  ;;  %v433_v7 = vmul.f32 0.015625, %v401_v44 }
 0x229   :  { %545 = vst.msk [vmem:[#allocation2 + $0x48] sm:$0xff] %vm55_vm0, %v529_v52  ;;  %v500_v8 = vmul.f32 %v1092_v32, %v477_v43  ;;  %698 = vrsqrt.f32 %v446_v3  ;;  %v438_v9 = vmul.f32 0.015625, %v416_v63 }
 0x22a   :  { %v689_v10 = vpop.eup %688  ;;  %536 = vst.msk [vmem:[#allocation2] sm:$0xff] %vm55_vm0, %v520_v54  ;;  %v505_v13 = vmul.f32 %v1092_v32, %v482_v6  ;;  %v449_v62 = vadd.f32 1e-06, %v433_v7 }
 0x22b   :  { %v691_v14 = vpop.eup %690  ;;  %v523_v15 = vadd.f32 %v1098_v42, %v500_v8  ;;  %v485_v16 = vmul.f32 %v689_v10, %v1015_v5  ;;  %v454_v45 = vadd.f32 1e-06, %v438_v9  ;;  %v425_v19 = vpop.xlane.xlu1 %424 }
 0x22c   :  { %v398_v20 = vpop.xlane.xlu0 %397  ;;  %v528_v21 = vadd.f32 %v1098_v42, %v505_v13  ;;  %v476_v22 = vmul.f32 %v691_v14, %v1026_v55  ;;  %700 = vrsqrt.f32 %v449_v62  ;;  %v441_v25 = vmul.f32 0.015625, %v425_v19 }
 0x22d   :  { %539 = vst.msk [vmem:[#allocation2 + $0x18] sm:$0xff] %vm55_vm0, %v523_v15  ;;  %v508_v26 = vmul.f32 %v1092_v32, %v485_v16  ;;  %702 = vrsqrt.f32 %v454_v45  ;;  %v432_v11 = vmul.f32 0.015625, %v398_v20 }
 0x22e   :  { %v693_v29 = vpop.eup %692  ;;  %544 = vst.msk [vmem:[#allocation2 + $0x40] sm:$0xff] %vm55_vm0, %v528_v21  ;;  %v499_v5 = vmul.f32 %v1092_v32, %v476_v22  ;;  %v457_v30 = vadd.f32 1e-06, %v441_v25 }
 0x22f   :  { %v695_v31 = vpop.eup %694  ;;  %v531_v33 = vadd.f32 %v1098_v42, %v508_v26  ;;  %v479_v34 = vmul.f32 %v693_v29, %v1039_v12  ;;  %v448_v55 = vadd.f32 1e-06, %v432_v11 }
 0x230   :  { %v422_v35 = vpop.xlane.xlu0 %421  ;;  %v522_v38 = vadd.f32 %v1098_v42, %v499_v5  ;;  %v484_v41 = vmul.f32 %v695_v31, %v1029_v56  ;;  %704 = vrsqrt.f32 %v457_v30 }
 0x231   :  { %v440_v28 = vmul.f32 0.015625, %v422_v35  ;;  %547 = vst.msk [vmem:[#allocation2 + $0x58] sm:$0xff] %vm55_vm0, %v531_v33  ;;  %v502_v46 = vmul.f32 %v1092_v32, %v479_v34  ;;  %706 = vrsqrt.f32 %v448_v55 }
 0x232   :  { %v697_v47 = vpop.eup %696  ;;  %538 = vst.msk [vmem:[#allocation2 + $0x10] sm:$0xff] %vm55_vm0, %v522_v38  ;;  %v507_v48 = vmul.f32 %v1092_v32, %v484_v41 }
 0x233   :  { %v456_v49 = vadd.f32 1e-06, %v440_v28  ;;  %v699_v12 = vpop.eup %698  ;;  %v525_v23 = vadd.f32 %v1098_v42, %v502_v46  ;;  %v487_v51 = vmul.f32 %v697_v47, %v1050_v17 }
 0x234   :  { %v530_v56 = vadd.f32 %v1098_v42, %v507_v48  ;;  %v478_v57 = vmul.f32 %v699_v12, %v1042_v27 }
 0x235   :  { %708 = vrsqrt.f32 %v456_v49  ;;  %541 = vst.msk [vmem:[#allocation2 + $0x28] sm:$0xff] %vm55_vm0, %v525_v23  ;;  %v510_v53 = vmul.f32 %v1092_v32, %v487_v51 }
 0x236   :  { %v701_v58 = vpop.eup %700  ;;  %546 = vst.msk [vmem:[#allocation2 + $0x50] sm:$0xff] %vm55_vm0, %v530_v56  ;;  %v501_v59 = vmul.f32 %v1092_v32, %v478_v57 }
 0x237   :  { %v703_v60 = vpop.eup %702  ;;  %v533_v61 = vadd.f32 %v1098_v42, %v510_v53  ;;  %v481_v0 = vmul.f32 %v701_v58, %v1063_v24 }
 0x238   :  { %v524_v17 = vadd.f32 %v1098_v42, %v501_v59  ;;  %v486_v39 = vmul.f32 %v703_v60, %v1053_v18 }
 0x239   :  { %549 = vst.msk [vmem:[#allocation2 + $0x68] sm:$0xff] %vm55_vm0, %v533_v61  ;;  %v504_v27 = vmul.f32 %v1092_v32, %v481_v0 }
 0x23a   :  { %v705_v40 = vpop.eup %704  ;;  %540 = vst.msk [vmem:[#allocation2 + $0x20] sm:$0xff] %vm55_vm0, %v524_v17  ;;  %v509_v1 = vmul.f32 %v1092_v32, %v486_v39 }
 0x23b   :  { %v707_v2 = vpop.eup %706  ;;  %v527_v3 = vadd.f32 %v1098_v42, %v504_v27  ;;  %v489_v4 = vmul.f32 %v705_v40, %v1074_v36 }
 0x23c   :  { %v532_v24 = vadd.f32 %v1098_v42, %v509_v1  ;;  %v480_v52 = vmul.f32 %v707_v2, %v1066_v50 }
 0x23d   :  { %543 = vst.msk [vmem:[#allocation2 + $0x38] sm:$0xff] %vm55_vm0, %v527_v3  ;;  %v512_v18 = vmul.f32 %v1092_v32, %v489_v4 }
 0x23e   :  { %548 = vst.msk [vmem:[#allocation2 + $0x60] sm:$0xff] %vm55_vm0, %v532_v24  ;;  %v503_v44 = vmul.f32 %v1092_v32, %v480_v52 }
 0x23f   :  { %v709_v43 = vpop.eup %708  ;;  %v535_v63 = vadd.f32 %v1098_v42, %v512_v18 }
 0x240   :  { %v488_v54 = vmul.f32 %v709_v43, %v1077_v37  ;;  %v526_v6 = vadd.f32 %v1098_v42, %v503_v44 }
 0x241   :  { %551 = vst.msk [vmem:[#allocation2 + $0x78] sm:$0xff] %vm55_vm0, %v535_v63 }
 0x242   :  { %v511_v50 = vmul.f32 %v1092_v32, %v488_v54  ;;  %542 = vst.msk [vmem:[#allocation2 + $0x30] sm:$0xff] %vm55_vm0, %v526_v6 }
 0x244   :  { %v534_v36 = vadd.f32 %v1098_v42, %v511_v50 }
 0x246   :  { %550 = vst.msk [vmem:[#allocation2 + $0x70] sm:$0xff] %vm55_vm0, %v534_v36 }
 0x247   :  { %721 = shalt.err (!%p718_p4)
}
 0x248   :  { %s722_s30 = scalar_lea.hbm %s1181_s6, 2048 }
 0x249   :  { %p723_p5 = scmp.ne.s32.totalorder %s1181_s6, %s722_s30  ;;  %p726_p6 = scmp.lt.u32.totalorder %s722_s30, %s1181_s6 }
 0x24b   :  { %p728_p7 = pnand %p726_p6, %p723_p5 }
 0x24d   :  { %731 = shalt.err (!%p728_p7)
}
 0x24e   :  { %s735_s11 = smov 128   ;;  %s736_s12 = smov 8  }
 0x24f   :  { %563 = dma.vmem_to_hbm [thread:$0]  %s558_s5, 2048, %s1181_s6, [#allocation3], %s735_s11, %s735_s11, %s736_s12  }
 0x250   :  { %732 = dma.done.wait [#allocation3], 2048  }
 0x251   :  { %733 = vsyncadd [#allocation3], 4294965248 }
 0x252   :  { %567 = vsyncpa [#allocation3], 1 }

</bundles_post_ra>
